<compile_context>
chip_gen: v7x
topology: tpu7x:2x2x1
jax: 0.10.0
libtpu: 0.0.40
codegen_flags: <defaults>
</compile_context>

<pallas_src>
import functools
import math

import jax
import jax.numpy as jnp
from jax import lax
from jax.experimental import pallas as pl
from jax.experimental.pallas import tpu as pltpu

# --------------------------- config (small BERT-like) ---------------------------
VOCAB = 1024          # lane-aligned synthetic vocab
MAX_POS = 64
TYPE_VOCAB = 2
HIDDEN = 128          # lane-friendly hidden dim
N_HEADS = 4
HEAD_DIM = HIDDEN // N_HEADS
FFN = 256
N_LAYERS = 2
DROPOUT_P = 0.2       # EmbeddingClass self.dropout = nn.Dropout(0.2)
LN_EPS = 1e-12


# --------------------------- fused kernel helpers ---------------------------
def _mxdot(a, w):
    """MXU matmul: bf16 inputs, f32 accumulation."""
    return jnp.dot(a.astype(jnp.bfloat16), w.astype(jnp.bfloat16),
                   preferred_element_type=jnp.float32)


def _layernorm(x, g, b):
    mu = jnp.mean(x, axis=-1, keepdims=True)
    var = jnp.mean(jnp.square(x - mu), axis=-1, keepdims=True)
    return (x - mu) * lax.rsqrt(var + LN_EPS) * g + b


# --------------------------- the single fused Pallas kernel ---------------------------
def _bert_fused_kernel(ids_ref, tt_ref, tok_emb_ref, pos_emb_ref, type_emb_ref,
                       emb_g_ref, emb_b_ref,
                       wqkv_ref, bqkv_ref, wo_ref, bo_ref, ln1g_ref, ln1b_ref,
                       w1_ref, b1_ref, w2_ref, b2_ref, ln2g_ref, ln2b_ref,
                       wp_ref, bp_ref, rand_ref, o_ref, *, B, L, p):
    M = B * L

    # ---- BERT embeddings: token / position lookup as exact one-hot matmuls (f32) ----
    ids = ids_ref[...]                                         # [M, 1] int32
    tok_oh = (lax.broadcasted_iota(jnp.int32, (M, VOCAB), 1) == ids).astype(jnp.float32)
    h = jnp.dot(tok_oh, tok_emb_ref[...], preferred_element_type=jnp.float32)

    pos_idx = lax.broadcasted_iota(jnp.int32, (M, MAX_POS), 0) % L
    pos_oh = (lax.broadcasted_iota(jnp.int32, (M, MAX_POS), 1) == pos_idx).astype(jnp.float32)
    h = h + jnp.dot(pos_oh, pos_emb_ref[...], preferred_element_type=jnp.float32)

    tt = tt_ref[...]                                           # [M, 1] int32 in {0, 1}
    h = h + (type_emb_ref[0:1, :] * (tt == 0).astype(jnp.float32)
             + type_emb_ref[1:2, :] * (tt == 1).astype(jnp.float32))

    h = _layernorm(h, emb_g_ref[...], emb_b_ref[...])          # no zero-residual round trip

    scale = 1.0 / math.sqrt(HEAD_DIM)

    # ---- encoder layers, all intermediates VMEM-resident ----
    for l in range(N_LAYERS):
        qkv = _mxdot(h, wqkv_ref[l]) + bqkv_ref[l]             # [M, 3*HIDDEN], fused QKV

        batch_ctx = []
        for b in range(B):
            r0 = b * L
            head_ctx = []
            for hd in range(N_HEADS):
                c0 = hd * HEAD_DIM
                q = qkv[r0:r0 + L, c0:c0 + HEAD_DIM]
                k = qkv[r0:r0 + L, HIDDEN + c0:HIDDEN + c0 + HEAD_DIM]
                v = qkv[r0:r0 + L, 2 * HIDDEN + c0:2 * HIDDEN + c0 + HEAD_DIM]
                s = lax.dot_general(q, k, (((1,), (1,)), ((), ())),
                                    preferred_element_type=jnp.float32) * scale
                s = s - jnp.max(s, axis=-1, keepdims=True)
                e = jnp.exp(s)
                p_att = e / jnp.sum(e, axis=-1, keepdims=True)
                head_ctx.append(jnp.dot(p_att, v, preferred_element_type=jnp.float32))
            batch_ctx.append(jnp.concatenate(head_ctx, axis=1))   # [L, HIDDEN]
        ctx = jnp.concatenate(batch_ctx, axis=0)                  # [M, HIDDEN]

        attn_out = _mxdot(ctx, wo_ref[l]) + bo_ref[l]
        h = _layernorm(attn_out + h, ln1g_ref[l], ln1b_ref[l])    # post-LN

        # TODO(synk): HF BERT uses exact (erf) gelu; tanh approximation kept for safe lowering.
        ffn = jax.nn.gelu(_mxdot(h, w1_ref[l]) + b1_ref[l])
        ffn = _mxdot(ffn, w2_ref[l]) + b2_ref[l]
        h = _layernorm(ffn + h, ln2g_ref[l], ln2b_ref[l])         # post-LN

    # ---- pooler (CLS rows -> dense -> tanh) + dropout(0.2), fused in the same kernel ----
    cls = jnp.concatenate([h[b * L:b * L + 1, :] for b in range(B)], axis=0)   # [B, HIDDEN]
    pooled = jnp.tanh(_mxdot(cls, wp_ref[...]) + bp_ref[...])
    keep = (rand_ref[...] >= p).astype(jnp.float32)               # keep prob = 1 - p
    o_ref[...] = (pooled * keep * (1.0 / (1.0 - p))).astype(o_ref.dtype)


# --------------------------- parameter init (deterministic, synthetic) ---------------------------
def init_params(key):
    kit = iter(jax.random.split(key, 32))

    def nrm(shape, dtype=jnp.float32):
        return (0.02 * jax.random.normal(next(kit), shape, dtype=jnp.float32)).astype(dtype)

    bf = jnp.bfloat16   # MXU-side weights stored in bf16 (halves weight VMEM traffic)
    return {
        "tok_emb": nrm((VOCAB, HIDDEN)),
        "pos_emb": nrm((MAX_POS, HIDDEN)),
        "type_emb": nrm((TYPE_VOCAB, HIDDEN)),
        "emb_ln_g": jnp.ones((1, HIDDEN), jnp.float32),
        "emb_ln_b": jnp.zeros((1, HIDDEN), jnp.float32),
        # per-layer weights stacked along a leading N_LAYERS axis (one fused kernel loops over them)
        "wqkv": nrm((N_LAYERS, HIDDEN, 3 * HIDDEN), bf),
        "bqkv": jnp.zeros((N_LAYERS, 1, 3 * HIDDEN), jnp.float32),
        "wo": nrm((N_LAYERS, HIDDEN, HIDDEN), bf),
        "bo": jnp.zeros((N_LAYERS, 1, HIDDEN), jnp.float32),
        "ln1_g": jnp.ones((N_LAYERS, 1, HIDDEN), jnp.float32),
        "ln1_b": jnp.zeros((N_LAYERS, 1, HIDDEN), jnp.float32),
        "w1": nrm((N_LAYERS, HIDDEN, FFN), bf),
        "b1": jnp.zeros((N_LAYERS, 1, FFN), jnp.float32),
        "w2": nrm((N_LAYERS, FFN, HIDDEN), bf),
        "b2": jnp.zeros((N_LAYERS, 1, HIDDEN), jnp.float32),
        "ln2_g": jnp.ones((N_LAYERS, 1, HIDDEN), jnp.float32),
        "ln2_b": jnp.zeros((N_LAYERS, 1, HIDDEN), jnp.float32),
        "wp": nrm((HIDDEN, HIDDEN), bf),      # BertPooler dense
        "bp": jnp.zeros((1, HIDDEN), jnp.float32),
    }


# --------------------------- forward (EmbeddingClass.forward) ---------------------------
def embedding_class_forward(params, input_ids, token_type_ids=None, *, dropout_key):
    B, L = input_ids.shape
    assert L <= MAX_POS
    M = B * L
    if token_type_ids is None:
        token_type_ids = jnp.zeros((B, L), dtype=jnp.int32)

    ids2 = input_ids.reshape(M, 1).astype(jnp.int32)
    tt2 = token_type_ids.reshape(M, 1).astype(jnp.int32)
    # Portable dropout randomness (in-kernel pltpu.prng_seed does not lower on CPU/interpret).
    rand = jax.random.uniform(dropout_key, (B, HIDDEN), dtype=jnp.float32)

    kernel = functools.partial(_bert_fused_kernel, B=B, L=L, p=DROPOUT_P)
    # Total footprint (tables + all layer weights + activations) < 2 MiB: everything fits in
    # VMEM on v5e/v6e/v7x, so the whole model runs as a single VMEM-resident kernel.
    return pl.pallas_call(
        kernel,
        out_shape=jax.ShapeDtypeStruct((B, HIDDEN), jnp.float32),
        compiler_params=pltpu.CompilerParams(vmem_limit_bytes=32 * 1024 * 1024),
    )(ids2, tt2,
      params["tok_emb"], params["pos_emb"], params["type_emb"],
      params["emb_ln_g"], params["emb_ln_b"],
      params["wqkv"], params["bqkv"], params["wo"], params["bo"],
      params["ln1_g"], params["ln1_b"],
      params["w1"], params["b1"], params["w2"], params["b2"],
      params["ln2_g"], params["ln2_b"],
      params["wp"], params["bp"], rand)


if __name__ == "__main__":
    key = jax.random.PRNGKey(0)
    pkey, dkey, rkey = jax.random.split(key, 3)
    params = init_params(pkey)

    B, L = 2, 8
    input_ids = jax.random.randint(dkey, (B, L), 0, VOCAB, dtype=jnp.int32)

    emb = embedding_class_forward(params, input_ids, dropout_key=rkey)
    emb = jax.block_until_ready(emb)
    assert emb.shape == (B, HIDDEN) and emb.dtype == jnp.float32
    print("KERNEL_OK")
</pallas_src>

<mosaic_0001>
module attributes {stable_mosaic.version = 11 : i64} {
  func.func @_bert_fused_kernel(%arg0: memref<16x1xi32, #tpu.memory_space<vmem>>, %arg1: memref<16x1xi32, #tpu.memory_space<vmem>>, %arg2: memref<1024x128xf32, #tpu.memory_space<vmem>>, %arg3: memref<64x128xf32, #tpu.memory_space<vmem>>, %arg4: memref<2x128xf32, #tpu.memory_space<vmem>>, %arg5: memref<1x128xf32, #tpu.memory_space<vmem>>, %arg6: memref<1x128xf32, #tpu.memory_space<vmem>>, %arg7: memref<2x128x384xbf16, #tpu.memory_space<vmem>>, %arg8: memref<2x1x384xf32, #tpu.memory_space<vmem>>, %arg9: memref<2x128x128xbf16, #tpu.memory_space<vmem>>, %arg10: memref<2x1x128xf32, #tpu.memory_space<vmem>>, %arg11: memref<2x1x128xf32, #tpu.memory_space<vmem>>, %arg12: memref<2x1x128xf32, #tpu.memory_space<vmem>>, %arg13: memref<2x128x256xbf16, #tpu.memory_space<vmem>>, %arg14: memref<2x1x256xf32, #tpu.memory_space<vmem>>, %arg15: memref<2x256x128xbf16, #tpu.memory_space<vmem>>, %arg16: memref<2x1x128xf32, #tpu.memory_space<vmem>>, %arg17: memref<2x1x128xf32, #tpu.memory_space<vmem>>, %arg18: memref<2x1x128xf32, #tpu.memory_space<vmem>>, %arg19: memref<128x128xbf16, #tpu.memory_space<vmem>>, %arg20: memref<1x128xf32, #tpu.memory_space<vmem>>, %arg21: memref<2x128xf32, #tpu.memory_space<vmem>>, %arg22: memref<2x128xf32, #tpu.memory_space<vmem>>) attributes {dimension_semantics = [], scalar_prefetch = 0 : i64, scratch_operands = 0 : i64, tpu.core_type = #tpu.core_type<tc>} {
    %c0 = arith.constant 0 : index
    %c0_0 = arith.constant 0 : index
    %0 = vector.load %arg0[%c0, %c0_0] : memref<16x1xi32, #tpu.memory_space<vmem>>, vector<16x1xi32>
    %1 = tpu.iota {dimensions = array<i32: 1>} : vector<16x1024xi32>
    %2 = vector.broadcast %0 : vector<16x1xi32> to vector<16x1024xi32>
    %3 = arith.cmpi eq, %1, %2 : vector<16x1024xi32>
    %4 = arith.extui %3 : vector<16x1024xi1> to vector<16x1024xi32>
    %5 = arith.sitofp %4 : vector<16x1024xi32> to vector<16x1024xf32>
    %c0_1 = arith.constant 0 : index
    %c0_2 = arith.constant 0 : index
    %6 = vector.load %arg2[%c0_1, %c0_2] : memref<1024x128xf32, #tpu.memory_space<vmem>>, vector<1024x128xf32>
    %cst = arith.constant dense<0.000000e+00> : vector<16x128xf32>
    %7 = tpu.matmul %5, %6, %cst {dimension_numbers = #tpu.dot_dimension_numbers<[1], [0], [0], [1], [0, 0, 1, 1], [], []>} : vector<16x1024xf32>, vector<1024x128xf32>, vector<16x128xf32> -> vector<16x128xf32>
    %8 = tpu.iota {dimensions = array<i32: 0>} : vector<16x64xi32>
    %c8_i32 = arith.constant 8 : i32
    %c0_i32 = arith.constant 0 : i32
    %9 = arith.cmpi eq, %c8_i32, %c0_i32 : i32
    %c1_i32 = arith.constant 1 : i32
    %10 = arith.select %9, %c1_i32, %c8_i32 : i32
    %11 = vector.broadcast %10 : i32 to vector<16x64xi32>
    %12 = arith.remsi %8, %11 : vector<16x64xi32>
    %c0_i32_3 = arith.constant 0 : i32
    %13 = vector.broadcast %c0_i32_3 : i32 to vector<16x64xi32>
    %14 = arith.cmpi ne, %12, %13 : vector<16x64xi32>
    %c0_i32_4 = arith.constant 0 : i32
    %15 = vector.broadcast %c0_i32_4 : i32 to vector<16x64xi32>
    %16 = arith.cmpi slt, %12, %15 : vector<16x64xi32>
    %c0_i32_5 = arith.constant 0 : i32
    %17 = arith.cmpi slt, %10, %c0_i32_5 : i32
    %18 = vector.broadcast %17 : i1 to vector<16x64xi1>
    %19 = vector.broadcast %18 : vector<16x64xi1> to vector<16x64xi1>
    %20 = arith.xori %16, %19 : vector<16x64xi1>
    %21 = arith.andi %20, %14 : vector<16x64xi1>
    %22 = vector.broadcast %10 : i32 to vector<16x64xi32>
    %23 = arith.addi %12, %22 : vector<16x64xi32>
    %24 = arith.select %21, %23, %12 : vector<16x64xi1>, vector<16x64xi32>
    %25 = tpu.iota {dimensions = array<i32: 1>} : vector<16x64xi32>
    %26 = arith.cmpi eq, %25, %24 : vector<16x64xi32>
    %27 = arith.extui %26 : vector<16x64xi1> to vector<16x64xi32>
    %28 = arith.sitofp %27 : vector<16x64xi32> to vector<16x64xf32>
    %c0_6 = arith.constant 0 : index
    %c0_7 = arith.constant 0 : index
    %29 = vector.load %arg3[%c0_6, %c0_7] : memref<64x128xf32, #tpu.memory_space<vmem>>, vector<64x128xf32>
    %cst_8 = arith.constant dense<0.000000e+00> : vector<16x128xf32>
    %30 = tpu.matmul %28, %29, %cst_8 {dimension_numbers = #tpu.dot_dimension_numbers<[1], [0], [0], [1], [0, 0, 1, 1], [], []>} : vector<16x64xf32>, vector<64x128xf32>, vector<16x128xf32> -> vector<16x128xf32>
    %31 = arith.addf %7, %30 : vector<16x128xf32>
    %c0_9 = arith.constant 0 : index
    %c0_10 = arith.constant 0 : index
    %32 = vector.load %arg1[%c0_9, %c0_10] : memref<16x1xi32, #tpu.memory_space<vmem>>, vector<16x1xi32>
    %c0_11 = arith.constant 0 : index
    %c0_12 = arith.constant 0 : index
    %33 = vector.load %arg4[%c0_11, %c0_12] : memref<2x128xf32, #tpu.memory_space<vmem>>, vector<1x128xf32>
    %c0_i32_13 = arith.constant 0 : i32
    %34 = vector.broadcast %c0_i32_13 : i32 to vector<16x1xi32>
    %35 = arith.cmpi eq, %32, %34 : vector<16x1xi32>
    %36 = arith.extui %35 : vector<16x1xi1> to vector<16x1xi32>
    %37 = arith.sitofp %36 : vector<16x1xi32> to vector<16x1xf32>
    %38 = vector.broadcast %33 : vector<1x128xf32> to vector<16x128xf32>
    %39 = vector.broadcast %37 : vector<16x1xf32> to vector<16x128xf32>
    %40 = arith.mulf %38, %39 : vector<16x128xf32>
    %c1 = arith.constant 1 : index
    %c0_14 = arith.constant 0 : index
    %41 = vector.load %arg4[%c1, %c0_14] : memref<2x128xf32, #tpu.memory_space<vmem>>, vector<1x128xf32>
    %c1_i32_15 = arith.constant 1 : i32
    %42 = vector.broadcast %c1_i32_15 : i32 to vector<16x1xi32>
    %43 = arith.cmpi eq, %32, %42 : vector<16x1xi32>
    %44 = arith.extui %43 : vector<16x1xi1> to vector<16x1xi32>
    %45 = arith.sitofp %44 : vector<16x1xi32> to vector<16x1xf32>
    %46 = vector.broadcast %41 : vector<1x128xf32> to vector<16x128xf32>
    %47 = vector.broadcast %45 : vector<16x1xf32> to vector<16x128xf32>
    %48 = arith.mulf %46, %47 : vector<16x128xf32>
    %49 = arith.addf %40, %48 : vector<16x128xf32>
    %50 = arith.addf %31, %49 : vector<16x128xf32>
    %c0_16 = arith.constant 0 : index
    %c0_17 = arith.constant 0 : index
    %51 = vector.load %arg5[%c0_16, %c0_17] : memref<1x128xf32, #tpu.memory_space<vmem>>, vector<1x128xf32>
    %c0_18 = arith.constant 0 : index
    %c0_19 = arith.constant 0 : index
    %52 = vector.load %arg6[%c0_18, %c0_19] : memref<1x128xf32, #tpu.memory_space<vmem>>, vector<1x128xf32>
    %cst_20 = arith.constant dense<0.000000e+00> : vector<16xf32>
    %53 = vector.multi_reduction <add>, %50, %cst_20 [1] : vector<16x128xf32> to vector<16xf32>
    %54 = vector.shape_cast %53 : vector<16xf32> to vector<16x1xf32>
    %cst_21 = arith.constant 1.280000e+02 : f32
    %55 = vector.broadcast %cst_21 : f32 to vector<16x1xf32>
    %56 = arith.divf %54, %55 : vector<16x1xf32>
    %57 = vector.broadcast %56 : vector<16x1xf32> to vector<16x128xf32>
    %58 = arith.subf %50, %57 : vector<16x128xf32>
    %59 = arith.mulf %58, %58 : vector<16x128xf32>
    %cst_22 = arith.constant dense<0.000000e+00> : vector<16xf32>
    %60 = vector.multi_reduction <add>, %59, %cst_22 [1] : vector<16x128xf32> to vector<16xf32>
    %61 = vector.shape_cast %60 : vector<16xf32> to vector<16x1xf32>
    %cst_23 = arith.constant 1.280000e+02 : f32
    %62 = vector.broadcast %cst_23 : f32 to vector<16x1xf32>
    %63 = arith.divf %61, %62 : vector<16x1xf32>
    %64 = vector.broadcast %56 : vector<16x1xf32> to vector<16x128xf32>
    %65 = arith.subf %50, %64 : vector<16x128xf32>
    %cst_24 = arith.constant 9.99999996E-13 : f32
    %66 = vector.broadcast %cst_24 : f32 to vector<16x1xf32>
    %67 = arith.addf %63, %66 : vector<16x1xf32>
    %68 = math.rsqrt %67 : vector<16x1xf32>
    %69 = vector.broadcast %68 : vector<16x1xf32> to vector<16x128xf32>
    %70 = arith.mulf %65, %69 : vector<16x128xf32>
    %71 = vector.broadcast %51 : vector<1x128xf32> to vector<16x128xf32>
    %72 = arith.mulf %70, %71 : vector<16x128xf32>
    %73 = vector.broadcast %52 : vector<1x128xf32> to vector<16x128xf32>
    %74 = arith.addf %72, %73 : vector<16x128xf32>
    %c0_25 = arith.constant 0 : index
    %c0_26 = arith.constant 0 : index
    %c0_27 = arith.constant 0 : index
    %75 = vector.load %arg7[%c0_25, %c0_26, %c0_27] : memref<2x128x384xbf16, #tpu.memory_space<vmem>>, vector<1x128x384xbf16>
    %76 = vector.shape_cast %75 : vector<1x128x384xbf16> to vector<128x384xbf16>
    %77 = arith.truncf %74 : vector<16x128xf32> to vector<16x128xbf16>
    %cst_28 = arith.constant dense<0.000000e+00> : vector<16x384xf32>
    %78 = tpu.matmul %77, %76, %cst_28 {dimension_numbers = #tpu.dot_dimension_numbers<[1], [0], [0], [1], [0, 0, 1, 1], [], []>} : vector<16x128xbf16>, vector<128x384xbf16>, vector<16x384xf32> -> vector<16x384xf32>
    %c0_29 = arith.constant 0 : index
    %c0_30 = arith.constant 0 : index
    %c0_31 = arith.constant 0 : index
    %79 = vector.load %arg8[%c0_29, %c0_30, %c0_31] : memref<2x1x384xf32, #tpu.memory_space<vmem>>, vector<1x1x384xf32>
    %80 = vector.shape_cast %79 : vector<1x1x384xf32> to vector<1x384xf32>
    %81 = vector.broadcast %80 : vector<1x384xf32> to vector<16x384xf32>
    %82 = arith.addf %78, %81 : vector<16x384xf32>
    %83 = vector.extract_strided_slice %82 {offsets = [0, 0], sizes = [8, 32], strides = [1, 1]} : vector<16x384xf32> to vector<8x32xf32>
    %84 = vector.extract_strided_slice %82 {offsets = [0, 128], sizes = [8, 32], strides = [1, 1]} : vector<16x384xf32> to vector<8x32xf32>
    %85 = vector.extract_strided_slice %82 {offsets = [0, 256], sizes = [8, 32], strides = [1, 1]} : vector<16x384xf32> to vector<8x32xf32>
    %cst_32 = arith.constant dense<0.000000e+00> : vector<8x8xf32>
    %86 = tpu.matmul %83, %84, %cst_32 {dimension_numbers = #tpu.dot_dimension_numbers<[1], [1], [0], [0], [0, 0, 1, 0], [], []>} : vector<8x32xf32>, vector<8x32xf32>, vector<8x8xf32> -> vector<8x8xf32>
    %cst_33 = arith.constant 0.176776692 : f32
    %87 = vector.broadcast %cst_33 : f32 to vector<8x8xf32>
    %88 = arith.mulf %86, %87 : vector<8x8xf32>
    %cst_34 = arith.constant dense<0xFF800000> : vector<8xf32>
    %89 = vector.multi_reduction <maximumf>, %88, %cst_34 [1] : vector<8x8xf32> to vector<8xf32>
    %90 = vector.shape_cast %89 : vector<8xf32> to vector<8x1xf32>
    %91 = vector.broadcast %90 : vector<8x1xf32> to vector<8x8xf32>
    %92 = arith.subf %88, %91 : vector<8x8xf32>
    %93 = math.exp %92 : vector<8x8xf32>
    %cst_35 = arith.constant dense<0.000000e+00> : vector<8xf32>
    %94 = vector.multi_reduction <add>, %93, %cst_35 [1] : vector<8x8xf32> to vector<8xf32>
    %95 = vector.shape_cast %94 : vector<8xf32> to vector<8x1xf32>
    %96 = vector.broadcast %95 : vector<8x1xf32> to vector<8x8xf32>
    %97 = arith.divf %93, %96 : vector<8x8xf32>
    %cst_36 = arith.constant dense<0.000000e+00> : vector<8x32xf32>
    %98 = tpu.matmul %97, %85, %cst_36 {dimension_numbers = #tpu.dot_dimension_numbers<[1], [0], [0], [1], [0, 0, 1, 1], [], []>} : vector<8x8xf32>, vector<8x32xf32>, vector<8x32xf32> -> vector<8x32xf32>
    %99 = vector.extract_strided_slice %82 {offsets = [0, 32], sizes = [8, 32], strides = [1, 1]} : vector<16x384xf32> to vector<8x32xf32>
    %100 = vector.extract_strided_slice %82 {offsets = [0, 160], sizes = [8, 32], strides = [1, 1]} : vector<16x384xf32> to vector<8x32xf32>
    %101 = vector.extract_strided_slice %82 {offsets = [0, 288], sizes = [8, 32], strides = [1, 1]} : vector<16x384xf32> to vector<8x32xf32>
    %cst_37 = arith.constant dense<0.000000e+00> : vector<8x8xf32>
    %102 = tpu.matmul %99, %100, %cst_37 {dimension_numbers = #tpu.dot_dimension_numbers<[1], [1], [0], [0], [0, 0, 1, 0], [], []>} : vector<8x32xf32>, vector<8x32xf32>, vector<8x8xf32> -> vector<8x8xf32>
    %cst_38 = arith.constant 0.176776692 : f32
    %103 = vector.broadcast %cst_38 : f32 to vector<8x8xf32>
    %104 = arith.mulf %102, %103 : vector<8x8xf32>
    %cst_39 = arith.constant dense<0xFF800000> : vector<8xf32>
    %105 = vector.multi_reduction <maximumf>, %104, %cst_39 [1] : vector<8x8xf32> to vector<8xf32>
    %106 = vector.shape_cast %105 : vector<8xf32> to vector<8x1xf32>
    %107 = vector.broadcast %106 : vector<8x1xf32> to vector<8x8xf32>
    %108 = arith.subf %104, %107 : vector<8x8xf32>
    %109 = math.exp %108 : vector<8x8xf32>
    %cst_40 = arith.constant dense<0.000000e+00> : vector<8xf32>
    %110 = vector.multi_reduction <add>, %109, %cst_40 [1] : vector<8x8xf32> to vector<8xf32>
    %111 = vector.shape_cast %110 : vector<8xf32> to vector<8x1xf32>
    %112 = vector.broadcast %111 : vector<8x1xf32> to vector<8x8xf32>
    %113 = arith.divf %109, %112 : vector<8x8xf32>
    %cst_41 = arith.constant dense<0.000000e+00> : vector<8x32xf32>
    %114 = tpu.matmul %113, %101, %cst_41 {dimension_numbers = #tpu.dot_dimension_numbers<[1], [0], [0], [1], [0, 0, 1, 1], [], []>} : vector<8x8xf32>, vector<8x32xf32>, vector<8x32xf32> -> vector<8x32xf32>
    %115 = vector.extract_strided_slice %82 {offsets = [0, 64], sizes = [8, 32], strides = [1, 1]} : vector<16x384xf32> to vector<8x32xf32>
    %116 = vector.extract_strided_slice %82 {offsets = [0, 192], sizes = [8, 32], strides = [1, 1]} : vector<16x384xf32> to vector<8x32xf32>
    %117 = vector.extract_strided_slice %82 {offsets = [0, 320], sizes = [8, 32], strides = [1, 1]} : vector<16x384xf32> to vector<8x32xf32>
    %cst_42 = arith.constant dense<0.000000e+00> : vector<8x8xf32>
    %118 = tpu.matmul %115, %116, %cst_42 {dimension_numbers = #tpu.dot_dimension_numbers<[1], [1], [0], [0], [0, 0, 1, 0], [], []>} : vector<8x32xf32>, vector<8x32xf32>, vector<8x8xf32> -> vector<8x8xf32>
    %cst_43 = arith.constant 0.176776692 : f32
    %119 = vector.broadcast %cst_43 : f32 to vector<8x8xf32>
    %120 = arith.mulf %118, %119 : vector<8x8xf32>
    %cst_44 = arith.constant dense<0xFF800000> : vector<8xf32>
    %121 = vector.multi_reduction <maximumf>, %120, %cst_44 [1] : vector<8x8xf32> to vector<8xf32>
    %122 = vector.shape_cast %121 : vector<8xf32> to vector<8x1xf32>
    %123 = vector.broadcast %122 : vector<8x1xf32> to vector<8x8xf32>
    %124 = arith.subf %120, %123 : vector<8x8xf32>
    %125 = math.exp %124 : vector<8x8xf32>
    %cst_45 = arith.constant dense<0.000000e+00> : vector<8xf32>
    %126 = vector.multi_reduction <add>, %125, %cst_45 [1] : vector<8x8xf32> to vector<8xf32>
    %127 = vector.shape_cast %126 : vector<8xf32> to vector<8x1xf32>
    %128 = vector.broadcast %127 : vector<8x1xf32> to vector<8x8xf32>
    %129 = arith.divf %125, %128 : vector<8x8xf32>
    %cst_46 = arith.constant dense<0.000000e+00> : vector<8x32xf32>
    %130 = tpu.matmul %129, %117, %cst_46 {dimension_numbers = #tpu.dot_dimension_numbers<[1], [0], [0], [1], [0, 0, 1, 1], [], []>} : vector<8x8xf32>, vector<8x32xf32>, vector<8x32xf32> -> vector<8x32xf32>
    %131 = vector.extract_strided_slice %82 {offsets = [0, 96], sizes = [8, 32], strides = [1, 1]} : vector<16x384xf32> to vector<8x32xf32>
    %132 = vector.extract_strided_slice %82 {offsets = [0, 224], sizes = [8, 32], strides = [1, 1]} : vector<16x384xf32> to vector<8x32xf32>
    %133 = vector.extract_strided_slice %82 {offsets = [0, 352], sizes = [8, 32], strides = [1, 1]} : vector<16x384xf32> to vector<8x32xf32>
    %cst_47 = arith.constant dense<0.000000e+00> : vector<8x8xf32>
    %134 = tpu.matmul %131, %132, %cst_47 {dimension_numbers = #tpu.dot_dimension_numbers<[1], [1], [0], [0], [0, 0, 1, 0], [], []>} : vector<8x32xf32>, vector<8x32xf32>, vector<8x8xf32> -> vector<8x8xf32>
    %cst_48 = arith.constant 0.176776692 : f32
    %135 = vector.broadcast %cst_48 : f32 to vector<8x8xf32>
    %136 = arith.mulf %134, %135 : vector<8x8xf32>
    %cst_49 = arith.constant dense<0xFF800000> : vector<8xf32>
    %137 = vector.multi_reduction <maximumf>, %136, %cst_49 [1] : vector<8x8xf32> to vector<8xf32>
    %138 = vector.shape_cast %137 : vector<8xf32> to vector<8x1xf32>
    %139 = vector.broadcast %138 : vector<8x1xf32> to vector<8x8xf32>
    %140 = arith.subf %136, %139 : vector<8x8xf32>
    %141 = math.exp %140 : vector<8x8xf32>
    %cst_50 = arith.constant dense<0.000000e+00> : vector<8xf32>
    %142 = vector.multi_reduction <add>, %141, %cst_50 [1] : vector<8x8xf32> to vector<8xf32>
    %143 = vector.shape_cast %142 : vector<8xf32> to vector<8x1xf32>
    %144 = vector.broadcast %143 : vector<8x1xf32> to vector<8x8xf32>
    %145 = arith.divf %141, %144 : vector<8x8xf32>
    %cst_51 = arith.constant dense<0.000000e+00> : vector<8x32xf32>
    %146 = tpu.matmul %145, %133, %cst_51 {dimension_numbers = #tpu.dot_dimension_numbers<[1], [0], [0], [1], [0, 0, 1, 1], [], []>} : vector<8x8xf32>, vector<8x32xf32>, vector<8x32xf32> -> vector<8x32xf32>
    %147 = tpu.concatenate %98, %114, %130, %146 in 1 : vector<8x32xf32>, vector<8x32xf32>, vector<8x32xf32>, vector<8x32xf32> -> vector<8x128xf32>
    %148 = vector.extract_strided_slice %82 {offsets = [8, 0], sizes = [8, 32], strides = [1, 1]} : vector<16x384xf32> to vector<8x32xf32>
    %149 = vector.extract_strided_slice %82 {offsets = [8, 128], sizes = [8, 32], strides = [1, 1]} : vector<16x384xf32> to vector<8x32xf32>
    %150 = vector.extract_strided_slice %82 {offsets = [8, 256], sizes = [8, 32], strides = [1, 1]} : vector<16x384xf32> to vector<8x32xf32>
    %cst_52 = arith.constant dense<0.000000e+00> : vector<8x8xf32>
    %151 = tpu.matmul %148, %149, %cst_52 {dimension_numbers = #tpu.dot_dimension_numbers<[1], [1], [0], [0], [0, 0, 1, 0], [], []>} : vector<8x32xf32>, vector<8x32xf32>, vector<8x8xf32> -> vector<8x8xf32>
    %cst_53 = arith.constant 0.176776692 : f32
    %152 = vector.broadcast %cst_53 : f32 to vector<8x8xf32>
    %153 = arith.mulf %151, %152 : vector<8x8xf32>
    %cst_54 = arith.constant dense<0xFF800000> : vector<8xf32>
    %154 = vector.multi_reduction <maximumf>, %153, %cst_54 [1] : vector<8x8xf32> to vector<8xf32>
    %155 = vector.shape_cast %154 : vector<8xf32> to vector<8x1xf32>
    %156 = vector.broadcast %155 : vector<8x1xf32> to vector<8x8xf32>
    %157 = arith.subf %153, %156 : vector<8x8xf32>
    %158 = math.exp %157 : vector<8x8xf32>
    %cst_55 = arith.constant dense<0.000000e+00> : vector<8xf32>
    %159 = vector.multi_reduction <add>, %158, %cst_55 [1] : vector<8x8xf32> to vector<8xf32>
    %160 = vector.shape_cast %159 : vector<8xf32> to vector<8x1xf32>
    %161 = vector.broadcast %160 : vector<8x1xf32> to vector<8x8xf32>
    %162 = arith.divf %158, %161 : vector<8x8xf32>
    %cst_56 = arith.constant dense<0.000000e+00> : vector<8x32xf32>
    %163 = tpu.matmul %162, %150, %cst_56 {dimension_numbers = #tpu.dot_dimension_numbers<[1], [0], [0], [1], [0, 0, 1, 1], [], []>} : vector<8x8xf32>, vector<8x32xf32>, vector<8x32xf32> -> vector<8x32xf32>
    %164 = vector.extract_strided_slice %82 {offsets = [8, 32], sizes = [8, 32], strides = [1, 1]} : vector<16x384xf32> to vector<8x32xf32>
    %165 = vector.extract_strided_slice %82 {offsets = [8, 160], sizes = [8, 32], strides = [1, 1]} : vector<16x384xf32> to vector<8x32xf32>
    %166 = vector.extract_strided_slice %82 {offsets = [8, 288], sizes = [8, 32], strides = [1, 1]} : vector<16x384xf32> to vector<8x32xf32>
    %cst_57 = arith.constant dense<0.000000e+00> : vector<8x8xf32>
    %167 = tpu.matmul %164, %165, %cst_57 {dimension_numbers = #tpu.dot_dimension_numbers<[1], [1], [0], [0], [0, 0, 1, 0], [], []>} : vector<8x32xf32>, vector<8x32xf32>, vector<8x8xf32> -> vector<8x8xf32>
    %cst_58 = arith.constant 0.176776692 : f32
    %168 = vector.broadcast %cst_58 : f32 to vector<8x8xf32>
    %169 = arith.mulf %167, %168 : vector<8x8xf32>
    %cst_59 = arith.constant dense<0xFF800000> : vector<8xf32>
    %170 = vector.multi_reduction <maximumf>, %169, %cst_59 [1] : vector<8x8xf32> to vector<8xf32>
    %171 = vector.shape_cast %170 : vector<8xf32> to vector<8x1xf32>
    %172 = vector.broadcast %171 : vector<8x1xf32> to vector<8x8xf32>
    %173 = arith.subf %169, %172 : vector<8x8xf32>
    %174 = math.exp %173 : vector<8x8xf32>
    %cst_60 = arith.constant dense<0.000000e+00> : vector<8xf32>
    %175 = vector.multi_reduction <add>, %174, %cst_60 [1] : vector<8x8xf32> to vector<8xf32>
    %176 = vector.shape_cast %175 : vector<8xf32> to vector<8x1xf32>
    %177 = vector.broadcast %176 : vector<8x1xf32> to vector<8x8xf32>
    %178 = arith.divf %174, %177 : vector<8x8xf32>
    %cst_61 = arith.constant dense<0.000000e+00> : vector<8x32xf32>
    %179 = tpu.matmul %178, %166, %cst_61 {dimension_numbers = #tpu.dot_dimension_numbers<[1], [0], [0], [1], [0, 0, 1, 1], [], []>} : vector<8x8xf32>, vector<8x32xf32>, vector<8x32xf32> -> vector<8x32xf32>
    %180 = vector.extract_strided_slice %82 {offsets = [8, 64], sizes = [8, 32], strides = [1, 1]} : vector<16x384xf32> to vector<8x32xf32>
    %181 = vector.extract_strided_slice %82 {offsets = [8, 192], sizes = [8, 32], strides = [1, 1]} : vector<16x384xf32> to vector<8x32xf32>
    %182 = vector.extract_strided_slice %82 {offsets = [8, 320], sizes = [8, 32], strides = [1, 1]} : vector<16x384xf32> to vector<8x32xf32>
    %cst_62 = arith.constant dense<0.000000e+00> : vector<8x8xf32>
    %183 = tpu.matmul %180, %181, %cst_62 {dimension_numbers = #tpu.dot_dimension_numbers<[1], [1], [0], [0], [0, 0, 1, 0], [], []>} : vector<8x32xf32>, vector<8x32xf32>, vector<8x8xf32> -> vector<8x8xf32>
    %cst_63 = arith.constant 0.176776692 : f32
    %184 = vector.broadcast %cst_63 : f32 to vector<8x8xf32>
    %185 = arith.mulf %183, %184 : vector<8x8xf32>
    %cst_64 = arith.constant dense<0xFF800000> : vector<8xf32>
    %186 = vector.multi_reduction <maximumf>, %185, %cst_64 [1] : vector<8x8xf32> to vector<8xf32>
    %187 = vector.shape_cast %186 : vector<8xf32> to vector<8x1xf32>
    %188 = vector.broadcast %187 : vector<8x1xf32> to vector<8x8xf32>
    %189 = arith.subf %185, %188 : vector<8x8xf32>
    %190 = math.exp %189 : vector<8x8xf32>
    %cst_65 = arith.constant dense<0.000000e+00> : vector<8xf32>
    %191 = vector.multi_reduction <add>, %190, %cst_65 [1] : vector<8x8xf32> to vector<8xf32>
    %192 = vector.shape_cast %191 : vector<8xf32> to vector<8x1xf32>
    %193 = vector.broadcast %192 : vector<8x1xf32> to vector<8x8xf32>
    %194 = arith.divf %190, %193 : vector<8x8xf32>
    %cst_66 = arith.constant dense<0.000000e+00> : vector<8x32xf32>
    %195 = tpu.matmul %194, %182, %cst_66 {dimension_numbers = #tpu.dot_dimension_numbers<[1], [0], [0], [1], [0, 0, 1, 1], [], []>} : vector<8x8xf32>, vector<8x32xf32>, vector<8x32xf32> -> vector<8x32xf32>
    %196 = vector.extract_strided_slice %82 {offsets = [8, 96], sizes = [8, 32], strides = [1, 1]} : vector<16x384xf32> to vector<8x32xf32>
    %197 = vector.extract_strided_slice %82 {offsets = [8, 224], sizes = [8, 32], strides = [1, 1]} : vector<16x384xf32> to vector<8x32xf32>
    %198 = vector.extract_strided_slice %82 {offsets = [8, 352], sizes = [8, 32], strides = [1, 1]} : vector<16x384xf32> to vector<8x32xf32>
    %cst_67 = arith.constant dense<0.000000e+00> : vector<8x8xf32>
    %199 = tpu.matmul %196, %197, %cst_67 {dimension_numbers = #tpu.dot_dimension_numbers<[1], [1], [0], [0], [0, 0, 1, 0], [], []>} : vector<8x32xf32>, vector<8x32xf32>, vector<8x8xf32> -> vector<8x8xf32>
    %cst_68 = arith.constant 0.176776692 : f32
    %200 = vector.broadcast %cst_68 : f32 to vector<8x8xf32>
    %201 = arith.mulf %199, %200 : vector<8x8xf32>
    %cst_69 = arith.constant dense<0xFF800000> : vector<8xf32>
    %202 = vector.multi_reduction <maximumf>, %201, %cst_69 [1] : vector<8x8xf32> to vector<8xf32>
    %203 = vector.shape_cast %202 : vector<8xf32> to vector<8x1xf32>
    %204 = vector.broadcast %203 : vector<8x1xf32> to vector<8x8xf32>
    %205 = arith.subf %201, %204 : vector<8x8xf32>
    %206 = math.exp %205 : vector<8x8xf32>
    %cst_70 = arith.constant dense<0.000000e+00> : vector<8xf32>
    %207 = vector.multi_reduction <add>, %206, %cst_70 [1] : vector<8x8xf32> to vector<8xf32>
    %208 = vector.shape_cast %207 : vector<8xf32> to vector<8x1xf32>
    %209 = vector.broadcast %208 : vector<8x1xf32> to vector<8x8xf32>
    %210 = arith.divf %206, %209 : vector<8x8xf32>
    %cst_71 = arith.constant dense<0.000000e+00> : vector<8x32xf32>
    %211 = tpu.matmul %210, %198, %cst_71 {dimension_numbers = #tpu.dot_dimension_numbers<[1], [0], [0], [1], [0, 0, 1, 1], [], []>} : vector<8x8xf32>, vector<8x32xf32>, vector<8x32xf32> -> vector<8x32xf32>
    %212 = tpu.concatenate %163, %179, %195, %211 in 1 : vector<8x32xf32>, vector<8x32xf32>, vector<8x32xf32>, vector<8x32xf32> -> vector<8x128xf32>
    %213 = tpu.concatenate %147, %212 in 0 : vector<8x128xf32>, vector<8x128xf32> -> vector<16x128xf32>
    %c0_72 = arith.constant 0 : index
    %c0_73 = arith.constant 0 : index
    %c0_74 = arith.constant 0 : index
    %214 = vector.load %arg9[%c0_72, %c0_73, %c0_74] : memref<2x128x128xbf16, #tpu.memory_space<vmem>>, vector<1x128x128xbf16>
    %215 = vector.shape_cast %214 : vector<1x128x128xbf16> to vector<128x128xbf16>
    %216 = arith.truncf %213 : vector<16x128xf32> to vector<16x128xbf16>
    %cst_75 = arith.constant dense<0.000000e+00> : vector<16x128xf32>
    %217 = tpu.matmul %216, %215, %cst_75 {dimension_numbers = #tpu.dot_dimension_numbers<[1], [0], [0], [1], [0, 0, 1, 1], [], []>} : vector<16x128xbf16>, vector<128x128xbf16>, vector<16x128xf32> -> vector<16x128xf32>
    %c0_76 = arith.constant 0 : index
    %c0_77 = arith.constant 0 : index
    %c0_78 = arith.constant 0 : index
    %218 = vector.load %arg10[%c0_76, %c0_77, %c0_78] : memref<2x1x128xf32, #tpu.memory_space<vmem>>, vector<1x1x128xf32>
    %219 = vector.shape_cast %218 : vector<1x1x128xf32> to vector<1x128xf32>
    %220 = vector.broadcast %219 : vector<1x128xf32> to vector<16x128xf32>
    %221 = arith.addf %217, %220 : vector<16x128xf32>
    %222 = arith.addf %221, %74 : vector<16x128xf32>
    %c0_79 = arith.constant 0 : index
    %c0_80 = arith.constant 0 : index
    %c0_81 = arith.constant 0 : index
    %223 = vector.load %arg11[%c0_79, %c0_80, %c0_81] : memref<2x1x128xf32, #tpu.memory_space<vmem>>, vector<1x1x128xf32>
    %224 = vector.shape_cast %223 : vector<1x1x128xf32> to vector<1x128xf32>
    %c0_82 = arith.constant 0 : index
    %c0_83 = arith.constant 0 : index
    %c0_84 = arith.constant 0 : index
    %225 = vector.load %arg12[%c0_82, %c0_83, %c0_84] : memref<2x1x128xf32, #tpu.memory_space<vmem>>, vector<1x1x128xf32>
    %226 = vector.shape_cast %225 : vector<1x1x128xf32> to vector<1x128xf32>
    %cst_85 = arith.constant dense<0.000000e+00> : vector<16xf32>
    %227 = vector.multi_reduction <add>, %222, %cst_85 [1] : vector<16x128xf32> to vector<16xf32>
    %228 = vector.shape_cast %227 : vector<16xf32> to vector<16x1xf32>
    %cst_86 = arith.constant 1.280000e+02 : f32
    %229 = vector.broadcast %cst_86 : f32 to vector<16x1xf32>
    %230 = arith.divf %228, %229 : vector<16x1xf32>
    %231 = vector.broadcast %230 : vector<16x1xf32> to vector<16x128xf32>
    %232 = arith.subf %222, %231 : vector<16x128xf32>
    %233 = arith.mulf %232, %232 : vector<16x128xf32>
    %cst_87 = arith.constant dense<0.000000e+00> : vector<16xf32>
    %234 = vector.multi_reduction <add>, %233, %cst_87 [1] : vector<16x128xf32> to vector<16xf32>
    %235 = vector.shape_cast %234 : vector<16xf32> to vector<16x1xf32>
    %cst_88 = arith.constant 1.280000e+02 : f32
    %236 = vector.broadcast %cst_88 : f32 to vector<16x1xf32>
    %237 = arith.divf %235, %236 : vector<16x1xf32>
    %238 = vector.broadcast %230 : vector<16x1xf32> to vector<16x128xf32>
    %239 = arith.subf %222, %238 : vector<16x128xf32>
    %cst_89 = arith.constant 9.99999996E-13 : f32
    %240 = vector.broadcast %cst_89 : f32 to vector<16x1xf32>
    %241 = arith.addf %237, %240 : vector<16x1xf32>
    %242 = math.rsqrt %241 : vector<16x1xf32>
    %243 = vector.broadcast %242 : vector<16x1xf32> to vector<16x128xf32>
    %244 = arith.mulf %239, %243 : vector<16x128xf32>
    %245 = vector.broadcast %224 : vector<1x128xf32> to vector<16x128xf32>
    %246 = arith.mulf %244, %245 : vector<16x128xf32>
    %247 = vector.broadcast %226 : vector<1x128xf32> to vector<16x128xf32>
    %248 = arith.addf %246, %247 : vector<16x128xf32>
    %c0_90 = arith.constant 0 : index
    %c0_91 = arith.constant 0 : index
    %c0_92 = arith.constant 0 : index
    %249 = vector.load %arg13[%c0_90, %c0_91, %c0_92] : memref<2x128x256xbf16, #tpu.memory_space<vmem>>, vector<1x128x256xbf16>
    %250 = vector.shape_cast %249 : vector<1x128x256xbf16> to vector<128x256xbf16>
    %251 = arith.truncf %248 : vector<16x128xf32> to vector<16x128xbf16>
    %cst_93 = arith.constant dense<0.000000e+00> : vector<16x256xf32>
    %252 = tpu.matmul %251, %250, %cst_93 {dimension_numbers = #tpu.dot_dimension_numbers<[1], [0], [0], [1], [0, 0, 1, 1], [], []>} : vector<16x128xbf16>, vector<128x256xbf16>, vector<16x256xf32> -> vector<16x256xf32>
    %c0_94 = arith.constant 0 : index
    %c0_95 = arith.constant 0 : index
    %c0_96 = arith.constant 0 : index
    %253 = vector.load %arg14[%c0_94, %c0_95, %c0_96] : memref<2x1x256xf32, #tpu.memory_space<vmem>>, vector<1x1x256xf32>
    %254 = vector.shape_cast %253 : vector<1x1x256xf32> to vector<1x256xf32>
    %255 = vector.broadcast %254 : vector<1x256xf32> to vector<16x256xf32>
    %256 = arith.addf %252, %255 : vector<16x256xf32>
    %257 = arith.mulf %256, %256 : vector<16x256xf32>
    %258 = arith.mulf %256, %257 : vector<16x256xf32>
    %cst_97 = arith.constant 4.471500e-02 : f32
    %259 = vector.broadcast %cst_97 : f32 to vector<16x256xf32>
    %260 = arith.mulf %259, %258 : vector<16x256xf32>
    %261 = arith.addf %256, %260 : vector<16x256xf32>
    %cst_98 = arith.constant 0.797884583 : f32
    %262 = vector.broadcast %cst_98 : f32 to vector<16x256xf32>
    %263 = arith.mulf %262, %261 : vector<16x256xf32>
    %264 = math.tanh %263 : vector<16x256xf32>
    %cst_99 = arith.constant 1.000000e+00 : f32
    %265 = vector.broadcast %cst_99 : f32 to vector<16x256xf32>
    %266 = arith.addf %265, %264 : vector<16x256xf32>
    %cst_100 = arith.constant 5.000000e-01 : f32
    %267 = vector.broadcast %cst_100 : f32 to vector<16x256xf32>
    %268 = arith.mulf %267, %266 : vector<16x256xf32>
    %269 = arith.mulf %256, %268 : vector<16x256xf32>
    %c0_101 = arith.constant 0 : index
    %c0_102 = arith.constant 0 : index
    %c0_103 = arith.constant 0 : index
    %270 = vector.load %arg15[%c0_101, %c0_102, %c0_103] : memref<2x256x128xbf16, #tpu.memory_space<vmem>>, vector<1x256x128xbf16>
    %271 = vector.shape_cast %270 : vector<1x256x128xbf16> to vector<256x128xbf16>
    %272 = arith.truncf %269 : vector<16x256xf32> to vector<16x256xbf16>
    %cst_104 = arith.constant dense<0.000000e+00> : vector<16x128xf32>
    %273 = tpu.matmul %272, %271, %cst_104 {dimension_numbers = #tpu.dot_dimension_numbers<[1], [0], [0], [1], [0, 0, 1, 1], [], []>} : vector<16x256xbf16>, vector<256x128xbf16>, vector<16x128xf32> -> vector<16x128xf32>
    %c0_105 = arith.constant 0 : index
    %c0_106 = arith.constant 0 : index
    %c0_107 = arith.constant 0 : index
    %274 = vector.load %arg16[%c0_105, %c0_106, %c0_107] : memref<2x1x128xf32, #tpu.memory_space<vmem>>, vector<1x1x128xf32>
    %275 = vector.shape_cast %274 : vector<1x1x128xf32> to vector<1x128xf32>
    %276 = vector.broadcast %275 : vector<1x128xf32> to vector<16x128xf32>
    %277 = arith.addf %273, %276 : vector<16x128xf32>
    %278 = arith.addf %277, %248 : vector<16x128xf32>
    %c0_108 = arith.constant 0 : index
    %c0_109 = arith.constant 0 : index
    %c0_110 = arith.constant 0 : index
    %279 = vector.load %arg17[%c0_108, %c0_109, %c0_110] : memref<2x1x128xf32, #tpu.memory_space<vmem>>, vector<1x1x128xf32>
    %280 = vector.shape_cast %279 : vector<1x1x128xf32> to vector<1x128xf32>
    %c0_111 = arith.constant 0 : index
    %c0_112 = arith.constant 0 : index
    %c0_113 = arith.constant 0 : index
    %281 = vector.load %arg18[%c0_111, %c0_112, %c0_113] : memref<2x1x128xf32, #tpu.memory_space<vmem>>, vector<1x1x128xf32>
    %282 = vector.shape_cast %281 : vector<1x1x128xf32> to vector<1x128xf32>
    %cst_114 = arith.constant dense<0.000000e+00> : vector<16xf32>
    %283 = vector.multi_reduction <add>, %278, %cst_114 [1] : vector<16x128xf32> to vector<16xf32>
    %284 = vector.shape_cast %283 : vector<16xf32> to vector<16x1xf32>
    %cst_115 = arith.constant 1.280000e+02 : f32
    %285 = vector.broadcast %cst_115 : f32 to vector<16x1xf32>
    %286 = arith.divf %284, %285 : vector<16x1xf32>
    %287 = vector.broadcast %286 : vector<16x1xf32> to vector<16x128xf32>
    %288 = arith.subf %278, %287 : vector<16x128xf32>
    %289 = arith.mulf %288, %288 : vector<16x128xf32>
    %cst_116 = arith.constant dense<0.000000e+00> : vector<16xf32>
    %290 = vector.multi_reduction <add>, %289, %cst_116 [1] : vector<16x128xf32> to vector<16xf32>
    %291 = vector.shape_cast %290 : vector<16xf32> to vector<16x1xf32>
    %cst_117 = arith.constant 1.280000e+02 : f32
    %292 = vector.broadcast %cst_117 : f32 to vector<16x1xf32>
    %293 = arith.divf %291, %292 : vector<16x1xf32>
    %294 = vector.broadcast %286 : vector<16x1xf32> to vector<16x128xf32>
    %295 = arith.subf %278, %294 : vector<16x128xf32>
    %cst_118 = arith.constant 9.99999996E-13 : f32
    %296 = vector.broadcast %cst_118 : f32 to vector<16x1xf32>
    %297 = arith.addf %293, %296 : vector<16x1xf32>
    %298 = math.rsqrt %297 : vector<16x1xf32>
    %299 = vector.broadcast %298 : vector<16x1xf32> to vector<16x128xf32>
    %300 = arith.mulf %295, %299 : vector<16x128xf32>
    %301 = vector.broadcast %280 : vector<1x128xf32> to vector<16x128xf32>
    %302 = arith.mulf %300, %301 : vector<16x128xf32>
    %303 = vector.broadcast %282 : vector<1x128xf32> to vector<16x128xf32>
    %304 = arith.addf %302, %303 : vector<16x128xf32>
    %c1_119 = arith.constant 1 : index
    %c0_120 = arith.constant 0 : index
    %c0_121 = arith.constant 0 : index
    %305 = vector.load %arg7[%c1_119, %c0_120, %c0_121] : memref<2x128x384xbf16, #tpu.memory_space<vmem>>, vector<1x128x384xbf16>
    %306 = vector.shape_cast %305 : vector<1x128x384xbf16> to vector<128x384xbf16>
    %307 = arith.truncf %304 : vector<16x128xf32> to vector<16x128xbf16>
    %cst_122 = arith.constant dense<0.000000e+00> : vector<16x384xf32>
    %308 = tpu.matmul %307, %306, %cst_122 {dimension_numbers = #tpu.dot_dimension_numbers<[1], [0], [0], [1], [0, 0, 1, 1], [], []>} : vector<16x128xbf16>, vector<128x384xbf16>, vector<16x384xf32> -> vector<16x384xf32>
    %c1_123 = arith.constant 1 : index
    %c0_124 = arith.constant 0 : index
    %c0_125 = arith.constant 0 : index
    %309 = vector.load %arg8[%c1_123, %c0_124, %c0_125] : memref<2x1x384xf32, #tpu.memory_space<vmem>>, vector<1x1x384xf32>
    %310 = vector.shape_cast %309 : vector<1x1x384xf32> to vector<1x384xf32>
    %311 = vector.broadcast %310 : vector<1x384xf32> to vector<16x384xf32>
    %312 = arith.addf %308, %311 : vector<16x384xf32>
    %313 = vector.extract_strided_slice %312 {offsets = [0, 0], sizes = [8, 32], strides = [1, 1]} : vector<16x384xf32> to vector<8x32xf32>
    %314 = vector.extract_strided_slice %312 {offsets = [0, 128], sizes = [8, 32], strides = [1, 1]} : vector<16x384xf32> to vector<8x32xf32>
    %315 = vector.extract_strided_slice %312 {offsets = [0, 256], sizes = [8, 32], strides = [1, 1]} : vector<16x384xf32> to vector<8x32xf32>
    %cst_126 = arith.constant dense<0.000000e+00> : vector<8x8xf32>
    %316 = tpu.matmul %313, %314, %cst_126 {dimension_numbers = #tpu.dot_dimension_numbers<[1], [1], [0], [0], [0, 0, 1, 0], [], []>} : vector<8x32xf32>, vector<8x32xf32>, vector<8x8xf32> -> vector<8x8xf32>
    %cst_127 = arith.constant 0.176776692 : f32
    %317 = vector.broadcast %cst_127 : f32 to vector<8x8xf32>
    %318 = arith.mulf %316, %317 : vector<8x8xf32>
    %cst_128 = arith.constant dense<0xFF800000> : vector<8xf32>
    %319 = vector.multi_reduction <maximumf>, %318, %cst_128 [1] : vector<8x8xf32> to vector<8xf32>
    %320 = vector.shape_cast %319 : vector<8xf32> to vector<8x1xf32>
    %321 = vector.broadcast %320 : vector<8x1xf32> to vector<8x8xf32>
    %322 = arith.subf %318, %321 : vector<8x8xf32>
    %323 = math.exp %322 : vector<8x8xf32>
    %cst_129 = arith.constant dense<0.000000e+00> : vector<8xf32>
    %324 = vector.multi_reduction <add>, %323, %cst_129 [1] : vector<8x8xf32> to vector<8xf32>
    %325 = vector.shape_cast %324 : vector<8xf32> to vector<8x1xf32>
    %326 = vector.broadcast %325 : vector<8x1xf32> to vector<8x8xf32>
    %327 = arith.divf %323, %326 : vector<8x8xf32>
    %cst_130 = arith.constant dense<0.000000e+00> : vector<8x32xf32>
    %328 = tpu.matmul %327, %315, %cst_130 {dimension_numbers = #tpu.dot_dimension_numbers<[1], [0], [0], [1], [0, 0, 1, 1], [], []>} : vector<8x8xf32>, vector<8x32xf32>, vector<8x32xf32> -> vector<8x32xf32>
    %329 = vector.extract_strided_slice %312 {offsets = [0, 32], sizes = [8, 32], strides = [1, 1]} : vector<16x384xf32> to vector<8x32xf32>
    %330 = vector.extract_strided_slice %312 {offsets = [0, 160], sizes = [8, 32], strides = [1, 1]} : vector<16x384xf32> to vector<8x32xf32>
    %331 = vector.extract_strided_slice %312 {offsets = [0, 288], sizes = [8, 32], strides = [1, 1]} : vector<16x384xf32> to vector<8x32xf32>
    %cst_131 = arith.constant dense<0.000000e+00> : vector<8x8xf32>
    %332 = tpu.matmul %329, %330, %cst_131 {dimension_numbers = #tpu.dot_dimension_numbers<[1], [1], [0], [0], [0, 0, 1, 0], [], []>} : vector<8x32xf32>, vector<8x32xf32>, vector<8x8xf32> -> vector<8x8xf32>
    %cst_132 = arith.constant 0.176776692 : f32
    %333 = vector.broadcast %cst_132 : f32 to vector<8x8xf32>
    %334 = arith.mulf %332, %333 : vector<8x8xf32>
    %cst_133 = arith.constant dense<0xFF800000> : vector<8xf32>
    %335 = vector.multi_reduction <maximumf>, %334, %cst_133 [1] : vector<8x8xf32> to vector<8xf32>
    %336 = vector.shape_cast %335 : vector<8xf32> to vector<8x1xf32>
    %337 = vector.broadcast %336 : vector<8x1xf32> to vector<8x8xf32>
    %338 = arith.subf %334, %337 : vector<8x8xf32>
    %339 = math.exp %338 : vector<8x8xf32>
    %cst_134 = arith.constant dense<0.000000e+00> : vector<8xf32>
    %340 = vector.multi_reduction <add>, %339, %cst_134 [1] : vector<8x8xf32> to vector<8xf32>
    %341 = vector.shape_cast %340 : vector<8xf32> to vector<8x1xf32>
    %342 = vector.broadcast %341 : vector<8x1xf32> to vector<8x8xf32>
    %343 = arith.divf %339, %342 : vector<8x8xf32>
    %cst_135 = arith.constant dense<0.000000e+00> : vector<8x32xf32>
    %344 = tpu.matmul %343, %331, %cst_135 {dimension_numbers = #tpu.dot_dimension_numbers<[1], [0], [0], [1], [0, 0, 1, 1], [], []>} : vector<8x8xf32>, vector<8x32xf32>, vector<8x32xf32> -> vector<8x32xf32>
    %345 = vector.extract_strided_slice %312 {offsets = [0, 64], sizes = [8, 32], strides = [1, 1]} : vector<16x384xf32> to vector<8x32xf32>
    %346 = vector.extract_strided_slice %312 {offsets = [0, 192], sizes = [8, 32], strides = [1, 1]} : vector<16x384xf32> to vector<8x32xf32>
    %347 = vector.extract_strided_slice %312 {offsets = [0, 320], sizes = [8, 32], strides = [1, 1]} : vector<16x384xf32> to vector<8x32xf32>
    %cst_136 = arith.constant dense<0.000000e+00> : vector<8x8xf32>
    %348 = tpu.matmul %345, %346, %cst_136 {dimension_numbers = #tpu.dot_dimension_numbers<[1], [1], [0], [0], [0, 0, 1, 0], [], []>} : vector<8x32xf32>, vector<8x32xf32>, vector<8x8xf32> -> vector<8x8xf32>
    %cst_137 = arith.constant 0.176776692 : f32
    %349 = vector.broadcast %cst_137 : f32 to vector<8x8xf32>
    %350 = arith.mulf %348, %349 : vector<8x8xf32>
    %cst_138 = arith.constant dense<0xFF800000> : vector<8xf32>
    %351 = vector.multi_reduction <maximumf>, %350, %cst_138 [1] : vector<8x8xf32> to vector<8xf32>
    %352 = vector.shape_cast %351 : vector<8xf32> to vector<8x1xf32>
    %353 = vector.broadcast %352 : vector<8x1xf32> to vector<8x8xf32>
    %354 = arith.subf %350, %353 : vector<8x8xf32>
    %355 = math.exp %354 : vector<8x8xf32>
    %cst_139 = arith.constant dense<0.000000e+00> : vector<8xf32>
    %356 = vector.multi_reduction <add>, %355, %cst_139 [1] : vector<8x8xf32> to vector<8xf32>
    %357 = vector.shape_cast %356 : vector<8xf32> to vector<8x1xf32>
    %358 = vector.broadcast %357 : vector<8x1xf32> to vector<8x8xf32>
    %359 = arith.divf %355, %358 : vector<8x8xf32>
    %cst_140 = arith.constant dense<0.000000e+00> : vector<8x32xf32>
    %360 = tpu.matmul %359, %347, %cst_140 {dimension_numbers = #tpu.dot_dimension_numbers<[1], [0], [0], [1], [0, 0, 1, 1], [], []>} : vector<8x8xf32>, vector<8x32xf32>, vector<8x32xf32> -> vector<8x32xf32>
    %361 = vector.extract_strided_slice %312 {offsets = [0, 96], sizes = [8, 32], strides = [1, 1]} : vector<16x384xf32> to vector<8x32xf32>
    %362 = vector.extract_strided_slice %312 {offsets = [0, 224], sizes = [8, 32], strides = [1, 1]} : vector<16x384xf32> to vector<8x32xf32>
    %363 = vector.extract_strided_slice %312 {offsets = [0, 352], sizes = [8, 32], strides = [1, 1]} : vector<16x384xf32> to vector<8x32xf32>
    %cst_141 = arith.constant dense<0.000000e+00> : vector<8x8xf32>
    %364 = tpu.matmul %361, %362, %cst_141 {dimension_numbers = #tpu.dot_dimension_numbers<[1], [1], [0], [0], [0, 0, 1, 0], [], []>} : vector<8x32xf32>, vector<8x32xf32>, vector<8x8xf32> -> vector<8x8xf32>
    %cst_142 = arith.constant 0.176776692 : f32
    %365 = vector.broadcast %cst_142 : f32 to vector<8x8xf32>
    %366 = arith.mulf %364, %365 : vector<8x8xf32>
    %cst_143 = arith.constant dense<0xFF800000> : vector<8xf32>
    %367 = vector.multi_reduction <maximumf>, %366, %cst_143 [1] : vector<8x8xf32> to vector<8xf32>
    %368 = vector.shape_cast %367 : vector<8xf32> to vector<8x1xf32>
    %369 = vector.broadcast %368 : vector<8x1xf32> to vector<8x8xf32>
    %370 = arith.subf %366, %369 : vector<8x8xf32>
    %371 = math.exp %370 : vector<8x8xf32>
    %cst_144 = arith.constant dense<0.000000e+00> : vector<8xf32>
    %372 = vector.multi_reduction <add>, %371, %cst_144 [1] : vector<8x8xf32> to vector<8xf32>
    %373 = vector.shape_cast %372 : vector<8xf32> to vector<8x1xf32>
    %374 = vector.broadcast %373 : vector<8x1xf32> to vector<8x8xf32>
    %375 = arith.divf %371, %374 : vector<8x8xf32>
    %cst_145 = arith.constant dense<0.000000e+00> : vector<8x32xf32>
    %376 = tpu.matmul %375, %363, %cst_145 {dimension_numbers = #tpu.dot_dimension_numbers<[1], [0], [0], [1], [0, 0, 1, 1], [], []>} : vector<8x8xf32>, vector<8x32xf32>, vector<8x32xf32> -> vector<8x32xf32>
    %377 = tpu.concatenate %328, %344, %360, %376 in 1 : vector<8x32xf32>, vector<8x32xf32>, vector<8x32xf32>, vector<8x32xf32> -> vector<8x128xf32>
    %378 = vector.extract_strided_slice %312 {offsets = [8, 0], sizes = [8, 32], strides = [1, 1]} : vector<16x384xf32> to vector<8x32xf32>
    %379 = vector.extract_strided_slice %312 {offsets = [8, 128], sizes = [8, 32], strides = [1, 1]} : vector<16x384xf32> to vector<8x32xf32>
    %380 = vector.extract_strided_slice %312 {offsets = [8, 256], sizes = [8, 32], strides = [1, 1]} : vector<16x384xf32> to vector<8x32xf32>
    %cst_146 = arith.constant dense<0.000000e+00> : vector<8x8xf32>
    %381 = tpu.matmul %378, %379, %cst_146 {dimension_numbers = #tpu.dot_dimension_numbers<[1], [1], [0], [0], [0, 0, 1, 0], [], []>} : vector<8x32xf32>, vector<8x32xf32>, vector<8x8xf32> -> vector<8x8xf32>
    %cst_147 = arith.constant 0.176776692 : f32
    %382 = vector.broadcast %cst_147 : f32 to vector<8x8xf32>
    %383 = arith.mulf %381, %382 : vector<8x8xf32>
    %cst_148 = arith.constant dense<0xFF800000> : vector<8xf32>
    %384 = vector.multi_reduction <maximumf>, %383, %cst_148 [1] : vector<8x8xf32> to vector<8xf32>
    %385 = vector.shape_cast %384 : vector<8xf32> to vector<8x1xf32>
    %386 = vector.broadcast %385 : vector<8x1xf32> to vector<8x8xf32>
    %387 = arith.subf %383, %386 : vector<8x8xf32>
    %388 = math.exp %387 : vector<8x8xf32>
    %cst_149 = arith.constant dense<0.000000e+00> : vector<8xf32>
    %389 = vector.multi_reduction <add>, %388, %cst_149 [1] : vector<8x8xf32> to vector<8xf32>
    %390 = vector.shape_cast %389 : vector<8xf32> to vector<8x1xf32>
    %391 = vector.broadcast %390 : vector<8x1xf32> to vector<8x8xf32>
    %392 = arith.divf %388, %391 : vector<8x8xf32>
    %cst_150 = arith.constant dense<0.000000e+00> : vector<8x32xf32>
    %393 = tpu.matmul %392, %380, %cst_150 {dimension_numbers = #tpu.dot_dimension_numbers<[1], [0], [0], [1], [0, 0, 1, 1], [], []>} : vector<8x8xf32>, vector<8x32xf32>, vector<8x32xf32> -> vector<8x32xf32>
    %394 = vector.extract_strided_slice %312 {offsets = [8, 32], sizes = [8, 32], strides = [1, 1]} : vector<16x384xf32> to vector<8x32xf32>
    %395 = vector.extract_strided_slice %312 {offsets = [8, 160], sizes = [8, 32], strides = [1, 1]} : vector<16x384xf32> to vector<8x32xf32>
    %396 = vector.extract_strided_slice %312 {offsets = [8, 288], sizes = [8, 32], strides = [1, 1]} : vector<16x384xf32> to vector<8x32xf32>
    %cst_151 = arith.constant dense<0.000000e+00> : vector<8x8xf32>
    %397 = tpu.matmul %394, %395, %cst_151 {dimension_numbers = #tpu.dot_dimension_numbers<[1], [1], [0], [0], [0, 0, 1, 0], [], []>} : vector<8x32xf32>, vector<8x32xf32>, vector<8x8xf32> -> vector<8x8xf32>
    %cst_152 = arith.constant 0.176776692 : f32
    %398 = vector.broadcast %cst_152 : f32 to vector<8x8xf32>
    %399 = arith.mulf %397, %398 : vector<8x8xf32>
    %cst_153 = arith.constant dense<0xFF800000> : vector<8xf32>
    %400 = vector.multi_reduction <maximumf>, %399, %cst_153 [1] : vector<8x8xf32> to vector<8xf32>
    %401 = vector.shape_cast %400 : vector<8xf32> to vector<8x1xf32>
    %402 = vector.broadcast %401 : vector<8x1xf32> to vector<8x8xf32>
    %403 = arith.subf %399, %402 : vector<8x8xf32>
    %404 = math.exp %403 : vector<8x8xf32>
    %cst_154 = arith.constant dense<0.000000e+00> : vector<8xf32>
    %405 = vector.multi_reduction <add>, %404, %cst_154 [1] : vector<8x8xf32> to vector<8xf32>
    %406 = vector.shape_cast %405 : vector<8xf32> to vector<8x1xf32>
    %407 = vector.broadcast %406 : vector<8x1xf32> to vector<8x8xf32>
    %408 = arith.divf %404, %407 : vector<8x8xf32>
    %cst_155 = arith.constant dense<0.000000e+00> : vector<8x32xf32>
    %409 = tpu.matmul %408, %396, %cst_155 {dimension_numbers = #tpu.dot_dimension_numbers<[1], [0], [0], [1], [0, 0, 1, 1], [], []>} : vector<8x8xf32>, vector<8x32xf32>, vector<8x32xf32> -> vector<8x32xf32>
    %410 = vector.extract_strided_slice %312 {offsets = [8, 64], sizes = [8, 32], strides = [1, 1]} : vector<16x384xf32> to vector<8x32xf32>
    %411 = vector.extract_strided_slice %312 {offsets = [8, 192], sizes = [8, 32], strides = [1, 1]} : vector<16x384xf32> to vector<8x32xf32>
    %412 = vector.extract_strided_slice %312 {offsets = [8, 320], sizes = [8, 32], strides = [1, 1]} : vector<16x384xf32> to vector<8x32xf32>
    %cst_156 = arith.constant dense<0.000000e+00> : vector<8x8xf32>
    %413 = tpu.matmul %410, %411, %cst_156 {dimension_numbers = #tpu.dot_dimension_numbers<[1], [1], [0], [0], [0, 0, 1, 0], [], []>} : vector<8x32xf32>, vector<8x32xf32>, vector<8x8xf32> -> vector<8x8xf32>
    %cst_157 = arith.constant 0.176776692 : f32
    %414 = vector.broadcast %cst_157 : f32 to vector<8x8xf32>
    %415 = arith.mulf %413, %414 : vector<8x8xf32>
    %cst_158 = arith.constant dense<0xFF800000> : vector<8xf32>
    %416 = vector.multi_reduction <maximumf>, %415, %cst_158 [1] : vector<8x8xf32> to vector<8xf32>
    %417 = vector.shape_cast %416 : vector<8xf32> to vector<8x1xf32>
    %418 = vector.broadcast %417 : vector<8x1xf32> to vector<8x8xf32>
    %419 = arith.subf %415, %418 : vector<8x8xf32>
    %420 = math.exp %419 : vector<8x8xf32>
    %cst_159 = arith.constant dense<0.000000e+00> : vector<8xf32>
    %421 = vector.multi_reduction <add>, %420, %cst_159 [1] : vector<8x8xf32> to vector<8xf32>
    %422 = vector.shape_cast %421 : vector<8xf32> to vector<8x1xf32>
    %423 = vector.broadcast %422 : vector<8x1xf32> to vector<8x8xf32>
    %424 = arith.divf %420, %423 : vector<8x8xf32>
    %cst_160 = arith.constant dense<0.000000e+00> : vector<8x32xf32>
    %425 = tpu.matmul %424, %412, %cst_160 {dimension_numbers = #tpu.dot_dimension_numbers<[1], [0], [0], [1], [0, 0, 1, 1], [], []>} : vector<8x8xf32>, vector<8x32xf32>, vector<8x32xf32> -> vector<8x32xf32>
    %426 = vector.extract_strided_slice %312 {offsets = [8, 96], sizes = [8, 32], strides = [1, 1]} : vector<16x384xf32> to vector<8x32xf32>
    %427 = vector.extract_strided_slice %312 {offsets = [8, 224], sizes = [8, 32], strides = [1, 1]} : vector<16x384xf32> to vector<8x32xf32>
    %428 = vector.extract_strided_slice %312 {offsets = [8, 352], sizes = [8, 32], strides = [1, 1]} : vector<16x384xf32> to vector<8x32xf32>
    %cst_161 = arith.constant dense<0.000000e+00> : vector<8x8xf32>
    %429 = tpu.matmul %426, %427, %cst_161 {dimension_numbers = #tpu.dot_dimension_numbers<[1], [1], [0], [0], [0, 0, 1, 0], [], []>} : vector<8x32xf32>, vector<8x32xf32>, vector<8x8xf32> -> vector<8x8xf32>
    %cst_162 = arith.constant 0.176776692 : f32
    %430 = vector.broadcast %cst_162 : f32 to vector<8x8xf32>
    %431 = arith.mulf %429, %430 : vector<8x8xf32>
    %cst_163 = arith.constant dense<0xFF800000> : vector<8xf32>
    %432 = vector.multi_reduction <maximumf>, %431, %cst_163 [1] : vector<8x8xf32> to vector<8xf32>
    %433 = vector.shape_cast %432 : vector<8xf32> to vector<8x1xf32>
    %434 = vector.broadcast %433 : vector<8x1xf32> to vector<8x8xf32>
    %435 = arith.subf %431, %434 : vector<8x8xf32>
    %436 = math.exp %435 : vector<8x8xf32>
    %cst_164 = arith.constant dense<0.000000e+00> : vector<8xf32>
    %437 = vector.multi_reduction <add>, %436, %cst_164 [1] : vector<8x8xf32> to vector<8xf32>
    %438 = vector.shape_cast %437 : vector<8xf32> to vector<8x1xf32>
    %439 = vector.broadcast %438 : vector<8x1xf32> to vector<8x8xf32>
    %440 = arith.divf %436, %439 : vector<8x8xf32>
    %cst_165 = arith.constant dense<0.000000e+00> : vector<8x32xf32>
    %441 = tpu.matmul %440, %428, %cst_165 {dimension_numbers = #tpu.dot_dimension_numbers<[1], [0], [0], [1], [0, 0, 1, 1], [], []>} : vector<8x8xf32>, vector<8x32xf32>, vector<8x32xf32> -> vector<8x32xf32>
    %442 = tpu.concatenate %393, %409, %425, %441 in 1 : vector<8x32xf32>, vector<8x32xf32>, vector<8x32xf32>, vector<8x32xf32> -> vector<8x128xf32>
    %443 = tpu.concatenate %377, %442 in 0 : vector<8x128xf32>, vector<8x128xf32> -> vector<16x128xf32>
    %c1_166 = arith.constant 1 : index
    %c0_167 = arith.constant 0 : index
    %c0_168 = arith.constant 0 : index
    %444 = vector.load %arg9[%c1_166, %c0_167, %c0_168] : memref<2x128x128xbf16, #tpu.memory_space<vmem>>, vector<1x128x128xbf16>
    %445 = vector.shape_cast %444 : vector<1x128x128xbf16> to vector<128x128xbf16>
    %446 = arith.truncf %443 : vector<16x128xf32> to vector<16x128xbf16>
    %cst_169 = arith.constant dense<0.000000e+00> : vector<16x128xf32>
    %447 = tpu.matmul %446, %445, %cst_169 {dimension_numbers = #tpu.dot_dimension_numbers<[1], [0], [0], [1], [0, 0, 1, 1], [], []>} : vector<16x128xbf16>, vector<128x128xbf16>, vector<16x128xf32> -> vector<16x128xf32>
    %c1_170 = arith.constant 1 : index
    %c0_171 = arith.constant 0 : index
    %c0_172 = arith.constant 0 : index
    %448 = vector.load %arg10[%c1_170, %c0_171, %c0_172] : memref<2x1x128xf32, #tpu.memory_space<vmem>>, vector<1x1x128xf32>
    %449 = vector.shape_cast %448 : vector<1x1x128xf32> to vector<1x128xf32>
    %450 = vector.broadcast %449 : vector<1x128xf32> to vector<16x128xf32>
    %451 = arith.addf %447, %450 : vector<16x128xf32>
    %452 = arith.addf %451, %304 : vector<16x128xf32>
    %c1_173 = arith.constant 1 : index
    %c0_174 = arith.constant 0 : index
    %c0_175 = arith.constant 0 : index
    %453 = vector.load %arg11[%c1_173, %c0_174, %c0_175] : memref<2x1x128xf32, #tpu.memory_space<vmem>>, vector<1x1x128xf32>
    %454 = vector.shape_cast %453 : vector<1x1x128xf32> to vector<1x128xf32>
    %c1_176 = arith.constant 1 : index
    %c0_177 = arith.constant 0 : index
    %c0_178 = arith.constant 0 : index
    %455 = vector.load %arg12[%c1_176, %c0_177, %c0_178] : memref<2x1x128xf32, #tpu.memory_space<vmem>>, vector<1x1x128xf32>
    %456 = vector.shape_cast %455 : vector<1x1x128xf32> to vector<1x128xf32>
    %cst_179 = arith.constant dense<0.000000e+00> : vector<16xf32>
    %457 = vector.multi_reduction <add>, %452, %cst_179 [1] : vector<16x128xf32> to vector<16xf32>
    %458 = vector.shape_cast %457 : vector<16xf32> to vector<16x1xf32>
    %cst_180 = arith.constant 1.280000e+02 : f32
    %459 = vector.broadcast %cst_180 : f32 to vector<16x1xf32>
    %460 = arith.divf %458, %459 : vector<16x1xf32>
    %461 = vector.broadcast %460 : vector<16x1xf32> to vector<16x128xf32>
    %462 = arith.subf %452, %461 : vector<16x128xf32>
    %463 = arith.mulf %462, %462 : vector<16x128xf32>
    %cst_181 = arith.constant dense<0.000000e+00> : vector<16xf32>
    %464 = vector.multi_reduction <add>, %463, %cst_181 [1] : vector<16x128xf32> to vector<16xf32>
    %465 = vector.shape_cast %464 : vector<16xf32> to vector<16x1xf32>
    %cst_182 = arith.constant 1.280000e+02 : f32
    %466 = vector.broadcast %cst_182 : f32 to vector<16x1xf32>
    %467 = arith.divf %465, %466 : vector<16x1xf32>
    %468 = vector.broadcast %460 : vector<16x1xf32> to vector<16x128xf32>
    %469 = arith.subf %452, %468 : vector<16x128xf32>
    %cst_183 = arith.constant 9.99999996E-13 : f32
    %470 = vector.broadcast %cst_183 : f32 to vector<16x1xf32>
    %471 = arith.addf %467, %470 : vector<16x1xf32>
    %472 = math.rsqrt %471 : vector<16x1xf32>
    %473 = vector.broadcast %472 : vector<16x1xf32> to vector<16x128xf32>
    %474 = arith.mulf %469, %473 : vector<16x128xf32>
    %475 = vector.broadcast %454 : vector<1x128xf32> to vector<16x128xf32>
    %476 = arith.mulf %474, %475 : vector<16x128xf32>
    %477 = vector.broadcast %456 : vector<1x128xf32> to vector<16x128xf32>
    %478 = arith.addf %476, %477 : vector<16x128xf32>
    %c1_184 = arith.constant 1 : index
    %c0_185 = arith.constant 0 : index
    %c0_186 = arith.constant 0 : index
    %479 = vector.load %arg13[%c1_184, %c0_185, %c0_186] : memref<2x128x256xbf16, #tpu.memory_space<vmem>>, vector<1x128x256xbf16>
    %480 = vector.shape_cast %479 : vector<1x128x256xbf16> to vector<128x256xbf16>
    %481 = arith.truncf %478 : vector<16x128xf32> to vector<16x128xbf16>
    %cst_187 = arith.constant dense<0.000000e+00> : vector<16x256xf32>
    %482 = tpu.matmul %481, %480, %cst_187 {dimension_numbers = #tpu.dot_dimension_numbers<[1], [0], [0], [1], [0, 0, 1, 1], [], []>} : vector<16x128xbf16>, vector<128x256xbf16>, vector<16x256xf32> -> vector<16x256xf32>
    %c1_188 = arith.constant 1 : index
    %c0_189 = arith.constant 0 : index
    %c0_190 = arith.constant 0 : index
    %483 = vector.load %arg14[%c1_188, %c0_189, %c0_190] : memref<2x1x256xf32, #tpu.memory_space<vmem>>, vector<1x1x256xf32>
    %484 = vector.shape_cast %483 : vector<1x1x256xf32> to vector<1x256xf32>
    %485 = vector.broadcast %484 : vector<1x256xf32> to vector<16x256xf32>
    %486 = arith.addf %482, %485 : vector<16x256xf32>
    %487 = arith.mulf %486, %486 : vector<16x256xf32>
    %488 = arith.mulf %486, %487 : vector<16x256xf32>
    %cst_191 = arith.constant 4.471500e-02 : f32
    %489 = vector.broadcast %cst_191 : f32 to vector<16x256xf32>
    %490 = arith.mulf %489, %488 : vector<16x256xf32>
    %491 = arith.addf %486, %490 : vector<16x256xf32>
    %cst_192 = arith.constant 0.797884583 : f32
    %492 = vector.broadcast %cst_192 : f32 to vector<16x256xf32>
    %493 = arith.mulf %492, %491 : vector<16x256xf32>
    %494 = math.tanh %493 : vector<16x256xf32>
    %cst_193 = arith.constant 1.000000e+00 : f32
    %495 = vector.broadcast %cst_193 : f32 to vector<16x256xf32>
    %496 = arith.addf %495, %494 : vector<16x256xf32>
    %cst_194 = arith.constant 5.000000e-01 : f32
    %497 = vector.broadcast %cst_194 : f32 to vector<16x256xf32>
    %498 = arith.mulf %497, %496 : vector<16x256xf32>
    %499 = arith.mulf %486, %498 : vector<16x256xf32>
    %c1_195 = arith.constant 1 : index
    %c0_196 = arith.constant 0 : index
    %c0_197 = arith.constant 0 : index
    %500 = vector.load %arg15[%c1_195, %c0_196, %c0_197] : memref<2x256x128xbf16, #tpu.memory_space<vmem>>, vector<1x256x128xbf16>
    %501 = vector.shape_cast %500 : vector<1x256x128xbf16> to vector<256x128xbf16>
    %502 = arith.truncf %499 : vector<16x256xf32> to vector<16x256xbf16>
    %cst_198 = arith.constant dense<0.000000e+00> : vector<16x128xf32>
    %503 = tpu.matmul %502, %501, %cst_198 {dimension_numbers = #tpu.dot_dimension_numbers<[1], [0], [0], [1], [0, 0, 1, 1], [], []>} : vector<16x256xbf16>, vector<256x128xbf16>, vector<16x128xf32> -> vector<16x128xf32>
    %c1_199 = arith.constant 1 : index
    %c0_200 = arith.constant 0 : index
    %c0_201 = arith.constant 0 : index
    %504 = vector.load %arg16[%c1_199, %c0_200, %c0_201] : memref<2x1x128xf32, #tpu.memory_space<vmem>>, vector<1x1x128xf32>
    %505 = vector.shape_cast %504 : vector<1x1x128xf32> to vector<1x128xf32>
    %506 = vector.broadcast %505 : vector<1x128xf32> to vector<16x128xf32>
    %507 = arith.addf %503, %506 : vector<16x128xf32>
    %508 = arith.addf %507, %478 : vector<16x128xf32>
    %c1_202 = arith.constant 1 : index
    %c0_203 = arith.constant 0 : index
    %c0_204 = arith.constant 0 : index
    %509 = vector.load %arg17[%c1_202, %c0_203, %c0_204] : memref<2x1x128xf32, #tpu.memory_space<vmem>>, vector<1x1x128xf32>
    %510 = vector.shape_cast %509 : vector<1x1x128xf32> to vector<1x128xf32>
    %c1_205 = arith.constant 1 : index
    %c0_206 = arith.constant 0 : index
    %c0_207 = arith.constant 0 : index
    %511 = vector.load %arg18[%c1_205, %c0_206, %c0_207] : memref<2x1x128xf32, #tpu.memory_space<vmem>>, vector<1x1x128xf32>
    %512 = vector.shape_cast %511 : vector<1x1x128xf32> to vector<1x128xf32>
    %cst_208 = arith.constant dense<0.000000e+00> : vector<16xf32>
    %513 = vector.multi_reduction <add>, %508, %cst_208 [1] : vector<16x128xf32> to vector<16xf32>
    %514 = vector.shape_cast %513 : vector<16xf32> to vector<16x1xf32>
    %cst_209 = arith.constant 1.280000e+02 : f32
    %515 = vector.broadcast %cst_209 : f32 to vector<16x1xf32>
    %516 = arith.divf %514, %515 : vector<16x1xf32>
    %517 = vector.broadcast %516 : vector<16x1xf32> to vector<16x128xf32>
    %518 = arith.subf %508, %517 : vector<16x128xf32>
    %519 = arith.mulf %518, %518 : vector<16x128xf32>
    %cst_210 = arith.constant dense<0.000000e+00> : vector<16xf32>
    %520 = vector.multi_reduction <add>, %519, %cst_210 [1] : vector<16x128xf32> to vector<16xf32>
    %521 = vector.shape_cast %520 : vector<16xf32> to vector<16x1xf32>
    %cst_211 = arith.constant 1.280000e+02 : f32
    %522 = vector.broadcast %cst_211 : f32 to vector<16x1xf32>
    %523 = arith.divf %521, %522 : vector<16x1xf32>
    %524 = vector.broadcast %516 : vector<16x1xf32> to vector<16x128xf32>
    %525 = arith.subf %508, %524 : vector<16x128xf32>
    %cst_212 = arith.constant 9.99999996E-13 : f32
    %526 = vector.broadcast %cst_212 : f32 to vector<16x1xf32>
    %527 = arith.addf %523, %526 : vector<16x1xf32>
    %528 = math.rsqrt %527 : vector<16x1xf32>
    %529 = vector.broadcast %528 : vector<16x1xf32> to vector<16x128xf32>
    %530 = arith.mulf %525, %529 : vector<16x128xf32>
    %531 = vector.broadcast %510 : vector<1x128xf32> to vector<16x128xf32>
    %532 = arith.mulf %530, %531 : vector<16x128xf32>
    %533 = vector.broadcast %512 : vector<1x128xf32> to vector<16x128xf32>
    %534 = arith.addf %532, %533 : vector<16x128xf32>
    %535 = vector.extract_strided_slice %534 {offsets = [0, 0], sizes = [1, 128], strides = [1, 1]} : vector<16x128xf32> to vector<1x128xf32>
    %536 = vector.extract_strided_slice %534 {offsets = [8, 0], sizes = [1, 128], strides = [1, 1]} : vector<16x128xf32> to vector<1x128xf32>
    %537 = tpu.concatenate %535, %536 in 0 : vector<1x128xf32>, vector<1x128xf32> -> vector<2x128xf32>
    %c0_213 = arith.constant 0 : index
    %c0_214 = arith.constant 0 : index
    %538 = vector.load %arg19[%c0_213, %c0_214] : memref<128x128xbf16, #tpu.memory_space<vmem>>, vector<128x128xbf16>
    %539 = arith.truncf %537 : vector<2x128xf32> to vector<2x128xbf16>
    %cst_215 = arith.constant dense<0.000000e+00> : vector<2x128xf32>
    %540 = tpu.matmul %539, %538, %cst_215 {dimension_numbers = #tpu.dot_dimension_numbers<[1], [0], [0], [1], [0, 0, 1, 1], [], []>} : vector<2x128xbf16>, vector<128x128xbf16>, vector<2x128xf32> -> vector<2x128xf32>
    %c0_216 = arith.constant 0 : index
    %c0_217 = arith.constant 0 : index
    %541 = vector.load %arg20[%c0_216, %c0_217] : memref<1x128xf32, #tpu.memory_space<vmem>>, vector<1x128xf32>
    %542 = vector.broadcast %541 : vector<1x128xf32> to vector<2x128xf32>
    %543 = arith.addf %540, %542 : vector<2x128xf32>
    %544 = math.tanh %543 : vector<2x128xf32>
    %c0_218 = arith.constant 0 : index
    %c0_219 = arith.constant 0 : index
    %545 = vector.load %arg21[%c0_218, %c0_219] : memref<2x128xf32, #tpu.memory_space<vmem>>, vector<2x128xf32>
    %cst_220 = arith.constant 2.000000e-01 : f32
    %546 = vector.broadcast %cst_220 : f32 to vector<2x128xf32>
    %547 = arith.cmpf oge, %545, %546 : vector<2x128xf32>
    %548 = arith.extui %547 : vector<2x128xi1> to vector<2x128xi32>
    %549 = arith.sitofp %548 : vector<2x128xi32> to vector<2x128xf32>
    %550 = arith.mulf %544, %549 : vector<2x128xf32>
    %cst_221 = arith.constant 1.250000e+00 : f32
    %551 = vector.broadcast %cst_221 : f32 to vector<2x128xf32>
    %552 = arith.mulf %550, %551 : vector<2x128xf32>
    %c0_222 = arith.constant 0 : index
    %c0_223 = arith.constant 0 : index
    %553 = vector.load %arg22[%c0_222, %c0_223] : memref<2x128xf32, #tpu.memory_space<vmem>>, vector<2x128xf32>
    tpu.vector_store %arg22[%c0_222, %c0_223], %552 {strides = array<i32>} : memref<2x128xf32, #tpu.memory_space<vmem>>, vector<2x128xf32>,
    return
  }
}

</mosaic_0001>

<bundles_post_ra>
// kernel: tpu_custom_call.1
= control target key start
LH: loop header
LB: loop body
LE: loop exit
PB: predicated region body
PF: predicated region fallthrough
CT: control target
= control target key end

     0   :  { %s7707_s0 = inlined_call_operand.vmem [shape: s32[16,1], index: 0, kind: input, shape index: {}]   ;;  %s7708_s1 = inlined_call_operand.vmem [shape: s32[16,1], index: 1, kind: input, shape index: {}]   ;;  %s7709_s2 = inlined_call_operand.hbm [shape: f32[1024,128], index: 2, kind: input, shape index: {}]   ;;  %s7710_s3 = inlined_call_operand.hbm [shape: f32[64,128], index: 3, kind: input, shape index: {}]   ;;  %s7711_s4 = inlined_call_operand.vmem [shape: f32[2,128], index: 4, kind: input, shape index: {}]   ;;  %s7712_s5 = inlined_call_operand.vmem [shape: f32[1,128], index: 5, kind: input, shape index: {}]   ;;  %s7713_s6 = inlined_call_operand.vmem [shape: f32[1,128], index: 6, kind: input, shape index: {}]   ;;  %s7714_s7 = inlined_call_operand.hbm [shape: bf16[2,128,384], index: 7, kind: input, shape index: {}]   ;;  %s7715_s8 = inlined_call_operand.vmem [shape: f32[2,1,384], index: 8, kind: input, shape index: {}]   ;;  %s7716_s9 = inlined_call_operand.hbm [shape: bf16[2,128,128], index: 9, kind: input, shape index: {}]   ;;  %s7717_s10 = inlined_call_operand.vmem [shape: f32[2,1,128], index: 10, kind: input, shape index: {}]   ;;  %s7718_s11 = inlined_call_operand.vmem [shape: f32[2,1,128], index: 11, kind: input, shape index: {}]   ;;  %s7719_s12 = inlined_call_operand.vmem [shape: f32[2,1,128], index: 12, kind: input, shape index: {}]   ;;  %s7720_s13 = inlined_call_operand.hbm [shape: bf16[2,128,256], index: 13, kind: input, shape index: {}]   ;;  %s7721_s14 = inlined_call_operand.vmem [shape: f32[2,1,256], index: 14, kind: input, shape index: {}]   ;;  %s7722_s15 = inlined_call_operand.hbm [shape: bf16[2,256,128], index: 15, kind: input, shape index: {}]   ;;  %s7723_s16 = inlined_call_operand.vmem [shape: f32[2,1,128], index: 16, kind: input, shape index: {}]   ;;  %s7724_s17 = inlined_call_operand.vmem [shape: f32[2,1,128], index: 17, kind: input, shape index: {}]   ;;  %s7725_s18 = inlined_call_operand.vmem [shape: f32[2,1,128], index: 18, kind: input, shape index: {}]   ;;  %s7726_s19 = inlined_call_operand.vmem [shape: bf16[128,128], index: 19, kind: input, shape index: {}]   ;;  %s7727_s20 = inlined_call_operand.vmem [shape: f32[1,128], index: 20, kind: input, shape index: {}]   ;;  %s7728_s21 = inlined_call_operand.vmem [shape: f32[2,128], index: 21, kind: input, shape index: {}]   ;;  %s7729_s22 = inlined_call_operand.hbm [shape: f32[2,128], index: 22, kind: output, shape index: {}]  }
   0x1   :  { %7743 = sst [smem:[#allocation19_spill]] %s7707_s0 }
   0x2   :  { %7744 = sst [smem:[#allocation20_spill]] %s7708_s1 }
   0x3   :  { %7745 = sst [smem:[#allocation21_spill]] %s7709_s2 }
   0x4   :  { %7746 = sst [smem:[#allocation22_spill]] %s7710_s3 }
   0x5   :  { %7747 = sst [smem:[#allocation23_spill]] %s7711_s4 }
   0x6   :  { %7748 = sst [smem:[#allocation24_spill]] %s7712_s5 }
   0x7   :  { %7749 = sst [smem:[#allocation25_spill]] %s7713_s6 }
   0x8   :  { %7750 = sst [smem:[#allocation26_spill]] %s7728_s21 }
   0x9   :  { %7751 = sst [smem:[#allocation27_spill]] %s7729_s22 }
   0xa   :  { %27 = vsyncpa [#allocation3], 0 }
   0xb   :  { %28 = vsyncpa [#allocation6], 0 }
   0xc   :  { %29 = vsyncpa [#allocation9], 0 }
   0xd   :  { %30 = vsyncpa [#allocation12], 0 }
   0xe   :  { %31 = vsyncpa [#allocation4], 0  ;;  %s6855_s3 = smov [#allocation5]   ;;  %s6856_s29 = smov [#allocation8]  }
   0xf   :  { %s53_s28 = sshll.u32 %s6855_s3, 4  ;;  %s85_s30 = sshll.u32 %s6856_s29, 4  ;;  %s54_s28 = int_to_ptr.vmem [resolvable:$true] %s53_s28  ;;  %s6989_s30 = int_to_ptr.vmem [resolvable:$true] %s85_s30 }
  0x10   :  { %s7752_s23 = sld [smem:[#allocation22_spill]] }
  0x16   :  { %s6691_s1 = scalar_lea.hbm %s7752_s23, 1024 }
  0x17   :  { %p6692_p0 = scmp.ne.s32.totalorder %s7752_s23, %s6691_s1  ;;  %p6695_p1 = scmp.lt.u32.totalorder %s6691_s1, %s7752_s23 }
  0x19   :  { %p6697_p2 = pnand %p6695_p1, %p6692_p0 }
  0x1b   :  { %6700 = shalt.err (!%p6697_p2)
}
  0x1c   :  { %s6701_s26 = scalar_lea.vmem %s54_s28, 1024  ;;  %p6706_p4 = scmp.lt.s32.totalorder %s54_s28, %s54_s28 }
  0x1d   :  { %p6702_p3 = scmp.ne.s32.totalorder %s54_s28, %s6701_s26  ;;  %p6707_p5 = scmp.lt.s32.totalorder %s6701_s26, %s6701_s26 }
  0x1f   :  { %p6708_p6 = por %p6707_p5, %p6706_p4 }
  0x21   :  { %p6709_p7 = pnand %p6708_p6, %p6702_p3 }
  0x23   :  { %6712 = shalt.err (!%p6709_p7)
}
  0x24   :  { %s7735_s2 = smov 128   ;;  %s7737_s27 = smov 8  }
  0x25   :  { %59 = dma.hbm_to_vmem [thread:$0]  %s7752_s23, 1024, %s54_s28, [#allocation6], %s7735_s2, %s7735_s2, %s7737_s27  }
  0x26   :  { %s6713_s1 = scalar_lea.hbm %s7716_s9, 2048 }
  0x27   :  { %p6714_p8 = scmp.ne.s32.totalorder %s7716_s9, %s6713_s1  ;;  %p6717_p9 = scmp.lt.u32.totalorder %s6713_s1, %s7716_s9 }
  0x29   :  { %p6719_p10 = pnand %p6717_p9, %p6714_p8 }
  0x2b   :  { %6722 = shalt.err (!%p6719_p10)
}
  0x2c   :  { %s6723_s26 = scalar_lea.vmem %s6989_s30, 2048  ;;  %p6728_p12 = scmp.lt.s32.totalorder %s6989_s30, %s6989_s30 }
  0x2d   :  { %p6724_p11 = scmp.ne.s32.totalorder %s6989_s30, %s6723_s26  ;;  %p6729_p13 = scmp.lt.s32.totalorder %s6723_s26, %s6723_s26 }
  0x2f   :  { %p6730_p0 = por %p6729_p13, %p6728_p12 }
  0x31   :  { %p6731_p1 = pnand %p6730_p0, %p6724_p11 }
  0x33   :  { %6734 = shalt.err (!%p6731_p1)
}
  0x34   :  { %s7740_s28 = smov 64   ;;  %s7742_s23 = smov 4  }
  0x35   :  { %91 = dma.hbm_to_vmem [thread:$0]  %s7716_s9, 2048, %s6989_s30, [#allocation9], %s7740_s28, %s7740_s28, %s7742_s23  }
  0x36   :  { %s6861_s4 = smov [#allocation2]   ;;  %s6862_s1 = smov [#allocation7]  }
  0x37   :  { %s41_s0 = sshll.u32 %s6861_s4, 4  ;;  %s71_s5 = sshll.u32 %s6862_s1, 4  ;;  %s42_s0 = int_to_ptr.vmem [resolvable:$true] %s41_s0  ;;  %s7026_s5 = int_to_ptr.vmem [resolvable:$true] %s71_s5 }
  0x38   :  { %s7753_s25 = sld [smem:[#allocation21_spill]] }
  0x3e   :  { %s6735_s26 = scalar_lea.hbm %s7753_s25, 16384 }
  0x3f   :  { %p6736_p2 = scmp.ne.s32.totalorder %s7753_s25, %s6735_s26  ;;  %p6739_p3 = scmp.lt.u32.totalorder %s6735_s26, %s7753_s25 }
  0x41   :  { %p6741_p4 = pnand %p6739_p3, %p6736_p2 }
  0x43   :  { %6744 = shalt.err (!%p6741_p4)
}
  0x44   :  { %s6745_s9 = scalar_lea.vmem %s42_s0, 16384  ;;  %p6750_p6 = scmp.lt.s32.totalorder %s42_s0, %s42_s0 }
  0x45   :  { %p6746_p5 = scmp.ne.s32.totalorder %s42_s0, %s6745_s9  ;;  %p6751_p7 = scmp.lt.s32.totalorder %s6745_s9, %s6745_s9 }
  0x47   :  { %p6752_p8 = por %p6751_p7, %p6750_p6 }
  0x49   :  { %p6753_p9 = pnand %p6752_p8, %p6746_p5 }
  0x4b   :  { %6756 = shalt.err (!%p6753_p9)
}
  0x4c   :  { %s7754_s30 = smov 8   ;;  %s7755_s3 = smov 128  }
  0x4d   :  { %47 = dma.hbm_to_vmem [thread:$0]  %s7753_s25, 16384, %s42_s0, [#allocation3], %s7755_s3, %s7755_s3, %s7754_s30  }
  0x4e   :  { %s6757_s21 = scalar_lea.hbm %s7714_s7, 6144 }
  0x4f   :  { %p6758_p10 = scmp.ne.s32.totalorder %s7714_s7, %s6757_s21  ;;  %p6761_p11 = scmp.lt.u32.totalorder %s6757_s21, %s7714_s7 }
  0x51   :  { %p6763_p12 = pnand %p6761_p11, %p6758_p10 }
  0x53   :  { %6766 = shalt.err (!%p6763_p12)
}
  0x54   :  { %s6767_s26 = scalar_lea.vmem %s7026_s5, 6144  ;;  %p6772_p0 = scmp.lt.s32.totalorder %s7026_s5, %s7026_s5 }
  0x55   :  { %p6768_p13 = scmp.ne.s32.totalorder %s7026_s5, %s6767_s26  ;;  %p6773_p1 = scmp.lt.s32.totalorder %s6767_s26, %s6767_s26 }
  0x57   :  { %p6774_p2 = por %p6773_p1, %p6772_p0 }
  0x59   :  { %p6775_p3 = pnand %p6774_p2, %p6768_p13 }
  0x5b   :  { %6778 = shalt.err (!%p6775_p3)
}
  0x5c   :  { %s6863_s0 = smov 192   ;;  %s6864_s25 = smov 12  }
  0x5d   :  { %77 = dma.hbm_to_vmem [thread:$0]  %s7714_s7, 6144, %s7026_s5, [#allocation6], %s6863_s0, %s6863_s0, %s6864_s25  }
  0x5e   :  { %s6865_s4 = smov [#allocation10]   ;;  %s6866_s27 = smov [#allocation11]  }
  0x5f   :  { %s103_s2 = sshll.u32 %s6865_s4, 4  ;;  %s117_s21 = sshll.u32 %s6866_s27, 4  ;;  %s104_s2 = int_to_ptr.vmem [resolvable:$true] %s103_s2  ;;  %s7060_s21 = int_to_ptr.vmem [resolvable:$true] %s117_s21 }
  0x60   :  { %s6779_s24 = scalar_lea.hbm %s7720_s13, 4096 }
  0x61   :  { %p6780_p4 = scmp.ne.s32.totalorder %s7720_s13, %s6779_s24  ;;  %p6783_p5 = scmp.lt.u32.totalorder %s6779_s24, %s7720_s13 }
  0x63   :  { %p6785_p6 = pnand %p6783_p5, %p6780_p4 }
  0x65   :  { %6788 = shalt.err (!%p6785_p6)
}
  0x66   :  { %s6789_s7 = scalar_lea.vmem %s104_s2, 4096  ;;  %p6794_p8 = scmp.lt.s32.totalorder %s104_s2, %s104_s2 }
  0x67   :  { %p6790_p7 = scmp.ne.s32.totalorder %s104_s2, %s6789_s7  ;;  %p6795_p9 = scmp.lt.s32.totalorder %s6789_s7, %s6789_s7 }
  0x69   :  { %p6796_p10 = por %p6795_p9, %p6794_p8 }
  0x6b   :  { %p6797_p11 = pnand %p6796_p10, %p6790_p7 }
  0x6d   :  { %6800 = shalt.err (!%p6797_p11)
}
  0x6e   :  { %109 = dma.hbm_to_vmem [thread:$0]  %s7720_s13, 4096, %s104_s2, [#allocation9], %s7755_s3, %s7755_s3, %s7754_s30  }
  0x6f   :  { %s6801_s28 = scalar_lea.hbm %s7722_s15, 4096 }
  0x70   :  { %p6802_p12 = scmp.ne.s32.totalorder %s7722_s15, %s6801_s28  ;;  %p6805_p13 = scmp.lt.u32.totalorder %s6801_s28, %s7722_s15 }
  0x72   :  { %p6807_p0 = pnand %p6805_p13, %p6802_p12 }
  0x74   :  { %6810 = shalt.err (!%p6807_p0)
}
  0x75   :  { %s6811_s22 = scalar_lea.vmem %s7060_s21, 4096  ;;  %p6816_p2 = scmp.lt.s32.totalorder %s7060_s21, %s7060_s21 }
  0x76   :  { %p6812_p1 = scmp.ne.s32.totalorder %s7060_s21, %s6811_s22  ;;  %p6817_p3 = scmp.lt.s32.totalorder %s6811_s22, %s6811_s22 }
  0x78   :  { %p6818_p4 = por %p6817_p3, %p6816_p2 }
  0x7a   :  { %p6819_p5 = pnand %p6818_p4, %p6812_p1 }
  0x7c   :  { %6822 = shalt.err (!%p6819_p5)
}
  0x7d   :  { %s7756_s13 = smov 4   ;;  %s7757_s30 = smov 64  }
  0x7e   :  { %123 = dma.hbm_to_vmem [thread:$0]  %s7722_s15, 4096, %s7060_s21, [#allocation12], %s7757_s30, %s7757_s30, %s7756_s13  }
  0x7f   :  { %6845 = dma.done.wait [#allocation3], 16384  }
  0x80   :  { %6846 = vsyncadd [#allocation3], 4294950912 }
  0x81   :  { %6847 = dma.done.wait [#allocation6], 7168  }
  0x82   :  { %6848 = vsyncadd [#allocation6], 4294960128 }
  0x83   :  { %6849 = dma.done.wait [#allocation9], 6144  }
  0x84   :  { %6850 = vsyncadd [#allocation9], 4294961152 }
  0x85   :  { %6851 = dma.done.wait [#allocation12], 4096  }
  0x86   :  { %6852 = vsyncadd [#allocation12], 4294963200  ;;  %v157_v0 = vlaneseq  ;;  %v6867_v1 = vmov 0   ;;  %vm389_vm0 = vcmask 523264   ;;  %s7758_s1 = sld [smem:[#allocation19_spill]]  ;;  %v381_v6 = vld [vmem:[#allocation5] sm:$0xff] }
  0x87   :  { %6379 = vset.pattern.permute.xlu0 %v6867_v1  ;;  %6380 = vset.pattern.permute.xlu1 %v6867_v1  ;;  %v6868_v7 = vmov 0.0   ;;  %v382_v9 = vld [vmem:[#allocation5 + $0x8] sm:$0xff]  ;;  %v383_v10 = vld [vmem:[#allocation5 + $0x10] sm:$0xff]  ;;  %v384_v11 = vld [vmem:[#allocation5 + $0x18] sm:$0xff]  ;;  %s7759_s5 = sld [smem:[#allocation20_spill]]  ;;  %s7760_s23 = sld [smem:[#allocation23_spill]] }
  0x88   :  { %v7099_v2 = vand.u32 127, %v157_v0  ;;  %v7101_v3 = vshrl.u32 %v157_v0, 7  ;;  %v6216_v13 = vpack.c.bf16 %v382_v9, %v381_v6  ;;  %v6220_v14 = vpack.c.bf16 %v384_v11, %v383_v10  ;;  %v385_v15 = vld [vmem:[#allocation5 + $0x20] sm:$0xff]  ;;  %v386_v16 = vld [vmem:[#allocation5 + $0x28] sm:$0xff]  ;;  %v387_v23 = vld [vmem:[#allocation5 + $0x30] sm:$0xff]  ;;  %s7761_s13 = sld [smem:[#allocation24_spill]] }
  0x89   :  { %v236_v17 = vld [vmem:[#allocation2 + $0x80] sm:$0xff]  ;;  %v237_v18 = vld [vmem:[#allocation2 + $0x88] sm:$0xff]  ;;  %v6224_v22 = vpack.c.bf16 %v386_v16, %v385_v15  ;;  %v238_v26 = vld [vmem:[#allocation2 + $0x90] sm:$0xff]  ;;  %s7762_s15 = sld [smem:[#allocation25_spill]]  ;;  %s6871_s24 = smov 96  }
  0x8a   :  { %v355_v4 = vand.u32 7, %v7101_v3  ;;  %6217 = vmatprep.subr.bf16.mxu0 %v6216_v13  ;;  %v6232_v19 = vpack.c.bf16 %v237_v18, %v236_v17  ;;  %v220_v20 = vld [vmem:[#allocation2] sm:$0xff]  ;;  %v221_v21 = vld [vmem:[#allocation2 + $0x8] sm:$0xff]  ;;  %v350_v24 = vadd.s32 8, %v7101_v3  ;;  %v239_v27 = vld [vmem:[#allocation2 + $0x98] sm:$0xff]  ;;  %s6872_s6 = smov 32  }
  0x8b   :  { %6219 = vmatpush3.bf16.msra.mxu0 %v6216_v13  ;;  %v6234_v25 = vpack.c.bf16 %v221_v21, %v220_v20  ;;  %v388_v28 = vld [vmem:[#allocation5 + $0x38] sm:$0xff]  ;;  %v6236_v29 = vpack.c.bf16 %v239_v27, %v238_v26  ;;  %v222_v30 = vld [vmem:[#allocation2 + $0x10] sm:$0xff]  ;;  %v240_v33 = vld [vmem:[#allocation2 + $0xa0] sm:$0xff] }
  0x8c   :  { %vm375_vm1 = vcmp.eq.s32.totalorder %v7099_v2, %v355_v4  ;;  %v155_v5 = vld [vmem:[%s7758_s1] sm:$0xff]  ;;  %v156_v12 = vld [vmem:[%s7758_s1 + $0x8] sm:$0xff]  ;;  %6221 = vmatprep.subr.bf16.mxu0 %v6220_v14  ;;  %6233 = vmatprep.subr.bf16.mxu1 %v6232_v19  ;;  %v223_v31 = vld [vmem:[#allocation2 + $0x18] sm:$0xff]  ;;  %v6228_v35 = vpack.c.bf16 %v388_v28, %v387_v23  ;;  %v362_v37 = vand.u32 7, %v350_v24 }
  0x8d   :  { %v5388_v8 = vsel %vm375_vm1, 1.0, %v6868_v7  ;;  %167 = vperm.xlu0 %6379, %v155_v5   ;;  %6235 = vmatpush3.bf16.msra.mxu1 %v6234_v25  ;;  %v6238_v32 = vpack.c.bf16 %v223_v31, %v222_v30  ;;  %v241_v34 = vld [vmem:[#allocation2 + $0xa8] sm:$0xff]  ;;  %v268_v36 = vld [vmem:[#allocation2 + $0x180] sm:$0xff]  ;;  %v242_v42 = vld [vmem:[#allocation2 + $0xb0] sm:$0xff] }
  0x8e   :  { %5953 = vmatprep.mubr.msk.f32.mxu0 %vm389_vm0, %v5388_v8  ;;  %6237 = vmatprep.subr.bf16.mxu1 %v6236_v29  ;;  %v6240_v38 = vpack.c.bf16 %v241_v34, %v240_v33  ;;  %v224_v39 = vld [vmem:[#allocation2 + $0x20] sm:$0xff]  ;;  %v225_v40 = vld [vmem:[#allocation2 + $0x28] sm:$0xff]  ;;  %v243_v43 = vld [vmem:[#allocation2 + $0xb8] sm:$0xff]  ;;  %vm376_vm2 = vcmp.eq.s32.totalorder %v7099_v2, %v362_v37 }
  0x8f   :  { %6223 = vmatpush3.bf16.msra.mxu0 %v6220_v14  ;;  %v269_v41 = vld [vmem:[#allocation2 + $0x188] sm:$0xff]  ;;  %v6242_v44 = vpack.c.bf16 %v225_v40, %v224_v39  ;;  %v252_v45 = vld [vmem:[#allocation2 + $0x100] sm:$0xff]  ;;  %v6244_v46 = vpack.c.bf16 %v243_v43, %v242_v42  ;;  %v226_v47 = vld [vmem:[#allocation2 + $0x30] sm:$0xff]  ;;  %v5389_v56 = vsel %vm376_vm2, 1.0, %v6868_v7 }
  0x90   :  { %6225 = vmatprep.subr.bf16.mxu0 %v6224_v22  ;;  %v227_v48 = vld [vmem:[#allocation2 + $0x38] sm:$0xff]  ;;  %v6264_v49 = vpack.c.bf16 %v269_v41, %v268_v36  ;;  %v253_v50 = vld [vmem:[#allocation2 + $0x108] sm:$0xff]  ;;  %v244_v51 = vld [vmem:[#allocation2 + $0xc0] sm:$0xff] }
  0x91   :  { %170 = vperm.xlu0 %6379, %v156_v12   ;;  %6239 = vmatpush3.bf16.msra.mxu1 %v6238_v32  ;;  %v245_v52 = vld [vmem:[#allocation2 + $0xc8] sm:$0xff]  ;;  %v270_v53 = vld [vmem:[#allocation2 + $0x190] sm:$0xff]  ;;  %v271_v54 = vld [vmem:[#allocation2 + $0x198] sm:$0xff]  ;;  %v6246_v55 = vpack.c.bf16 %v227_v48, %v226_v47  ;;  %v6266_v57 = vpack.c.bf16 %v253_v50, %v252_v45 }
  0x92   :  { %6241 = vmatprep.subr.bf16.mxu1 %v6240_v38  ;;  %v254_v58 = vld [vmem:[#allocation2 + $0x110] sm:$0xff]  ;;  %v6248_v59 = vpack.c.bf16 %v245_v52, %v244_v51  ;;  %v228_v60 = vld [vmem:[#allocation2 + $0x40] sm:$0xff]  ;;  %v229_v61 = vld [vmem:[#allocation2 + $0x48] sm:$0xff]  ;;  %v6268_v62 = vpack.c.bf16 %v271_v54, %v270_v53 }
  0x93   :  { %6227 = vmatpush3.bf16.msra.mxu0 %v6224_v22  ;;  %v255_v63 = vld [vmem:[#allocation2 + $0x118] sm:$0xff]  ;;  %v246_v0 = vld [vmem:[#allocation2 + $0xd0] sm:$0xff]  ;;  %v272_v5 = vld [vmem:[#allocation2 + $0x1a0] sm:$0xff]  ;;  %v6250_v8 = vpack.c.bf16 %v229_v61, %v228_v60 }
  0x94   :  { %6229 = vmatprep.subr.bf16.mxu0 %v6228_v35  ;;  %v247_v4 = vld [vmem:[#allocation2 + $0xd8] sm:$0xff]  ;;  %v273_v6 = vld [vmem:[#allocation2 + $0x1a8] sm:$0xff]  ;;  %v6270_v9 = vpack.c.bf16 %v255_v63, %v254_v58  ;;  %v256_v10 = vld [vmem:[#allocation2 + $0x120] sm:$0xff] }
  0x95   :  { %6243 = vmatpush3.bf16.msra.mxu1 %v6242_v44  ;;  %v6252_v11 = vpack.c.bf16 %v247_v4, %v246_v0  ;;  %v230_v12 = vld [vmem:[#allocation2 + $0x50] sm:$0xff]  ;;  %v231_v13 = vld [vmem:[#allocation2 + $0x58] sm:$0xff]  ;;  %v6272_v14 = vpack.c.bf16 %v273_v6, %v272_v5  ;;  %v257_v15 = vld [vmem:[#allocation2 + $0x128] sm:$0xff] }
  0x96   :  { %6245 = vmatprep.subr.bf16.mxu1 %v6244_v46  ;;  %v248_v16 = vld [vmem:[#allocation2 + $0xe0] sm:$0xff]  ;;  %v249_v17 = vld [vmem:[#allocation2 + $0xe8] sm:$0xff]  ;;  %v274_v18 = vld [vmem:[#allocation2 + $0x1b0] sm:$0xff]  ;;  %v6254_v20 = vpack.c.bf16 %v231_v13, %v230_v12  ;;  %v6274_v21 = vpack.c.bf16 %v257_v15, %v256_v10 }
  0x97   :  { %6231 = vmatpush3.bf16.msra.mxu0 %v6228_v35  ;;  %v275_v19 = vld [vmem:[#allocation2 + $0x1b8] sm:$0xff]  ;;  %v258_v22 = vld [vmem:[#allocation2 + $0x130] sm:$0xff]  ;;  %v6256_v23 = vpack.c.bf16 %v249_v17, %v248_v16  ;;  %v232_v24 = vld [vmem:[#allocation2 + $0x60] sm:$0xff] }
  0x98   :  { %6265 = vmatprep.subr.bf16.mxu0 %v6264_v49  ;;  %v233_v25 = vld [vmem:[#allocation2 + $0x68] sm:$0xff]  ;;  %v6276_v26 = vpack.c.bf16 %v275_v19, %v274_v18  ;;  %v259_v27 = vld [vmem:[#allocation2 + $0x138] sm:$0xff]  ;;  %v250_v28 = vld [vmem:[#allocation2 + $0xf0] sm:$0xff]  ;;  %v159_v19 = vadd.s32 128, %v7099_v2 }
  0x99   :  { %6247 = vmatpush3.bf16.msra.mxu1 %v6246_v55  ;;  %v251_v29 = vld [vmem:[#allocation2 + $0xf8] sm:$0xff]  ;;  %v276_v30 = vld [vmem:[#allocation2 + $0x1c0] sm:$0xff]  ;;  %v277_v31 = vld [vmem:[#allocation2 + $0x1c8] sm:$0xff]  ;;  %v6258_v32 = vpack.c.bf16 %v233_v25, %v232_v24  ;;  %v6278_v33 = vpack.c.bf16 %v259_v27, %v258_v22 }
  0x9a   :  { %5954 = vmatmul.mubr.msk.f32.vlgmr.msra.gmra.mrb[0].mxu0 %vm389_vm0, %v5389_v56  ;;  %6249 = vmatprep.subr.bf16.mxu1 %v6248_v59  ;;  %v260_v34 = vld [vmem:[#allocation2 + $0x140] sm:$0xff]  ;;  %v6260_v35 = vpack.c.bf16 %v251_v29, %v250_v28  ;;  %v234_v36 = vld [vmem:[#allocation2 + $0x70] sm:$0xff]  ;;  %v235_v37 = vld [vmem:[#allocation2 + $0x78] sm:$0xff]  ;;  %v6280_v38 = vpack.c.bf16 %v277_v31, %v276_v30 }
  0x9b   :  { %6267 = vmatpush3.bf16.msra.mxu0 %v6266_v57  ;;  %v261_v39 = vld [vmem:[#allocation2 + $0x148] sm:$0xff]  ;;  %v300_v40 = vld [vmem:[#allocation2 + $0x280] sm:$0xff]  ;;  %v278_v42 = vld [vmem:[#allocation2 + $0x1d0] sm:$0xff]  ;;  %v6262_v44 = vpack.c.bf16 %v235_v37, %v234_v36 }
  0x9c   :  { %6269 = vmatprep.subr.bf16.mxu0 %v6268_v62  ;;  %v301_v41 = vld [vmem:[#allocation2 + $0x288] sm:$0xff]  ;;  %v279_v43 = vld [vmem:[#allocation2 + $0x1d8] sm:$0xff]  ;;  %v6282_v45 = vpack.c.bf16 %v261_v39, %v260_v34  ;;  %v262_v48 = vld [vmem:[#allocation2 + $0x150] sm:$0xff]  ;;  %v6869_v34 = vmov 1.0  }
  0x9d   :  { %6251 = vmatpush3.bf16.msra.mxu1 %v6250_v8  ;;  %v6296_v46 = vpack.c.bf16 %v301_v41, %v300_v40  ;;  %v6284_v47 = vpack.c.bf16 %v279_v43, %v278_v42  ;;  %v263_v49 = vld [vmem:[#allocation2 + $0x158] sm:$0xff]  ;;  %v280_v50 = vld [vmem:[#allocation2 + $0x1e0] sm:$0xff]  ;;  %v281_v51 = vld [vmem:[#allocation2 + $0x1e8] sm:$0xff]  ;;  %v7144_v42 = vadd.s32 640, %v7099_v2  ;;  %v7147_v43 = vadd.s32 896, %v7099_v2 }
  0x9e   :  { %6253 = vmatprep.subr.bf16.mxu1 %v6252_v11  ;;  %v6286_v52 = vpack.c.bf16 %v263_v49, %v262_v48  ;;  %v6288_v53 = vpack.c.bf16 %v281_v51, %v280_v50  ;;  %v264_v54 = vld [vmem:[#allocation2 + $0x160] sm:$0xff]  ;;  %v265_v55 = vld [vmem:[#allocation2 + $0x168] sm:$0xff]  ;;  %v282_v56 = vld [vmem:[#allocation2 + $0x1f0] sm:$0xff] }
  0x9f   :  { %6271 = vmatpush3.bf16.msra.mxu0 %v6270_v9  ;;  %v283_v57 = vld [vmem:[#allocation2 + $0x1f8] sm:$0xff]  ;;  %v6290_v58 = vpack.c.bf16 %v265_v55, %v264_v54  ;;  %v266_v60 = vld [vmem:[#allocation2 + $0x170] sm:$0xff]  ;;  %v332_v62 = vld [vmem:[#allocation2 + $0x380] sm:$0xff] }
  0xa0   :  { %6273 = vmatprep.subr.bf16.mxu0 %v6272_v14  ;;  %v6292_v59 = vpack.c.bf16 %v283_v57, %v282_v56  ;;  %v267_v61 = vld [vmem:[#allocation2 + $0x178] sm:$0xff]  ;;  %v333_v63 = vld [vmem:[#allocation2 + $0x388] sm:$0xff]  ;;  %v771_v5 = vld [vmem:[%s7759_s5] sm:$0xff] }
  0xa1   :  { %6255 = vmatpush3.bf16.msra.mxu1 %v6254_v20  ;;  %v6294_v0 = vpack.c.bf16 %v267_v61, %v266_v60  ;;  %v6328_v4 = vpack.c.bf16 %v333_v63, %v332_v62  ;;  %v772_v6 = vld [vmem:[%s7759_s5 + $0x8] sm:$0xff]  ;;  %vm774_vm3 = vcmp.eq.s32.totalorder %v771_v5, 0  ;;  %vm797_vm5 = vcmp.eq.s32.totalorder %v771_v5, 1  ;;  %v284_v14 = vld [vmem:[#allocation2 + $0x200] sm:$0xff]  ;;  %v302_v18 = vld [vmem:[#allocation2 + $0x290] sm:$0xff] }
  0xa2   :  { %6257 = vmatprep.subr.bf16.mxu1 %v6256_v23  ;;  %vm775_vm4 = vcmp.eq.s32.totalorder %v772_v6, 0  ;;  %vm798_vm6 = vcmp.eq.s32.totalorder %v772_v6, 1  ;;  %v5408_v8 = vsel %vm774_vm3, 1.0, %v6868_v7  ;;  %v5411_v10 = vsel %vm797_vm5, 1.0, %v6868_v7  ;;  %v285_v15 = vld [vmem:[#allocation2 + $0x208] sm:$0xff]  ;;  %v316_v16 = vld [vmem:[#allocation2 + $0x300] sm:$0xff] }
  0xa3   :  { %6275 = vmatpush3.bf16.msra.mxu0 %v6274_v21  ;;  %v5409_v9 = vsel %vm775_vm4, 1.0, %v6868_v7  ;;  %v5412_v11 = vsel %vm798_vm6, 1.0, %v6868_v7  ;;  %v317_v17 = vld [vmem:[#allocation2 + $0x308] sm:$0xff]  ;;  %v161_v20 = vadd.s32 384, %v7099_v2  ;;  %v160_v21 = vadd.s32 256, %v7099_v2  ;;  %v303_v22 = vld [vmem:[#allocation2 + $0x298] sm:$0xff] }
  0xa4   :  { %6277 = vmatprep.subr.bf16.mxu0 %v6276_v26  ;;  %v6381_v12 = vpack.i.bf16 %v5409_v9, %v5408_v8  ;;  %v6386_v13 = vpack.i.bf16 %v5412_v11, %v5411_v10  ;;  %v334_v23 = vld [vmem:[#allocation2 + $0x390] sm:$0xff]  ;;  %v335_v24 = vld [vmem:[#allocation2 + $0x398] sm:$0xff]  ;;  %v6298_v26 = vpack.c.bf16 %v285_v15, %v284_v14  ;;  %v6330_v27 = vpack.c.bf16 %v317_v17, %v316_v16  ;;  %v305_v36 = vld [vmem:[#allocation2 + $0x2a8] sm:$0xff] }
  0xa5   :  { %6259 = vmatpush3.bf16.msra.mxu1 %v6258_v32  ;;  %v6300_v28 = vpack.c.bf16 %v303_v22, %v302_v18  ;;  %v6332_v29 = vpack.c.bf16 %v335_v24, %v334_v23  ;;  %v286_v30 = vld [vmem:[#allocation2 + $0x210] sm:$0xff]  ;;  %v287_v31 = vld [vmem:[#allocation2 + $0x218] sm:$0xff]  ;;  %v336_v37 = vld [vmem:[#allocation2 + $0x3a0] sm:$0xff] }
  0xa6   :  { %6261 = vmatprep.subr.bf16.mxu1 %v6260_v35  ;;  %6382 = vperm.xlu1 %6380, %v6381_v12   ;;  %v318_v32 = vld [vmem:[#allocation2 + $0x310] sm:$0xff]  ;;  %v304_v35 = vld [vmem:[#allocation2 + $0x2a0] sm:$0xff]  ;;  %v6302_v40 = vpack.c.bf16 %v287_v31, %v286_v30  ;;  %v307_v51 = vld [vmem:[#allocation2 + $0x2b8] sm:$0xff] }
  0xa7   :  { %6279 = vmatpush3.bf16.msra.mxu0 %v6278_v33  ;;  %v319_v33 = vld [vmem:[#allocation2 + $0x318] sm:$0xff]  ;;  %v306_v48 = vld [vmem:[#allocation2 + $0x2b0] sm:$0xff]  ;;  %v6304_v49 = vpack.c.bf16 %v305_v36, %v304_v35  ;;  %v308_v62 = vld [vmem:[#allocation2 + $0x2c0] sm:$0xff] }
  0xa8   :  { %6281 = vmatprep.subr.bf16.mxu0 %v6280_v38  ;;  %v337_v38 = vld [vmem:[#allocation2 + $0x3a8] sm:$0xff]  ;;  %v6334_v41 = vpack.c.bf16 %v319_v33, %v318_v32  ;;  %v290_v56 = vld [vmem:[#allocation2 + $0x230] sm:$0xff]  ;;  %v291_v57 = vld [vmem:[#allocation2 + $0x238] sm:$0xff] }
  0xa9   :  { %6263 = vmatpush3.bf16.msra.mxu1 %v6262_v44  ;;  %v288_v44 = vld [vmem:[#allocation2 + $0x220] sm:$0xff]  ;;  %v6336_v50 = vpack.c.bf16 %v337_v38, %v336_v37  ;;  %v322_v60 = vld [vmem:[#allocation2 + $0x330] sm:$0xff]  ;;  %v323_v61 = vld [vmem:[#allocation2 + $0x338] sm:$0xff]  ;;  %v6310_v5 = vpack.c.bf16 %v291_v57, %v290_v56  ;;  %v162_v57 = vadd.s32 512, %v7099_v2 }
  0xaa   :  { %6297 = vmatprep.subr.bf16.mxu1 %v6296_v46  ;;  %6387 = vperm.xlu1 %6380, %v6386_v13   ;;  %v320_v46 = vld [vmem:[#allocation2 + $0x320] sm:$0xff]  ;;  %v309_v63 = vld [vmem:[#allocation2 + $0x2c8] sm:$0xff]  ;;  %v6342_v6 = vpack.c.bf16 %v323_v61, %v322_v60  ;;  %v310_v14 = vld [vmem:[#allocation2 + $0x2d0] sm:$0xff] }
  0xab   :  { %6283 = vmatpush3.bf16.msra.mxu0 %v6282_v45  ;;  %v289_v45 = vld [vmem:[#allocation2 + $0x228] sm:$0xff]  ;;  %v292_v8 = vld [vmem:[#allocation2 + $0x240] sm:$0xff]  ;;  %v6312_v10 = vpack.c.bf16 %v309_v63, %v308_v62  ;;  %v311_v15 = vld [vmem:[#allocation2 + $0x2d8] sm:$0xff] }
  0xac   :  { %6285 = vmatprep.subr.bf16.mxu0 %v6284_v47  ;;  %v321_v47 = vld [vmem:[#allocation2 + $0x328] sm:$0xff]  ;;  %v6306_v54 = vpack.c.bf16 %v289_v45, %v288_v44  ;;  %v324_v12 = vld [vmem:[#allocation2 + $0x340] sm:$0xff]  ;;  %v342_v16 = vld [vmem:[#allocation2 + $0x3d0] sm:$0xff]  ;;  %v6316_v22 = vpack.c.bf16 %v311_v15, %v310_v14 }
  0xad   :  { %v6338_v55 = vpack.c.bf16 %v321_v47, %v320_v46  ;;  %v293_v9 = vld [vmem:[#allocation2 + $0x248] sm:$0xff]  ;;  %v343_v17 = vld [vmem:[#allocation2 + $0x3d8] sm:$0xff]  ;;  %v326_v24 = vld [vmem:[#allocation2 + $0x350] sm:$0xff] }
  0xae   :  { %v325_v13 = vld [vmem:[#allocation2 + $0x348] sm:$0xff]  ;;  %v6314_v18 = vpack.c.bf16 %v293_v9, %v292_v8  ;;  %v6348_v23 = vpack.c.bf16 %v343_v17, %v342_v16  ;;  %v296_v33 = vld [vmem:[#allocation2 + $0x260] sm:$0xff]  ;;  %v315_v44 = vld [vmem:[#allocation2 + $0x2f8] sm:$0xff] }
  0xaf   :  { %6287 = vmatpush3.bf16.msra.mxu0 %v6286_v52  ;;  %v338_v52 = vld [vmem:[#allocation2 + $0x3b0] sm:$0xff]  ;;  %v345_v30 = vld [vmem:[#allocation2 + $0x3e8] sm:$0xff]  ;;  %v328_v38 = vld [vmem:[#allocation2 + $0x360] sm:$0xff] }
  0xb0   :  { %6289 = vmatprep.subr.bf16.mxu0 %v6288_v53  ;;  %v339_v53 = vld [vmem:[#allocation2 + $0x3b8] sm:$0xff]  ;;  %v297_v35 = vld [vmem:[#allocation2 + $0x268] sm:$0xff]  ;;  %v346_v45 = vld [vmem:[#allocation2 + $0x3f0] sm:$0xff] }
  0xb1   :  { %v347_v46 = vld [vmem:[#allocation2 + $0x3f8] sm:$0xff]  ;;  %v6322_v47 = vpack.c.bf16 %v297_v35, %v296_v33  ;;  %v5410_v15 = vld [vmem:[%s7760_s23] ss:$0 sm:$0xff]  ;;  %v5413_v16 = vld [vmem:[%s7760_s23 + $0x1] ss:$0 sm:$0xff] }
  0xb3   :  { %6291 = vmatpush3.bf16.msra.mxu0 %v6290_v58  ;;  %v6308_v58 = vpack.c.bf16 %v307_v51, %v306_v48  ;;  %v6356_v51 = vpack.c.bf16 %v347_v46, %v346_v45 }
  0xb4   :  { %6293 = vmatprep.subr.bf16.mxu0 %v6292_v59  ;;  %v6340_v59 = vpack.c.bf16 %v339_v53, %v338_v52  ;;  %v299_v52 = vld [vmem:[#allocation2 + $0x278] sm:$0xff]  ;;  %v330_v53 = vld [vmem:[#allocation2 + $0x370] sm:$0xff] }
  0xb7   :  { %6295 = vmatpush3.bf16.msra.mxu0 %v6294_v0  ;;  %v340_v0 = vld [vmem:[#allocation2 + $0x3c0] sm:$0xff] }
  0xb8   :  { %6329 = vmatprep.subr.bf16.mxu0 %v6328_v4  ;;  %v341_v4 = vld [vmem:[#allocation2 + $0x3c8] sm:$0xff] }
  0xb9   :  { %v6344_v11 = vpack.c.bf16 %v341_v4, %v340_v0 }
 0x10c   :  { %v7130_v25 = vpop.permute.xlu0 %167 }
 0x10d   :  { %vm173_vm7 = vcmp.eq.s32.totalorder %v159_v19, %v7130_v25  ;;  %vm175_vm8 = vcmp.eq.s32.totalorder %v161_v20, %v7130_v25  ;;  %vm172_vm9 = vcmp.eq.s32.totalorder %v7099_v2, %v7130_v25  ;;  %vm174_vm10 = vcmp.eq.s32.totalorder %v160_v21, %v7130_v25 }
 0x10e   :  { %5392 = vmatprep.mubr.msk.f32.mxu1 %vm173_vm7, %v6869_v34  ;;  %5396 = vmatprep.mubr.msk.f32.mxu0 %vm175_vm8, %v6869_v34  ;;  %vm177_vm15 = vcmp.eq.s32.totalorder %v7144_v42, %v7130_v25  ;;  %vm179_vm1 = vcmp.eq.s32.totalorder %v7147_v43, %v7130_v25  ;;  %vm176_vm2 = vcmp.eq.s32.totalorder %v162_v57, %v7130_v25  ;;  %vm6870_vm8 = vmmov 0  }
 0x10f   :  { %5393 = vmatmul.mubr.msk.f32.vlgmr.msra.gmra.mrb[0].mxu1 %vm172_vm9, %v6869_v34  ;;  %5397 = vmatmul.mubr.msk.f32.vlgmr.msra.gmra.mrb[2].mxu0 %vm174_vm10, %v6869_v34  ;;  %vm1126_vm9 = vcmask 261120   ;;  %vm1204_vm10 = vcmask 64512  }
 0x110   :  { %6299 = vmatpush3.bf16.msra.mxu1 %v6298_v26  ;;  %6331 = vmatpush3.bf16.msra.mxu0 %v6330_v27  ;;  %v7141_v39 = vpop.permute.xlu0 %170  ;;  %v327_v26 = vld [vmem:[#allocation2 + $0x358] sm:$0xff]  ;;  %v312_v27 = vld [vmem:[#allocation2 + $0x2e0] sm:$0xff] }
 0x111   :  { %vm181_vm11 = vcmp.eq.s32.totalorder %v159_v19, %v7141_v39  ;;  %vm183_vm12 = vcmp.eq.s32.totalorder %v161_v20, %v7141_v39  ;;  %6301 = vmatprep.subr.bf16.mxu1 %v6300_v28  ;;  %6333 = vmatprep.subr.bf16.mxu0 %v6332_v29  ;;  %vm180_vm13 = vcmp.eq.s32.totalorder %v7099_v2, %v7141_v39  ;;  %v294_v20 = vld [vmem:[#allocation2 + $0x250] sm:$0xff]  ;;  %v313_v28 = vld [vmem:[#allocation2 + $0x2e8] sm:$0xff]  ;;  %v344_v29 = vld [vmem:[#allocation2 + $0x3e0] sm:$0xff] }
 0x112   :  { %5394 = vmatprep.mubr.msk.f32.mxu1 %vm181_vm11, %v6869_v34  ;;  %5398 = vmatprep.mubr.msk.f32.mxu0 %vm183_vm12, %v6869_v34  ;;  %vm182_vm14 = vcmp.eq.s32.totalorder %v160_v21, %v7141_v39  ;;  %v6346_v19 = vpack.c.bf16 %v325_v13, %v324_v12  ;;  %v295_v21 = vld [vmem:[#allocation2 + $0x258] sm:$0xff]  ;;  %v6350_v32 = vpack.c.bf16 %v327_v26, %v326_v24  ;;  %vm1802_vm11 = vcmask 785408  }
 0x113   :  { %5395 = vmatmul.mubr.msk.f32.gmra.mrb[2].mxu1 %vm180_vm13, %v6869_v34  ;;  %5399 = vmatmul.mubr.msk.f32.gmra.mrb[4].mxu0 %vm182_vm14, %v6869_v34  ;;  %v6318_v31 = vpack.c.bf16 %v295_v21, %v294_v20  ;;  %v6320_v36 = vpack.c.bf16 %v313_v28, %v312_v27  ;;  %v6352_v37 = vpack.c.bf16 %v345_v30, %v344_v29 }
 0x114   :  { %6303 = vmatpush3.bf16.msra.mxu1 %v6302_v40  ;;  %6335 = vmatpush3.bf16.msra.mxu0 %v6334_v41  ;;  %v329_v40 = vld [vmem:[#allocation2 + $0x368] sm:$0xff]  ;;  %v314_v41 = vld [vmem:[#allocation2 + $0x2f0] sm:$0xff]  ;;  %vm185_vm4 = vcmp.eq.s32.totalorder %v7144_v42, %v7141_v39  ;;  %vm187_vm5 = vcmp.eq.s32.totalorder %v7147_v43, %v7141_v39  ;;  %vm184_vm6 = vcmp.eq.s32.totalorder %v162_v57, %v7141_v39 }
 0x115   :  { %5400 = vmatprep.mubr.msk.f32.mxu1 %vm177_vm15, %v6869_v34  ;;  %5404 = vmatprep.mubr.msk.f32.mxu0 %vm179_vm1, %v6869_v34  ;;  %v6354_v48 = vpack.c.bf16 %v329_v40, %v328_v38 }
 0x116   :  { %6305 = vmatprep.subr.bf16.mxu1 %v6304_v49  ;;  %6337 = vmatprep.subr.bf16.mxu0 %v6336_v50  ;;  %v298_v49 = vld [vmem:[#allocation2 + $0x270] sm:$0xff]  ;;  %v6324_v50 = vpack.c.bf16 %v315_v44, %v314_v41 }
 0x118   :  { %6307 = vmatpush3.bf16.msra.mxu1 %v6306_v54  ;;  %6339 = vmatpush3.bf16.msra.mxu0 %v6338_v55  ;;  %v331_v54 = vld [vmem:[#allocation2 + $0x378] sm:$0xff]  ;;  %v6326_v55 = vpack.c.bf16 %v299_v52, %v298_v49  ;;  %v6423_v49 = vld [vmem:[#allocation7 + $0x4] ss:$12 sps:$4 sm:$0xff]  }
 0x119   :  { %6309 = vmatprep.subr.bf16.mxu1 %v6308_v58  ;;  %6341 = vmatprep.subr.bf16.mxu0 %v6340_v59  ;;  %v6358_v56 = vpack.c.bf16 %v331_v54, %v330_v53  ;;  %v164_v58 = vadd.s32 768, %v7099_v2  ;;  %v6425_v52 = vld [vmem:[#allocation7 + $0x18] ss:$12 sps:$4 sm:$0xff]  }
 0x11b   :  { %vm178_vm3 = vcmp.eq.s32.totalorder %v164_v58, %v7130_v25  ;;  %vm186_vm7 = vcmp.eq.s32.totalorder %v164_v58, %v7141_v39 }
 0x11c   :  { %6311 = vmatpush3.bf16.msra.mxu1 %v6310_v5  ;;  %6343 = vmatpush3.bf16.msra.mxu0 %v6342_v6 }
 0x11d   :  { %6313 = vmatprep.subr.bf16.mxu1 %v6312_v10  ;;  %6345 = vmatprep.subr.bf16.mxu0 %v6344_v11 }
 0x120   :  { %6315 = vmatpush3.bf16.msra.mxu1 %v6314_v18  ;;  %6347 = vmatpush3.bf16.msra.mxu0 %v6346_v19 }
 0x121   :  { %6317 = vmatprep.subr.bf16.mxu1 %v6316_v22  ;;  %6349 = vmatprep.subr.bf16.mxu0 %v6348_v23 }
 0x124   :  { %6319 = vmatpush3.bf16.msra.mxu1 %v6318_v31  ;;  %6351 = vmatpush3.bf16.msra.mxu0 %v6350_v32 }
 0x125   :  { %6321 = vmatprep.subr.bf16.mxu1 %v6320_v36  ;;  %6353 = vmatprep.subr.bf16.mxu0 %v6352_v37  ;;  %v6383_v11 = vpop.permute.xlu1 %6382 }
 0x126   :  { %v6384_v13 = vunpack.i.l.bf16 %v6383_v11  ;;  %v6385_v19 = vunpack.i.h.bf16 %v6383_v11  ;;  %v6449_v11 = vld [vmem:[#allocation7 + $0xa8] ss:$12 sps:$4 sm:$0xff]  }
 0x128   :  { %6323 = vmatpush3.bf16.msra.mxu1 %v6322_v47  ;;  %6355 = vmatpush3.bf16.msra.mxu0 %v6354_v48  ;;  %v794_v23 = vmul.f32 %v6384_v13, %v5410_v15  ;;  %v795_v31 = vmul.f32 %v6385_v19, %v5410_v15  ;;  %v6421_v48 = vld [vmem:[#allocation7] ss:$12 sps:$4 sm:$0xff]   ;;  %v6452_v13 = vld [vmem:[#allocation7 + $0xb0] ss:$12 sps:$4 sm:$0xff]  }
 0x129   :  { %6325 = vmatprep.subr.bf16.mxu1 %v6324_v50  ;;  %6357 = vmatprep.subr.bf16.mxu0 %v6356_v51  ;;  %v6388_v12 = vpop.permute.xlu1 %6387  ;;  %v6424_v50 = vld [vmem:[#allocation7 + $0x8] ss:$12 sps:$4 sm:$0xff]  }
 0x12a   :  { %v6389_v14 = vunpack.i.l.bf16 %v6388_v12  ;;  %v6390_v20 = vunpack.i.h.bf16 %v6388_v12  ;;  %v6427_v51 = vld [vmem:[#allocation7 + $0x1c] ss:$12 sps:$4 sm:$0xff]   ;;  %v6451_v12 = vld [vmem:[#allocation7 + $0xac] ss:$12 sps:$4 sm:$0xff]  }
 0x12c   :  { %6327 = vmatpush3.bf16.msra.mxu1 %v6326_v55  ;;  %6359 = vmatpush3.bf16.msra.mxu0 %v6358_v56  ;;  %v817_v24 = vmul.f32 %v6389_v14, %v5413_v16  ;;  %v818_v32 = vmul.f32 %v6390_v20, %v5413_v16 }
 0x12d   :  { %5956 = vmatprep.subr.bf16.mxu0 %v6868_v7  ;;  %1042 = vmatprep.subr.bf16.mxu1 %v6423_v49 }
 0x12e   :  { %v819_v40 = vadd.f32 %v817_v24, %v794_v23  ;;  %v820_v46 = vadd.f32 %v818_v32, %v795_v31  ;;  %v7226_v32 = vsub.s32 1, %v7101_v3 }
 0x12f   :  { %5401 = vmatmul.mubr.msk.f32.vlgmr.msra.gmra.mrb[4].mxu1 %vm176_vm2, %v6869_v34  ;;  %5405 = vmatmul.mubr.msk.f32.vlgmr.msra.gmra.mrb[6].mxu0 %vm178_vm3, %v6869_v34 }
 0x130   :  { %5402 = vmatprep.mubr.msk.f32.mxu1 %vm185_vm4, %v6869_v34  ;;  %5406 = vmatprep.mubr.msk.f32.mxu0 %vm187_vm5, %v6869_v34 }
 0x131   :  { %5957 = vmatpush3.bf16.msra.mxu0 %v6424_v50  ;;  %1043 = vmatpush1.bf16.msra.mxu1 %v6421_v48 }
 0x132   :  { %5958 = vmatprep.subr.bf16.mxu0 %v6868_v7  ;;  %1044 = vmatprep.subr.bf16.mxu1 %v6427_v51 }
 0x133   :  { %5403 = vmatmul.mubr.msk.f32.gmra.mrb[6].mxu1 %vm184_vm6, %v6869_v34  ;;  %5407 = vmatmul.mubr.msk.f32.gmra.mrb[8].mxu0 %vm186_vm7, %v6869_v34 }
 0x134   :  { %1074 = vmatprep.mubr.bf16.mxu1 %v6867_v1  ;;  %5972 = vmatprep.mubr.msk.bf16.mxu0 %vm6870_vm8, %v6868_v7 }
 0x135   :  { %1045 = vmatpush1.bf16.msra.mxu1 %v6425_v52 }
 0x16d   :  { %v5955_v2 = vpop.f32.mrb[0].mxu0 }
 0x16e   :  { %v462_v25 = vpop.f32.mrb[1].mxu0 }
 0x1e2   :  { %v5664_v42 = vpop.f32.mrb[0].mxu1  ;;  %v5702_v59 = vpop.f32.mrb[2].mxu0 }
 0x1e3   :  { %v5665_v60 = vpop.f32.mrb[1].mxu1  ;;  %v5703_v43 = vpop.f32.mrb[3].mxu0 }
 0x1e4   :  { %v5666_v61 = vadd.f32 %v5665_v60, %v5664_v42  ;;  %v5704_v62 = vadd.f32 %v5703_v43, %v5702_v59  ;;  %v6428_v42 = vld [vmem:[#allocation7 + $0x20] ss:$12 sps:$4 sm:$0xff]   ;;  %v6429_v60 = vld [vmem:[#allocation7 + $0x30] ss:$12 sps:$4 sm:$0xff]   ;;  %v6432_v43 = vld [vmem:[#allocation7 + $0x38] ss:$12 sps:$4 sm:$0xff]  }
 0x1e5   :  { %5959 = vmatpush3.bf16.msra.mxu0 %v6428_v42  ;;  %v6431_v59 = vld [vmem:[#allocation7 + $0x34] ss:$12 sps:$4 sm:$0xff]  }
 0x1e6   :  { %v538_v63 = vadd.f32 %v5666_v61, %v462_v25  ;;  %v5667_v0 = vpop.f32.mrb[2].mxu1  ;;  %v5705_v4 = vpop.f32.mrb[4].mxu0  ;;  %5960 = vmatprep.subr.bf16.mxu0 %v6868_v7  ;;  %1046 = vmatprep.subr.bf16.mxu1 %v6431_v59  ;;  %v6435_v61 = vld [vmem:[#allocation7 + $0x4c] ss:$12 sps:$4 sm:$0xff]  }
 0x1e7   :  { %v5668_v5 = vpop.f32.mrb[3].mxu1  ;;  %v5706_v6 = vpop.f32.mrb[5].mxu0  ;;  %1047 = vmatpush1.bf16.msra.mxu1 %v6429_v60 }
 0x1e8   :  { %v613_v39 = vadd.f32 %v5704_v62, %v538_v63  ;;  %v5669_v8 = vadd.f32 %v5668_v5, %v5667_v0  ;;  %v5707_v9 = vadd.f32 %v5706_v6, %v5705_v4  ;;  %v6433_v62 = vld [vmem:[#allocation7 + $0x48] ss:$12 sps:$4 sm:$0xff]   ;;  %v6436_v63 = vld [vmem:[#allocation7 + $0x50] ss:$12 sps:$4 sm:$0xff]   ;;  %1048 = vmatprep.subr.bf16.mxu1 %v6435_v61  ;;  %v6437_v4 = vld [vmem:[#allocation7 + $0x60] ss:$12 sps:$4 sm:$0xff]  }
 0x1e9   :  { %5961 = vmatpush3.bf16.msra.mxu0 %v6432_v43  ;;  %v6439_v0 = vld [vmem:[#allocation7 + $0x64] ss:$12 sps:$4 sm:$0xff]   ;;  %v6440_v5 = vld [vmem:[#allocation7 + $0x68] ss:$12 sps:$4 sm:$0xff]  }
 0x1ea   :  { %v543_v10 = vadd.f32 %v5955_v2, %v5669_v8  ;;  %5962 = vmatprep.subr.bf16.mxu0 %v6868_v7  ;;  %v6443_v6 = vld [vmem:[#allocation7 + $0x7c] ss:$12 sps:$4 sm:$0xff]   ;;  %v6444_v8 = vld [vmem:[#allocation7 + $0x80] ss:$12 sps:$4 sm:$0xff]  }
 0x1eb   :  { %1049 = vmatpush1.bf16.msra.mxu1 %v6433_v62 }
 0x1ec   :  { %v618_v34 = vadd.f32 %v5707_v9, %v543_v10  ;;  %1050 = vmatprep.subr.bf16.mxu1 %v6439_v0  ;;  %v6447_v9 = vld [vmem:[#allocation7 + $0x94] ss:$12 sps:$4 sm:$0xff]   ;;  %v6445_v10 = vld [vmem:[#allocation7 + $0x90] ss:$12 sps:$4 sm:$0xff]  }
 0x1ed   :  { %5963 = vmatpush3.bf16.msra.mxu0 %v6436_v63 }
 0x1ee   :  { %5964 = vmatprep.subr.bf16.mxu0 %v6868_v7 }
 0x1ef   :  { %1051 = vmatpush1.bf16.msra.mxu1 %v6437_v4 }
 0x1f0   :  { %1052 = vmatprep.subr.bf16.mxu1 %v6443_v6 }
 0x1f1   :  { %5965 = vmatpush3.bf16.msra.mxu0 %v6440_v5 }
 0x1f2   :  { %5966 = vmatprep.subr.bf16.mxu0 %v6868_v7 }
 0x1f5   :  { %5967 = vmatpush3.bf16.msra.mxu0 %v6444_v8 }
 0x1f6   :  { %5968 = vmatprep.subr.bf16.mxu0 %v6868_v7 }
 0x202   :  { %v5740_v17 = vpop.f32.mrb[4].mxu1  ;;  %v5778_v18 = vpop.f32.mrb[6].mxu0 }
 0x203   :  { %v5741_v21 = vpop.f32.mrb[5].mxu1  ;;  %v5779_v22 = vpop.f32.mrb[7].mxu0 }
 0x204   :  { %v5742_v26 = vadd.f32 %v5741_v21, %v5740_v17  ;;  %v5780_v27 = vadd.f32 %v5779_v22, %v5778_v18  ;;  %v5414_v22 = vld [vmem:[%s7761_s13] ss:$0 sm:$0xff] }
 0x206   :  { %v688_v28 = vadd.f32 %v5742_v26, %v613_v39  ;;  %v5743_v29 = vpop.f32.mrb[6].mxu1  ;;  %v5781_v30 = vpop.f32.mrb[8].mxu0  ;;  %v6441_v39 = vld [vmem:[#allocation7 + $0x78] ss:$12 sps:$4 sm:$0xff]  }
 0x207   :  { %v5744_v33 = vpop.f32.mrb[7].mxu1  ;;  %v5782_v35 = vpop.f32.mrb[9].mxu0  ;;  %1053 = vmatpush1.bf16.msra.mxu1 %v6441_v39 }
 0x208   :  { %v763_v36 = vadd.f32 %v5780_v27, %v688_v28  ;;  %v5745_v37 = vadd.f32 %v5744_v33, %v5743_v29  ;;  %v5783_v38 = vadd.f32 %v5782_v35, %v5781_v30  ;;  %1054 = vmatprep.subr.bf16.mxu1 %v6447_v9  ;;  %v5415_v27 = vld [vmem:[%s7762_s15] ss:$0 sm:$0xff]  ;;  %v7232_v35 = vsub.s32 0, %v7101_v3 }
 0x209   :  { %v897_v33 = vld [vmem:[%s7715_s8] sm:$0x7] }
 0x20a   :  { %v693_v41 = vadd.f32 %v5745_v37, %v618_v34  ;;  %v821_v44 = vadd.f32 %v819_v40, %v763_v36  ;;  %v6448_v34 = vld [vmem:[#allocation7 + $0x98] ss:$12 sps:$4 sm:$0xff]   ;;  %v909_v36 = vsub.s32 2, %v7101_v3  ;;  %v906_v37 = vrot.slane %v897_v33, %v7226_v32 }
 0x20b   :  { %1055 = vmatpush1.bf16.msra.mxu1 %v6445_v10  ;;  %5969 = vmatpush3.bf16.msra.mxu0 %v6448_v34 }
 0x20c   :  { %v768_v45 = vadd.f32 %v5783_v38, %v693_v41  ;;  %825 = vadd.xlane.f32.xlu0 %v821_v44  ;;  %5970 = vmatprep.subr.bf16.mxu0 %v6868_v7  ;;  %v902_v41 = vrot.slane %v897_v33, %v7232_v35 }
 0x20d   :  { %1056 = vmatprep.subr.bf16.mxu1 %v6451_v12 }
 0x20e   :  { %v822_v47 = vadd.f32 %v820_v46, %v768_v45 }
 0x20f   :  { %1057 = vmatpush1.bf16.msra.mxu1 %v6449_v11  ;;  %5971 = vmatpush3.bf16.msra.mxu0 %v6452_v13 }
 0x210   :  { %827 = vadd.xlane.f32.xlu1 %v822_v47  ;;  %5976 = vmatprep.subr.mxu1 %v6868_v7 }
 0x211   :  { %5996 = vmatprep.subr.mxu0 %v6868_v7 }
 0x299   :  { %v826_v53 = vpop.xlane.xlu0 %825 }
 0x29a   :  { %v830_v54 = vmul.f32 0.0078125, %v826_v53 }
 0x29c   :  { %v7189_v55 = vsub.f32 %v821_v44, %v830_v54  ;;  %v910_v44 = vrot.slane %v897_v33, %v909_v36 }
 0x29d   :  { %v828_v56 = vpop.xlane.xlu1 %827 }
 0x29e   :  { %v831_v57 = vmul.f32 0.0078125, %v828_v56  ;;  %v834_v58 = vmul.f32 %v7189_v55, %v7189_v55 }
 0x2a0   :  { %v7193_v2 = vsub.f32 %v822_v47, %v831_v57  ;;  %836 = vadd.xlane.f32.xlu0 %v834_v58 }
 0x2a2   :  { %v835_v25 = vmul.f32 %v7193_v2, %v7193_v2 }
 0x2a4   :  { %838 = vadd.xlane.f32.xlu0 %v835_v25 }
 0x32d   :  { %v837_v14 = vpop.xlane.xlu0 %836 }
 0x32e   :  { %v840_v15 = vmul.f32 0.0078125, %v837_v14 }
 0x330   :  { %v842_v16 = vadd.f32 1e-12, %v840_v15 }
 0x331   :  { %v839_v17 = vpop.xlane.xlu0 %838 }
 0x332   :  { %6589 = vrsqrt.f32 %v842_v16  ;;  %v841_v18 = vmul.f32 0.0078125, %v839_v17 }
 0x334   :  { %v843_v19 = vadd.f32 1e-12, %v841_v18 }
 0x336   :  { %6591 = vrsqrt.f32 %v843_v19 }
 0x33c   :  { %v6590_v20 = vpop.eup %6589 }
 0x33d   :  { %v846_v21 = vmul.f32 %v6590_v20, %v7189_v55 }
 0x33f   :  { %v854_v24 = vmul.f32 %v5414_v22, %v846_v21 }
 0x340   :  { %v6592_v23 = vpop.eup %6591 }
 0x341   :  { %v847_v26 = vmul.f32 %v6592_v23, %v7193_v2  ;;  %v7215_v29 = vadd.f32 %v5415_v27, %v854_v24 }
 0x343   :  { %v855_v28 = vmul.f32 %v5414_v22, %v847_v26 }
 0x345   :  { %v7217_v30 = vadd.f32 %v5415_v27, %v855_v28 }
 0x347   :  { %v896_v31 = vpack.c.bf16 %v7217_v30, %v7215_v29 }
 0x349   :  { %1075 = vmatmul.mubr.bf16.vlgmr.msra.gmra.mrb[8].mxu1 %v896_v31  ;;  %5973 = vmatmul.mubr.bf16.vlgmr.msra.gmra.mrb[12].mxu0 %v896_v31 }
 0x34a   :  { %5978 = vmatprep.mubr.msk.f32.mxu1 %vm6870_vm8, %v6868_v7  ;;  %5998 = vmatprep.mubr.msk.f32.mxu0 %vm6870_vm8, %v6868_v7 }
 0x41c   :  { %v1076_v38 = vpop.f32.mrb[8].mxu1  ;;  %v1119_v40 = vpop.f32.mrb[12].mxu0 }
 0x41d   :  { %v1078_v45 = vpop.f32.mrb[9].mxu1  ;;  %v5974_v46 = vpop.f32.mrb[13].mxu0  ;;  %v1077_v55 = vadd.f32 %v1076_v38, %v902_v41  ;;  %v7245_v56 = vadd.f32 %v1119_v40, %v910_v44 }
 0x41e   :  { %v1079_v47 = vadd.f32 %v1078_v45, %v906_v37  ;;  %v1080_v48 = vpop.f32.mrb[10].mxu1  ;;  %v1122_v49 = vpop.f32.mrb[14].mxu0 }
 0x41f   :  { %v7239_v50 = vadd.f32 %v1080_v48, %v902_v41  ;;  %v7241_v51 = vadd.f32 %v1122_v49, %v910_v44  ;;  %v1082_v52 = vpop.f32.mrb[11].mxu1  ;;  %v5975_v53 = vpop.f32.mrb[15].mxu0 }
 0x420   :  { %v1083_v54 = vadd.f32 %v1082_v52, %v906_v37  ;;  %5977 = vmatpush3.xpose.msk.msra.mxu1 %vm1126_vm9, %v1079_v47 }
 0x421   :  { %5981 = vmatprep.subr.mxu1 %v6868_v7 }
 0x423   :  { %5979 = vmatmul.mubr.msk.f32.vlgmr.msra.gmra.mrb[12].mxu1 %vm1126_vm9, %v1077_v55 }
 0x424   :  { %5982 = vmatpush3.msra.mxu1 %v7245_v56  ;;  %5983 = vmatprep.mubr.msk.f32.mxu1 %vm6870_vm8, %v6868_v7 }
 0x425   :  { %5986 = vmatprep.subr.mxu1 %v6868_v7 }
 0x4f6   :  { %v1199_v57 = vpop.f32.mrb[12].mxu1 }
 0x4f7   :  { %v1203_v58 = vmul.f32 0.17677669, %v1199_v57  ;;  %v5980_v2 = vpop.f32.mrb[13].mxu1 }
 0x4f9   :  { %v1205_v25 = vsel %vm1204_vm10, %v1203_v58, -inf }
 0x4fa   :  { %1206 = vmax.xlane.f32.xlu1 %v1205_v25 }
 0x50b   :  { %1291 = vrot.lane.b32.xlu1 %v1079_v47, %s6871_s24 }
 0x50f   :  { %1458 = vrot.lane.b32.xlu1 %v1079_v47, %s7757_s30 }
 0x513   :  { %1456 = vrot.lane.b32.xlu1 %v1077_v55, %s7757_s30 }
 0x517   :  { %1622 = vrot.lane.b32.xlu1 %v1077_v55, %s6872_s6 }
 0x51b   :  { %1965 = vrot.lane.b32.xlu1 %v7239_v50, %s6871_s24 }
 0x51f   :  { %2132 = vrot.lane.b32.xlu1 %v7239_v50, %s7757_s30 }
 0x523   :  { %2298 = vrot.lane.b32.xlu1 %v7239_v50, %s6872_s6 }
 0x587   :  { %v1207_v42 = vpop.xlane.xlu1 %1206 }
 0x588   :  { %v1208_v59 = vsub.f32 %v1203_v58, %v1207_v42 }
 0x58a   :  { %v1209_v60 = vmul.f32 1.442695, %v1208_v59 }
 0x58b   :  { %v1292_v43 = vpop.permute.xlu1 %1291 }
 0x58c   :  { %6593 = vpow2.f32 %v1209_v60 }
 0x58f   :  { %v1459_v61 = vpop.permute.xlu1 %1458 }
 0x590   :  { %5997 = vmatpush3.xpose.msk.msra.mxu0 %vm1126_vm9, %v1459_v61 }
 0x591   :  { %6006 = vmatprep.subr.mxu0 %v6868_v7 }
 0x593   :  { %v1457_v62 = vpop.permute.xlu1 %1456 }
 0x594   :  { %5999 = vmatmul.mubr.msk.f32.vlgmr.msra.gmra.mrb[10].mxu0 %vm1126_vm9, %v1457_v62 }
 0x595   :  { %6008 = vmatprep.mubr.msk.f32.mxu0 %vm6870_vm8, %v6868_v7 }
 0x596   :  { %v6594_v63 = vpop.eup %6593 }
 0x597   :  { %v1211_v0 = vsel %vm1204_vm10, %v6594_v63, 0.0  ;;  %v1623_v39 = vpop.permute.xlu1 %1622 }
 0x598   :  { %1212 = vadd.xlane.f32.xlu0 %v1211_v0 }
 0x59b   :  { %v1966_v34 = vpop.permute.xlu1 %1965 }
 0x59f   :  { %v2133_v12 = vpop.permute.xlu1 %2132 }
 0x5a3   :  { %v2299_v14 = vpop.permute.xlu1 %2298 }
 0x5ae   :  { %1289 = vrot.lane.b32.xlu0 %v1077_v55, %s6871_s24 }
 0x5b2   :  { %1624 = vrot.lane.b32.xlu0 %v1079_v47, %s6872_s6 }
 0x5b6   :  { %1967 = vrot.lane.b32.xlu0 %v1083_v54, %s6871_s24 }
 0x5ba   :  { %2134 = vrot.lane.b32.xlu0 %v1083_v54, %s7757_s30 }
 0x5be   :  { %2300 = vrot.lane.b32.xlu0 %v1083_v54, %s6872_s6 }
 0x625   :  { %v1213_v4 = vpop.xlane.xlu0 %1212 }
 0x626   :  { %6595 = vrcp.f32 %v1213_v4 }
 0x629   :  { %v1290_v5 = vpop.permute.xlu0 %1289 }
 0x62d   :  { %v1625_v6 = vpop.permute.xlu0 %1624 }
 0x62e   :  { %6007 = vmatpush3.xpose.msk.msra.mxu0 %vm1126_vm9, %v1625_v6 }
 0x62f   :  { %6016 = vmatprep.subr.mxu0 %v6868_v7 }
 0x630   :  { %v6596_v8 = vpop.eup %6595 }
 0x631   :  { %v1215_v9 = vmul.f32 %v6596_v8, %v6594_v63  ;;  %v1968_v10 = vpop.permute.xlu0 %1967  ;;  %6009 = vmatmul.mubr.msk.f32.vlgmr.msra.gmra.mrb[16].mxu0 %vm1126_vm9, %v1623_v39 }
 0x632   :  { %6017 = vmatpush3.xpose.msk.msra.mxu0 %vm1126_vm9, %v1083_v54  ;;  %6018 = vmatprep.mubr.msk.f32.mxu0 %vm6870_vm8, %v6868_v7 }
 0x633   :  { %5984 = vmatmul.mubr.msk.f32.vlgmr.msra.gmra.mrb[14].mxu1 %vm1204_vm10, %v1215_v9  ;;  %6026 = vmatprep.subr.mxu0 %v6868_v7 }
 0x634   :  { %5987 = vmatpush3.xpose.msk.msra.mxu1 %vm1126_vm9, %v1292_v43  ;;  %5988 = vmatprep.mubr.msk.f32.mxu1 %vm6870_vm8, %v6868_v7 }
 0x635   :  { %6019 = vmatmul.mubr.msk.f32.vlgmr.msra.gmra.mrb[18].mxu0 %vm1126_vm9, %v7239_v50  ;;  %5991 = vmatprep.subr.mxu1 %v6868_v7  ;;  %v2135_v11 = vpop.permute.xlu0 %2134 }
 0x636   :  { %6027 = vmatpush3.xpose.msk.msra.mxu0 %vm1126_vm9, %v1968_v10  ;;  %6028 = vmatprep.mubr.msk.f32.mxu0 %vm6870_vm8, %v6868_v7 }
 0x637   :  { %5989 = vmatmul.mubr.msk.f32.vlgmr.msra.gmra.mrb[16].mxu1 %vm1126_vm9, %v1290_v5  ;;  %6036 = vmatprep.subr.mxu0 %v6868_v7 }
 0x638   :  { %5993 = vmatprep.mubr.msk.f32.mxu1 %vm6870_vm8, %v6868_v7 }
 0x639   :  { %6029 = vmatmul.mubr.msk.f32.vlgmr.msra.gmra.mrb[20].mxu0 %vm1126_vm9, %v1966_v34  ;;  %v2301_v13 = vpop.permute.xlu0 %2300 }
 0x63a   :  { %6037 = vmatpush3.xpose.msk.msra.mxu0 %vm1126_vm9, %v2135_v11  ;;  %6038 = vmatprep.mubr.msk.f32.mxu0 %vm6870_vm8, %v6868_v7 }
 0x63b   :  { %6046 = vmatprep.subr.mxu0 %v6868_v7 }
 0x63d   :  { %6039 = vmatmul.mubr.msk.f32.vlgmr.msra.gmra.mrb[22].mxu0 %vm1126_vm9, %v2133_v12 }
 0x63e   :  { %6047 = vmatpush3.xpose.msk.msra.mxu0 %vm1126_vm9, %v2301_v13  ;;  %6048 = vmatprep.mubr.msk.f32.mxu0 %vm6870_vm8, %v6868_v7 }
 0x63f   :  { %6056 = vmatprep.subr.bf16.mxu0 %v6868_v7 }
 0x641   :  { %6049 = vmatmul.mubr.msk.f32.vlgmr.msra.gmra.mrb[24].mxu0 %vm1126_vm9, %v2299_v14 }
 0x642   :  { %6072 = vmatprep.mubr.msk.bf16.mxu0 %vm6870_vm8, %v6868_v7 }
 0x667   :  { %v1530_v15 = vpop.f32.mrb[10].mxu0 }
 0x668   :  { %v1534_v16 = vmul.f32 0.17677669, %v1530_v15  ;;  %v6000_v17 = vpop.f32.mrb[11].mxu0 }
 0x66a   :  { %v1535_v18 = vsel %vm1204_vm10, %v1534_v16, -inf }
 0x66b   :  { %1536 = vmax.xlane.f32.xlu1 %v1535_v18 }
 0x6f8   :  { %v1537_v19 = vpop.xlane.xlu1 %1536 }
 0x6f9   :  { %v1538_v22 = vsub.f32 %v1534_v16, %v1537_v19 }
 0x6fb   :  { %v1539_v28 = vmul.f32 1.442695, %v1538_v22 }
 0x6fd   :  { %6597 = vpow2.f32 %v1539_v28 }
 0x704   :  { %v1696_v20 = vpop.f32.mrb[16].mxu0 }
 0x705   :  { %v6010_v21 = vpop.f32.mrb[17].mxu0  ;;  %v1700_v40 = vmul.f32 0.17677669, %v1696_v20 }
 0x706   :  { %v7309_v23 = vpop.f32.mrb[14].mxu1 }
 0x707   :  { %v5985_v24 = vpop.f32.mrb[15].mxu1  ;;  %v1701_v50 = vsel %vm1204_vm10, %v1700_v40, -inf  ;;  %v7316_v2 = vpop.eup %6597 }
 0x708   :  { %v1876_v26 = vpop.f32.mrb[18].mxu0  ;;  %v1541_v42 = vsel %vm1204_vm10, %v7316_v2, 0.0 }
 0x709   :  { %v6020_v27 = vpop.f32.mrb[19].mxu0  ;;  %v1880_v48 = vmul.f32 0.17677669, %v1876_v26 }
 0x70a   :  { %v1363_v31 = vpop.f32.mrb[16].mxu1 }
 0x70b   :  { %v1367_v33 = vmul.f32 0.17677669, %v1363_v31  ;;  %v5990_v37 = vpop.f32.mrb[17].mxu1  ;;  %v1881_v57 = vsel %vm1204_vm10, %v1880_v48, -inf }
 0x70c   :  { %v2039_v38 = vpop.f32.mrb[20].mxu0 }
 0x70d   :  { %v2043_v41 = vmul.f32 0.17677669, %v2039_v38  ;;  %v6030_v44 = vpop.f32.mrb[21].mxu0  ;;  %v1368_v45 = vsel %vm1204_vm10, %v1367_v33, -inf }
 0x70e   :  { %1369 = vmax.xlane.f32.xlu0 %v1368_v45 }
 0x70f   :  { %v2044_v46 = vsel %vm1204_vm10, %v2043_v41, -inf }
 0x710   :  { %2045 = vmax.xlane.f32.xlu1 %v2044_v46  ;;  %v2206_v47 = vpop.f32.mrb[22].mxu0 }
 0x711   :  { %v6040_v49 = vpop.f32.mrb[23].mxu0  ;;  %v2210_v53 = vmul.f32 0.17677669, %v2206_v47 }
 0x712   :  { %1702 = vmax.xlane.f32.xlu0 %v1701_v50 }
 0x713   :  { %v2211_v25 = vsel %vm1204_vm10, %v2210_v53, -inf }
 0x714   :  { %v2372_v52 = vpop.f32.mrb[24].mxu0 }
 0x715   :  { %v2376_v54 = vmul.f32 0.17677669, %v2372_v52  ;;  %v6050_v55 = vpop.f32.mrb[25].mxu0 }
 0x716   :  { %1882 = vmax.xlane.f32.xlu0 %v1881_v57 }
 0x717   :  { %v2377_v58 = vsel %vm1204_vm10, %v2376_v54, -inf }
 0x718   :  { %2378 = vmax.xlane.f32.xlu1 %v2377_v58 }
 0x71a   :  { %2212 = vmax.xlane.f32.xlu0 %v2211_v25 }
 0x71c   :  { %1542 = vadd.xlane.f32.xlu1 %v1541_v42 }
 0x79b   :  { %v1370_v59 = vpop.xlane.xlu0 %1369 }
 0x79c   :  { %v1371_v39 = vsub.f32 %v1367_v33, %v1370_v59 }
 0x79d   :  { %v2046_v60 = vpop.xlane.xlu1 %2045 }
 0x79e   :  { %v2047_v43 = vsub.f32 %v2043_v41, %v2046_v60  ;;  %v1372_v12 = vmul.f32 1.442695, %v1371_v39 }
 0x79f   :  { %v1703_v61 = vpop.xlane.xlu0 %1702 }
 0x7a0   :  { %v1704_v62 = vsub.f32 %v1700_v40, %v1703_v61  ;;  %v2048_v63 = vmul.f32 1.442695, %v2047_v43  ;;  %v6453_v43 = vld [vmem:[#allocation8] sm:$0xff]   ;;  %v6454_v61 = vld [vmem:[#allocation8 + $0x8] sm:$0xff]  }
 0x7a1   :  { %6057 = vmatpush3.bf16.msra.mxu0 %v6453_v43 }
 0x7a2   :  { %v1705_v0 = vmul.f32 1.442695, %v1704_v62  ;;  %6058 = vmatprep.subr.bf16.mxu0 %v6868_v7  ;;  %v6455_v62 = vld [vmem:[#allocation8 + $0x10] sm:$0xff]  }
 0x7a3   :  { %v1883_v4 = vpop.xlane.xlu0 %1882 }
 0x7a4   :  { %6599 = vpow2.f32 %v1705_v0  ;;  %v1884_v5 = vsub.f32 %v1880_v48, %v1883_v4  ;;  %v6457_v0 = vld [vmem:[#allocation8 + $0x20] sm:$0xff]  }
 0x7a5   :  { %v2379_v6 = vpop.xlane.xlu1 %2378  ;;  %6601 = vpow2.f32 %v2048_v63  ;;  %6059 = vmatpush3.bf16.msra.mxu0 %v6454_v61  ;;  %v6456_v63 = vld [vmem:[#allocation8 + $0x18] sm:$0xff]  }
 0x7a6   :  { %v1885_v8 = vmul.f32 1.442695, %v1884_v5  ;;  %v2380_v9 = vsub.f32 %v2376_v54, %v2379_v6  ;;  %6060 = vmatprep.subr.bf16.mxu0 %v6868_v7 }
 0x7a7   :  { %v2213_v10 = vpop.xlane.xlu0 %2212 }
 0x7a8   :  { %6603 = vpow2.f32 %v1885_v8  ;;  %v2381_v34 = vmul.f32 1.442695, %v2380_v9  ;;  %v2214_v11 = vsub.f32 %v2210_v53, %v2213_v10  ;;  %v6458_v8 = vld [vmem:[#allocation8 + $0x28] sm:$0xff]  }
 0x7a9   :  { %v1543_v28 = vpop.xlane.xlu1 %1542  ;;  %6061 = vmatpush3.bf16.msra.mxu0 %v6455_v62 }
 0x7aa   :  { %6605 = vpow2.f32 %v2381_v34  ;;  %v2215_v13 = vmul.f32 1.442695, %v2214_v11  ;;  %6062 = vmatprep.subr.bf16.mxu0 %v6868_v7  ;;  %v6459_v34 = vld [vmem:[#allocation8 + $0x30] sm:$0xff]  }
 0x7ac   :  { %6607 = vpow2.f32 %v2215_v13  ;;  %v6460_v13 = vld [vmem:[#allocation8 + $0x38] sm:$0xff]  }
 0x7ad   :  { %6609 = vpow2.f32 %v1372_v12  ;;  %6063 = vmatpush3.bf16.msra.mxu0 %v6456_v63 }
 0x7ae   :  { %v6600_v14 = vpop.eup %6599  ;;  %6064 = vmatprep.subr.bf16.mxu0 %v6868_v7 }
 0x7af   :  { %v1707_v15 = vsel %vm1204_vm10, %v6600_v14, 0.0  ;;  %v7322_v16 = vpop.eup %6601 }
 0x7b0   :  { %1708 = vadd.xlane.f32.xlu0 %v1707_v15  ;;  %v2050_v18 = vsel %vm1204_vm10, %v7322_v16, 0.0 }
 0x7b1   :  { %6065 = vmatpush3.bf16.msra.mxu0 %v6457_v0 }
 0x7b2   :  { %v6604_v17 = vpop.eup %6603  ;;  %6066 = vmatprep.subr.bf16.mxu0 %v6868_v7 }
 0x7b3   :  { %v1887_v19 = vsel %vm1204_vm10, %v6604_v17, 0.0 }
 0x7b4   :  { %v7327_v20 = vpop.eup %6605  ;;  %2051 = vadd.xlane.f32.xlu0 %v2050_v18  ;;  %1888 = vadd.xlane.f32.xlu1 %v1887_v19 }
 0x7b5   :  { %v2383_v22 = vsel %vm1204_vm10, %v7327_v20, 0.0  ;;  %6067 = vmatpush3.bf16.msra.mxu0 %v6458_v8  ;;  %v6473_v8 = vld [vmem:[#allocation10 + $0x40] ss:$8 sps:$4 sm:$0xff]  }
 0x7b6   :  { %v7329_v21 = vpop.eup %6607  ;;  %6068 = vmatprep.subr.bf16.mxu0 %v6868_v7 }
 0x7b7   :  { %v2217_v24 = vsel %vm1204_vm10, %v7329_v21, 0.0  ;;  %v6610_v26 = vpop.eup %6609 }
 0x7b8   :  { %2384 = vadd.xlane.f32.xlu0 %v2383_v22  ;;  %2218 = vadd.xlane.f32.xlu1 %v2217_v24  ;;  %v1374_v27 = vsel %vm1204_vm10, %v6610_v26, 0.0 }
 0x7b9   :  { %6069 = vmatpush3.bf16.msra.mxu0 %v6459_v34  ;;  %v6481_v34 = vld [vmem:[#allocation10 + $0x64] ss:$8 sps:$4 sm:$0xff]  }
 0x7ba   :  { %6070 = vmatprep.subr.bf16.mxu0 %v6868_v7 }
 0x7bc   :  { %1375 = vadd.xlane.f32.xlu0 %v1374_v27 }
 0x7bd   :  { %6071 = vmatpush3.bf16.msra.mxu0 %v6460_v13  ;;  %v6482_v13 = vld [vmem:[#allocation10 + $0x70] ss:$8 sps:$4 sm:$0xff]  }
 0x7c9   :  { %1380 = vrot.lane.b32.xlu1 %v7245_v56, %s6871_s24 }
 0x7cd   :  { %1712 = vrot.lane.b32.xlu1 %v7245_v56, %s6872_s6 }
 0x7d1   :  { %2056 = vrot.lane.b32.xlu1 %v7241_v51, %s6871_s24 }
 0x7d2   :  { %1546 = vrot.lane.b32.xlu0 %v7245_v56, %s7757_s30 }
 0x7d5   :  { %2388 = vrot.lane.b32.xlu1 %v7241_v51, %s6872_s6 }
 0x7d6   :  { %2222 = vrot.lane.b32.xlu0 %v7241_v51, %s7757_s30 }
 0x83d   :  { %v1709_v31 = vpop.xlane.xlu0 %1708 }
 0x841   :  { %v1889_v33 = vpop.xlane.xlu1 %1888  ;;  %v2052_v37 = vpop.xlane.xlu0 %2051 }
 0x845   :  { %v2219_v38 = vpop.xlane.xlu1 %2218  ;;  %v2385_v40 = vpop.xlane.xlu0 %2384 }
 0x849   :  { %v1381_v41 = vpop.permute.xlu1 %1380  ;;  %v1376_v44 = vpop.xlane.xlu0 %1375 }
 0x84a   :  { %6611 = vrcp.f32 %v1376_v44  ;;  %5992 = vmatpush3.msra.mxu1 %v1381_v41 }
 0x84b   :  { %6001 = vmatprep.subr.mxu1 %v6868_v7  ;;  %6613 = vrcp.f32 %v1543_v28 }
 0x84c   :  { %6615 = vrcp.f32 %v1709_v31 }
 0x84d   :  { %6617 = vrcp.f32 %v1889_v33  ;;  %v1547_v47 = vpop.permute.xlu0 %1546  ;;  %v1713_v50 = vpop.permute.xlu1 %1712 }
 0x84e   :  { %6619 = vrcp.f32 %v2052_v37 }
 0x84f   :  { %6621 = vrcp.f32 %v2219_v38 }
 0x850   :  { %6623 = vrcp.f32 %v2385_v40 }
 0x851   :  { %v2057_v57 = vpop.permute.xlu1 %2056 }
 0x854   :  { %v6612_v56 = vpop.eup %6611 }
 0x855   :  { %v1378_v45 = vmul.f32 %v6612_v56, %v6610_v26  ;;  %v6614_v46 = vpop.eup %6613  ;;  %v2389_v59 = vpop.permute.xlu1 %2388 }
 0x856   :  { %v1545_v48 = vmul.f32 %v6614_v46, %v7316_v2  ;;  %v6616_v49 = vpop.eup %6615 }
 0x857   :  { %5994 = vmatmul.mubr.msk.f32.vlgmr.msra.gmra.mrb[18].mxu1 %vm1204_vm10, %v1378_v45  ;;  %v1711_v52 = vmul.f32 %v6616_v49, %v6600_v14  ;;  %v6618_v53 = vpop.eup %6617  ;;  %v5464_v49 = vld [vmem:[%s7717_s10] ss:$0 sm:$0xff] }
 0x858   :  { %6002 = vmatpush3.msra.mxu1 %v1547_v47  ;;  %6003 = vmatprep.mubr.msk.f32.mxu1 %vm6870_vm8, %v6868_v7  ;;  %v1891_v54 = vmul.f32 %v6618_v53, %v6604_v17  ;;  %v6620_v55 = vpop.eup %6619 }
 0x859   :  { %6011 = vmatprep.subr.mxu1 %v6868_v7  ;;  %v2054_v58 = vmul.f32 %v6620_v55, %v7322_v16  ;;  %v6622_v2 = vpop.eup %6621 }
 0x85a   :  { %v2221_v25 = vmul.f32 %v6622_v2, %v7329_v21  ;;  %v6624_v42 = vpop.eup %6623  ;;  %v6461_v2 = vld [vmem:[#allocation10] ss:$8 sps:$4 sm:$0xff]  }
 0x85b   :  { %6004 = vmatmul.mubr.msk.f32.vlgmr.msra.gmra.mrb[20].mxu1 %vm1204_vm10, %v1545_v48  ;;  %v2387_v60 = vmul.f32 %v6624_v42, %v7327_v20  ;;  %v6464_v42 = vld [vmem:[#allocation10 + $0x10] ss:$8 sps:$4 sm:$0xff]  }
 0x85c   :  { %6012 = vmatpush3.msra.mxu1 %v1713_v50  ;;  %6013 = vmatprep.mubr.msk.f32.mxu1 %vm6870_vm8, %v6868_v7 }
 0x85d   :  { %6021 = vmatprep.subr.mxu1 %v6868_v7 }
 0x85f   :  { %6014 = vmatmul.mubr.msk.f32.vlgmr.msra.gmra.mrb[22].mxu1 %vm1204_vm10, %v1711_v52 }
 0x860   :  { %6022 = vmatpush3.msra.mxu1 %v7241_v51  ;;  %6023 = vmatprep.mubr.msk.f32.mxu1 %vm6870_vm8, %v6868_v7  ;;  %v2223_v51 = vpop.permute.xlu0 %2222 }
 0x861   :  { %6031 = vmatprep.subr.mxu1 %v6868_v7 }
 0x863   :  { %6024 = vmatmul.mubr.msk.f32.vlgmr.msra.gmra.mrb[24].mxu1 %vm1204_vm10, %v1891_v54 }
 0x864   :  { %6032 = vmatpush3.msra.mxu1 %v2057_v57  ;;  %6033 = vmatprep.mubr.msk.f32.mxu1 %vm6870_vm8, %v6868_v7 }
 0x865   :  { %6041 = vmatprep.subr.mxu1 %v6868_v7 }
 0x867   :  { %6034 = vmatmul.mubr.msk.f32.vlgmr.msra.gmra.mrb[26].mxu1 %vm1204_vm10, %v2054_v58 }
 0x868   :  { %6042 = vmatpush3.msra.mxu1 %v2223_v51  ;;  %6043 = vmatprep.mubr.msk.f32.mxu1 %vm6870_vm8, %v6868_v7  ;;  %v6463_v51 = vld [vmem:[#allocation10 + $0x4] ss:$8 sps:$4 sm:$0xff]  }
 0x869   :  { %6051 = vmatprep.subr.mxu1 %v6868_v7 }
 0x86b   :  { %6044 = vmatmul.mubr.msk.f32.vlgmr.msra.gmra.mrb[28].mxu1 %vm1204_vm10, %v2221_v25  ;;  %v6466_v25 = vld [vmem:[#allocation10 + $0x14] ss:$8 sps:$4 sm:$0xff]  }
 0x86c   :  { %6052 = vmatpush3.msra.mxu1 %v2389_v59  ;;  %6053 = vmatprep.mubr.msk.f32.mxu1 %vm6870_vm8, %v6868_v7 }
 0x86d   :  { %2743 = vmatprep.subr.bf16.mxu1 %v6463_v51 }
 0x86f   :  { %6054 = vmatmul.mubr.msk.f32.vlgmr.msra.gmra.mrb[30].mxu1 %vm1204_vm10, %v2387_v60 }
 0x870   :  { %2775 = vmatprep.mubr.bf16.mxu1 %v6867_v1  ;;  %2744 = vmatpush1.bf16.msra.mxu1 %v6461_v2 }
 0x871   :  { %2745 = vmatprep.subr.bf16.mxu1 %v6466_v25 }
 0x874   :  { %2746 = vmatpush1.bf16.msra.mxu1 %v6464_v42 }
 0x92a   :  { %v1452_v4 = vpop.f32.mrb[18].mxu1 }
 0x92b   :  { %v5995_v5 = vpop.f32.mrb[19].mxu1 }
 0x92c   :  { %v6472_v5 = vld [vmem:[#allocation10 + $0x34] ss:$8 sps:$4 sm:$0xff]  }
 0x92e   :  { %v1618_v6 = vpop.f32.mrb[20].mxu1 }
 0x92f   :  { %v6005_v39 = vpop.f32.mrb[21].mxu1 }
 0x930   :  { %v6475_v39 = vld [vmem:[#allocation10 + $0x44] ss:$8 sps:$4 sm:$0xff]  }
 0x932   :  { %v1784_v9 = vpop.f32.mrb[22].mxu1 }
 0x933   :  { %v6015_v10 = vpop.f32.mrb[23].mxu1 }
 0x934   :  { %v6476_v10 = vld [vmem:[#allocation10 + $0x50] ss:$8 sps:$4 sm:$0xff]  }
 0x936   :  { %v1961_v11 = vpop.f32.mrb[24].mxu1 }
 0x937   :  { %v6025_v12 = vpop.f32.mrb[25].mxu1 }
 0x938   :  { %v6484_v12 = vld [vmem:[#allocation10 + $0x74] ss:$8 sps:$4 sm:$0xff]  }
 0x93a   :  { %v2128_v14 = vpop.f32.mrb[26].mxu1 }
 0x93b   :  { %v6391_v15 = vpack.i.bf16 %v2128_v14, %v1452_v4  ;;  %v6035_v16 = vpop.f32.mrb[27].mxu1  ;;  %v6467_v4 = vld [vmem:[#allocation10 + $0x20] ss:$8 sps:$4 sm:$0xff]  }
 0x93d   :  { %6392 = vrot.lane.b32.xlu0 %v6391_v15, %s6872_s6 }
 0x93e   :  { %v2294_v17 = vpop.f32.mrb[28].mxu1 }
 0x93f   :  { %v6396_v18 = vpack.i.bf16 %v2294_v17, %v1618_v6  ;;  %v6045_v19 = vpop.f32.mrb[29].mxu1  ;;  %v6470_v6 = vld [vmem:[#allocation10 + $0x30] ss:$8 sps:$4 sm:$0xff]  }
 0x941   :  { %6397 = vrot.lane.b32.xlu1 %v6396_v18, %s7757_s30 }
 0x942   :  { %v2460_v20 = vpop.f32.mrb[30].mxu1 }
 0x943   :  { %v6401_v21 = vpack.i.bf16 %v2460_v20, %v1784_v9  ;;  %v6055_v22 = vpop.f32.mrb[31].mxu1  ;;  %v6478_v9 = vld [vmem:[#allocation10 + $0x54] ss:$8 sps:$4 sm:$0xff]  }
 0x945   :  { %6402 = vrot.lane.b32.xlu0 %v6401_v21, %s6871_s24  ;;  %v5473_v21 = vld [vmem:[%s7718_s11] ss:$0 sm:$0xff] }
 0x9af   :  { %v6393_v24 = vpop.permute.xlu0 %6392 }
 0x9b0   :  { %v6395_v27 = vunpack.i.h.bf16 %v6393_v24  ;;  %v6394_v28 = vunpack.i.l.bf16 %v6393_v24 }
 0x9b2   :  { %v2476_v38 = vsel %vm1126_vm9, %v1961_v11, %v6395_v27  ;;  %v1800_v40 = vsel %vm1126_vm9, %v7309_v23, %v6394_v28  ;;  %v6479_v11 = vld [vmem:[#allocation10 + $0x60] ss:$8 sps:$4 sm:$0xff]  }
 0x9b3   :  { %v6398_v26 = vpop.permute.xlu1 %6397  ;;  %v5474_v28 = vld [vmem:[%s7719_s12] ss:$0 sm:$0xff] }
 0x9b4   :  { %v6400_v31 = vunpack.i.h.bf16 %v6398_v26  ;;  %v6399_v33 = vunpack.i.l.bf16 %v6398_v26 }
 0x9b6   :  { %v2477_v56 = vsel %vm389_vm0, %v2476_v38, %v6400_v31  ;;  %v1801_v45 = vsel %vm389_vm0, %v1800_v40, %v6399_v33  ;;  %v6485_v40 = vld [vmem:[#allocation11 + $0x40] sm:$0xff]  }
 0x9b7   :  { %v6403_v37 = vpop.permute.xlu0 %6402  ;;  %5834 = vmatprep.subr.bf16.mxu0 %v6485_v40 }
 0x9b8   :  { %v6405_v41 = vunpack.i.h.bf16 %v6403_v37  ;;  %v6404_v44 = vunpack.i.l.bf16 %v6403_v37 }
 0x9ba   :  { %v2478_v46 = vsel %vm1802_vm11, %v2477_v56, %v6405_v41  ;;  %v1803_v47 = vsel %vm1802_vm11, %v1801_v45, %v6404_v44  ;;  %v6486_v41 = vld [vmem:[#allocation11] sm:$0xff]   ;;  %v6487_v44 = vld [vmem:[#allocation11 + $0x48] sm:$0xff]   ;;  %v6489_v45 = vld [vmem:[#allocation11 + $0x50] sm:$0xff]  }
 0x9bb   :  { %v2495_v48 = vpack.c.bf16 %v2478_v46, %v1803_v47  ;;  %v6488_v56 = vld [vmem:[#allocation11 + $0x8] sm:$0xff]   ;;  %v6490_v46 = vld [vmem:[#allocation11 + $0x10] sm:$0xff]   ;;  %v6491_v47 = vld [vmem:[#allocation11 + $0x58] sm:$0xff]  }
 0x9bd   :  { %6073 = vmatmul.mubr.bf16.vlgmr.msra.gmra.mrb[28].mxu0 %v2495_v48  ;;  %v6492_v48 = vld [vmem:[#allocation11 + $0x18] sm:$0xff]  }
 0x9be   :  { %5835 = vmatpush3.bf16.msra.mxu0 %v6486_v41 }
 0x9bf   :  { %5836 = vmatprep.subr.bf16.mxu0 %v6487_v44 }
 0x9c2   :  { %5837 = vmatpush3.bf16.msra.mxu0 %v6488_v56 }
 0x9c3   :  { %5838 = vmatprep.subr.bf16.mxu0 %v6489_v45 }
 0x9c6   :  { %5839 = vmatpush3.bf16.msra.mxu0 %v6490_v46 }
 0x9c7   :  { %5840 = vmatprep.subr.bf16.mxu0 %v6491_v47 }
 0x9ca   :  { %5841 = vmatpush3.bf16.msra.mxu0 %v6492_v48 }
 0xa90   :  { %v2585_v50 = vpop.f32.mrb[28].mxu0 }
 0xa91   :  { %v2586_v52 = vadd.f32 %v5464_v49, %v2585_v50  ;;  %v6074_v53 = vpop.f32.mrb[29].mxu0  ;;  %v6494_v50 = vld [vmem:[#allocation11 + $0x20] sm:$0xff]  }
 0xa92   :  { %v2588_v23 = vpop.f32.mrb[30].mxu0  ;;  %v6496_v53 = vld [vmem:[#allocation11 + $0x28] sm:$0xff]  }
 0xa93   :  { %v2589_v54 = vadd.f32 %v5464_v49, %v2588_v23  ;;  %v6075_v55 = vpop.f32.mrb[31].mxu0  ;;  %v2592_v57 = vadd.f32 %v2586_v52, %v7215_v29  ;;  %v6493_v49 = vld [vmem:[#allocation11 + $0x60] sm:$0xff]   ;;  %v6495_v52 = vld [vmem:[#allocation11 + $0x68] sm:$0xff]   ;;  %v6497_v23 = vld [vmem:[#allocation11 + $0x70] sm:$0xff]  }
 0xa94   :  { %5842 = vmatprep.subr.bf16.mxu0 %v6493_v49  ;;  %v6499_v55 = vld [vmem:[#allocation11 + $0x78] sm:$0xff]  }
 0xa95   :  { %2596 = vadd.xlane.f32.xlu1 %v2592_v57  ;;  %v2593_v58 = vadd.f32 %v2589_v54, %v7217_v30  ;;  %v6469_v30 = vld [vmem:[#allocation10 + $0x24] ss:$8 sps:$4 sm:$0xff]   ;;  %5843 = vmatpush3.bf16.msra.mxu0 %v6494_v50  ;;  %v6498_v54 = vld [vmem:[#allocation11 + $0x30] sm:$0xff]  }
 0xa96   :  { %2747 = vmatprep.subr.bf16.mxu1 %v6469_v30  ;;  %5844 = vmatprep.subr.bf16.mxu0 %v6495_v52  ;;  %v5491_v52 = vld [vmem:[%s7723_s16] ss:$0 sm:$0xff] }
 0xa97   :  { %2598 = vadd.xlane.f32.xlu0 %v2593_v58  ;;  %2748 = vmatpush1.bf16.msra.mxu1 %v6467_v4 }
 0xa98   :  { %2749 = vmatprep.subr.bf16.mxu1 %v6472_v5 }
 0xa99   :  { %5845 = vmatpush3.bf16.msra.mxu0 %v6496_v53 }
 0xa9a   :  { %5846 = vmatprep.subr.bf16.mxu0 %v6497_v23 }
 0xa9b   :  { %2750 = vmatpush1.bf16.msra.mxu1 %v6470_v6 }
 0xa9c   :  { %2751 = vmatprep.subr.bf16.mxu1 %v6475_v39 }
 0xa9d   :  { %5847 = vmatpush3.bf16.msra.mxu0 %v6498_v54 }
 0xa9e   :  { %5848 = vmatprep.subr.bf16.mxu0 %v6499_v55 }
 0xa9f   :  { %2752 = vmatpush1.bf16.msra.mxu1 %v6473_v8 }
 0xaa0   :  { %2753 = vmatprep.subr.bf16.mxu1 %v6478_v9 }
 0xaa3   :  { %2754 = vmatpush1.bf16.msra.mxu1 %v6476_v10 }
 0xaa4   :  { %2755 = vmatprep.subr.bf16.mxu1 %v6481_v34 }
 0xaa7   :  { %2756 = vmatpush1.bf16.msra.mxu1 %v6479_v11 }
 0xaa8   :  { %2757 = vmatprep.subr.bf16.mxu1 %v6484_v12 }
 0xaab   :  { %2758 = vmatpush1.bf16.msra.mxu1 %v6482_v13 }
 0xb22   :  { %v2597_v59 = vpop.xlane.xlu1 %2596 }
 0xb23   :  { %v2600_v60 = vmul.f32 0.0078125, %v2597_v59 }
 0xb24   :  { %v2599_v43 = vpop.xlane.xlu0 %2598 }
 0xb25   :  { %v2602_v61 = vsub.f32 %v2592_v57, %v2600_v60  ;;  %v2601_v62 = vmul.f32 0.0078125, %v2599_v43  ;;  %v6500_v57 = vld [vmem:[#allocation11 + $0x38] sm:$0xff]  }
 0xb26   :  { %5849 = vmatpush3.bf16.msra.mxu0 %v6500_v57 }
 0xb27   :  { %v2603_v63 = vsub.f32 %v2593_v58, %v2601_v62  ;;  %v2604_v0 = vmul.f32 %v2602_v61, %v2602_v61  ;;  %6076 = vmatprep.subr.bf16.mxu0 %v6868_v7  ;;  %v2651_v58 = vld [vmem:[%s7721_s14] sm:$0x3] }
 0xb28   :  { %v2656_v2 = vrot.slane %v2651_v58, %v7232_v35  ;;  %v2660_v51 = vrot.slane %v2651_v58, %v7226_v32 }
 0xb29   :  { %2606 = vadd.xlane.f32.xlu0 %v2604_v0  ;;  %v2605_v29 = vmul.f32 %v2603_v63, %v2603_v63 }
 0xb2b   :  { %2608 = vadd.xlane.f32.xlu1 %v2605_v29 }
 0xbb6   :  { %v2607_v14 = vpop.xlane.xlu0 %2606 }
 0xbb7   :  { %v2610_v15 = vmul.f32 0.0078125, %v2607_v14 }
 0xbb8   :  { %v2609_v16 = vpop.xlane.xlu1 %2608 }
 0xbb9   :  { %v2612_v17 = vadd.f32 1e-12, %v2610_v15  ;;  %v2611_v18 = vmul.f32 0.0078125, %v2609_v16 }
 0xbbb   :  { %6625 = vrsqrt.f32 %v2612_v17  ;;  %v2613_v19 = vadd.f32 1e-12, %v2611_v18 }
 0xbbd   :  { %6627 = vrsqrt.f32 %v2613_v19 }
 0xbc5   :  { %v6626_v20 = vpop.eup %6625 }
 0xbc6   :  { %v2616_v22 = vmul.f32 %v6626_v20, %v2602_v61 }
 0xbc7   :  { %v6628_v24 = vpop.eup %6627 }
 0xbc8   :  { %v2617_v26 = vmul.f32 %v6628_v24, %v2603_v63  ;;  %v2624_v27 = vmul.f32 %v5473_v21, %v2616_v22 }
 0xbca   :  { %v2625_v31 = vmul.f32 %v5473_v21, %v2617_v26  ;;  %v7407_v33 = vadd.f32 %v5474_v28, %v2624_v27 }
 0xbcc   :  { %v7409_v37 = vadd.f32 %v5474_v28, %v2625_v31 }
 0xbce   :  { %v2650_v38 = vpack.c.bf16 %v7409_v37, %v7407_v33 }
 0xbd0   :  { %2776 = vmatmul.mubr.bf16.vlgmr.msra.gmra.mrb[32].mxu1 %v2650_v38 }
 0xbd1   :  { %3254 = vmatprep.mubr.bf16.mxu1 %v6867_v1 }
 0xca3   :  { %v2777_v25 = vpop.f32.mrb[32].mxu1 }
 0xca4   :  { %v2778_v42 = vadd.f32 %v2777_v25, %v2656_v2  ;;  %v2779_v59 = vpop.f32.mrb[33].mxu1 }
 0xca5   :  { %v2780_v60 = vadd.f32 %v2779_v59, %v2660_v51  ;;  %v2781_v43 = vpop.f32.mrb[34].mxu1  ;;  %v6503_v59 = vld [vmem:[#allocation7 + $0xc4] ss:$12 sps:$4 sm:$0xff]  }
 0xca6   :  { %v2786_v61 = vmul.f32 %v2778_v42, %v2778_v42  ;;  %v2782_v62 = vadd.f32 %v2781_v43, %v2656_v2  ;;  %v2783_v63 = vpop.f32.mrb[35].mxu1  ;;  %v6507_v43 = vld [vmem:[#allocation7 + $0xdc] ss:$12 sps:$4 sm:$0xff]   ;;  %3222 = vmatprep.subr.bf16.mxu1 %v6503_v59 }
 0xca7   :  { %v2787_v0 = vmul.f32 %v2780_v60, %v2780_v60  ;;  %v2784_v29 = vadd.f32 %v2783_v63, %v2660_v51 }
 0xca8   :  { %v2790_v30 = vmul.f32 %v2786_v61, %v2778_v42  ;;  %v2788_v4 = vmul.f32 %v2782_v62, %v2782_v62  ;;  %v6508_v61 = vld [vmem:[#allocation7 + $0xe0] ss:$12 sps:$4 sm:$0xff]  }
 0xca9   :  { %v2791_v5 = vmul.f32 %v2787_v0, %v2780_v60  ;;  %v2789_v6 = vmul.f32 %v2784_v29, %v2784_v29 }
 0xcaa   :  { %v2794_v39 = vmul.f32 0.044715, %v2790_v30  ;;  %v2792_v8 = vmul.f32 %v2788_v4, %v2782_v62 }
 0xcab   :  { %v2795_v9 = vmul.f32 0.044715, %v2791_v5  ;;  %v2793_v10 = vmul.f32 %v2789_v6, %v2784_v29  ;;  %v6511_v6 = vld [vmem:[#allocation7 + $0xf4] ss:$12 sps:$4 sm:$0xff]  }
 0xcac   :  { %v2798_v34 = vadd.f32 %v2794_v39, %v2778_v42  ;;  %v2796_v11 = vmul.f32 0.044715, %v2792_v8  ;;  %v6509_v39 = vld [vmem:[#allocation7 + $0xf0] ss:$12 sps:$4 sm:$0xff]   ;;  %v6512_v8 = vld [vmem:[#allocation7 + $0xf8] ss:$12 sps:$4 sm:$0xff]  }
 0xcad   :  { %v2799_v12 = vadd.f32 %v2795_v9, %v2780_v60  ;;  %v2797_v13 = vmul.f32 0.044715, %v2793_v10  ;;  %v6515_v9 = vld [vmem:[#allocation7 + $0x10c] ss:$12 sps:$4 sm:$0xff]   ;;  %v6513_v10 = vld [vmem:[#allocation7 + $0x108] ss:$12 sps:$4 sm:$0xff]  }
 0xcae   :  { %v2802_v14 = vmul.f32 0.7978846, %v2798_v34  ;;  %v2800_v15 = vadd.f32 %v2796_v11, %v2782_v62  ;;  %v6516_v34 = vld [vmem:[#allocation7 + $0x110] ss:$12 sps:$4 sm:$0xff]  }
 0xcaf   :  { %v2803_v16 = vmul.f32 0.7978846, %v2799_v12  ;;  %v2801_v17 = vadd.f32 %v2797_v13, %v2784_v29  ;;  %v6519_v11 = vld [vmem:[#allocation7 + $0x124] ss:$12 sps:$4 sm:$0xff]   ;;  %v6517_v12 = vld [vmem:[#allocation7 + $0x120] ss:$12 sps:$4 sm:$0xff]  }
 0xcb0   :  { %6629 = vtanh.f32 %v2802_v14  ;;  %v2804_v18 = vmul.f32 0.7978846, %v2800_v15  ;;  %v6520_v13 = vld [vmem:[#allocation7 + $0x128] ss:$12 sps:$4 sm:$0xff]   ;;  %v6521_v15 = vld [vmem:[#allocation7 + $0x138] ss:$12 sps:$4 sm:$0xff]  }
 0xcb1   :  { %6631 = vtanh.f32 %v2803_v16  ;;  %v2805_v19 = vmul.f32 0.7978846, %v2801_v17  ;;  %v6523_v14 = vld [vmem:[#allocation7 + $0x13c] ss:$12 sps:$4 sm:$0xff]   ;;  %v6524_v16 = vld [vmem:[#allocation7 + $0x140] ss:$12 sps:$4 sm:$0xff]  }
 0xcb2   :  { %6633 = vtanh.f32 %v2804_v18  ;;  %v6527_v17 = vld [vmem:[#allocation7 + $0x154] ss:$12 sps:$4 sm:$0xff]   ;;  %v6525_v18 = vld [vmem:[#allocation7 + $0x150] ss:$12 sps:$4 sm:$0xff]  }
 0xcb3   :  { %6635 = vtanh.f32 %v2805_v19  ;;  %v6528_v19 = vld [vmem:[#allocation7 + $0x158] ss:$12 sps:$4 sm:$0xff]  }
 0xcba   :  { %v6630_v20 = vpop.eup %6629 }
 0xcbb   :  { %v6632_v21 = vpop.eup %6631  ;;  %v2810_v22 = vadd.f32 1.0, %v6630_v20  ;;  %v6531_v20 = vld [vmem:[#allocation7 + $0x16c] ss:$12 sps:$4 sm:$0xff]  }
 0xcbc   :  { %v6634_v24 = vpop.eup %6633  ;;  %v2811_v26 = vadd.f32 1.0, %v6632_v21  ;;  %v6529_v21 = vld [vmem:[#allocation7 + $0x168] ss:$12 sps:$4 sm:$0xff]  }
 0xcbd   :  { %v6636_v27 = vpop.eup %6635  ;;  %v2814_v28 = vmul.f32 0.5, %v2810_v22  ;;  %v2812_v31 = vadd.f32 1.0, %v6634_v24  ;;  %v6532_v22 = vld [vmem:[#allocation7 + $0x170] ss:$12 sps:$4 sm:$0xff]  }
 0xcbe   :  { %v2813_v38 = vadd.f32 1.0, %v6636_v27  ;;  %v2815_v40 = vmul.f32 0.5, %v2811_v26 }
 0xcbf   :  { %v2816_v41 = vmul.f32 0.5, %v2812_v31  ;;  %v2818_v56 = vmul.f32 %v2814_v28, %v2778_v42  ;;  %v6501_v42 = vld [vmem:[#allocation7 + $0xc0] ss:$12 sps:$4 sm:$0xff]  }
 0xcc0   :  { %v2817_v44 = vmul.f32 0.5, %v2813_v38  ;;  %v2819_v46 = vmul.f32 %v2815_v40, %v2780_v60  ;;  %v6504_v60 = vld [vmem:[#allocation7 + $0xc8] ss:$12 sps:$4 sm:$0xff]   ;;  %3223 = vmatpush1.bf16.msra.mxu1 %v6501_v42 }
 0xcc1   :  { %v2820_v45 = vmul.f32 %v2816_v41, %v2782_v62  ;;  %v6505_v62 = vld [vmem:[#allocation7 + $0xd8] ss:$12 sps:$4 sm:$0xff]   ;;  %3224 = vmatprep.subr.bf16.mxu1 %v6507_v43  ;;  %v5508_v41 = vld [vmem:[%s7724_s17] ss:$0 sm:$0xff] }
 0xcc2   :  { %v2821_v47 = vmul.f32 %v2817_v44, %v2784_v29 }
 0xcc3   :  { %v2854_v48 = vpack.c.bf16 %v2820_v45, %v2818_v56 }
 0xcc4   :  { %v2855_v49 = vpack.c.bf16 %v2821_v47, %v2819_v46  ;;  %3225 = vmatpush1.bf16.msra.mxu1 %v6505_v62  ;;  %v5509_v47 = vld [vmem:[%s7725_s18] ss:$0 sm:$0xff] }
 0xcc5   :  { %3226 = vmatprep.subr.bf16.mxu1 %v6511_v6 }
 0xcc6   :  { %2991 = vmatprep.mubr.bf16.mxu0 %v2855_v49 }
 0xcc7   :  { %2992 = vmatmul.mubr.bf16.vlgmr.msra.gmra.mrb[32].mxu0 %v2854_v48 }
 0xcc8   :  { %6092 = vmatprep.mubr.msk.bf16.mxu0 %vm6870_vm8, %v6868_v7  ;;  %6077 = vmatpush3.bf16.msra.mxu0 %v6504_v60 }
 0xcc9   :  { %6078 = vmatprep.subr.bf16.mxu0 %v6868_v7  ;;  %3227 = vmatpush1.bf16.msra.mxu1 %v6509_v39 }
 0xcca   :  { %3228 = vmatprep.subr.bf16.mxu1 %v6515_v9 }
 0xccc   :  { %6079 = vmatpush3.bf16.msra.mxu0 %v6508_v61 }
 0xccd   :  { %6080 = vmatprep.subr.bf16.mxu0 %v6868_v7  ;;  %3229 = vmatpush1.bf16.msra.mxu1 %v6513_v10 }
 0xcce   :  { %3230 = vmatprep.subr.bf16.mxu1 %v6519_v11 }
 0xcd0   :  { %6081 = vmatpush3.bf16.msra.mxu0 %v6512_v8 }
 0xcd1   :  { %6082 = vmatprep.subr.bf16.mxu0 %v6868_v7  ;;  %3231 = vmatpush1.bf16.msra.mxu1 %v6517_v12 }
 0xcd2   :  { %3232 = vmatprep.subr.bf16.mxu1 %v6523_v14 }
 0xcd4   :  { %6083 = vmatpush3.bf16.msra.mxu0 %v6516_v34 }
 0xcd5   :  { %6084 = vmatprep.subr.bf16.mxu0 %v6868_v7  ;;  %3233 = vmatpush1.bf16.msra.mxu1 %v6521_v15 }
 0xcd6   :  { %3234 = vmatprep.subr.bf16.mxu1 %v6527_v17 }
 0xcd8   :  { %6085 = vmatpush3.bf16.msra.mxu0 %v6520_v13 }
 0xcd9   :  { %6086 = vmatprep.subr.bf16.mxu0 %v6868_v7  ;;  %3235 = vmatpush1.bf16.msra.mxu1 %v6525_v18 }
 0xcda   :  { %3236 = vmatprep.subr.bf16.mxu1 %v6531_v20 }
 0xcdc   :  { %6087 = vmatpush3.bf16.msra.mxu0 %v6524_v16 }
 0xcdd   :  { %6088 = vmatprep.subr.bf16.mxu0 %v6868_v7  ;;  %3237 = vmatpush1.bf16.msra.mxu1 %v6529_v21 }
 0xcde   :  { %6096 = vmatprep.subr.mxu1 %v6868_v7 }
 0xce0   :  { %6089 = vmatpush3.bf16.msra.mxu0 %v6528_v19 }
 0xce1   :  { %6090 = vmatprep.subr.bf16.mxu0 %v6868_v7 }
 0xce4   :  { %6091 = vmatpush3.bf16.msra.mxu0 %v6532_v22 }
 0xce5   :  { %6136 = vmatprep.subr.mxu0 %v6868_v7 }
 0xd9a   :  { %v5850_v50 = vpop.f32.mrb[32].mxu0 }
 0xd9b   :  { %v5851_v53 = vpop.f32.mrb[33].mxu0 }
 0xd9c   :  { %v5852_v23 = vadd.f32 %v5851_v53, %v5850_v50  ;;  %v5853_v54 = vpop.f32.mrb[34].mxu0  ;;  %v5510_v53 = vld [vmem:[%s7715_s8 + $0x3] sm:$0x7] }
 0xd9d   :  { %v5854_v55 = vpop.f32.mrb[35].mxu0 }
 0xd9e   :  { %v2994_v57 = vadd.f32 %v5852_v23, %v5491_v52  ;;  %v5855_v58 = vadd.f32 %v5854_v55, %v5853_v54  ;;  %v3086_v23 = vrot.slane %v5510_v53, %v7226_v32 }
 0xda0   :  { %v2997_v2 = vadd.f32 %v5855_v58, %v5491_v52  ;;  %v3000_v51 = vadd.f32 %v2994_v57, %v7407_v33  ;;  %v3082_v57 = vrot.slane %v5510_v53, %v7232_v35  ;;  %v3090_v58 = vrot.slane %v5510_v53, %v909_v36 }
 0xda2   :  { %3004 = vadd.xlane.f32.xlu0 %v3000_v51  ;;  %v3001_v25 = vadd.f32 %v2997_v2, %v7409_v37 }
 0xda4   :  { %3006 = vadd.xlane.f32.xlu1 %v3001_v25 }
 0xe2f   :  { %v3005_v33 = vpop.xlane.xlu0 %3004 }
 0xe30   :  { %v3008_v63 = vmul.f32 0.0078125, %v3005_v33 }
 0xe31   :  { %v3007_v37 = vpop.xlane.xlu1 %3006 }
 0xe32   :  { %v3010_v0 = vsub.f32 %v3000_v51, %v3008_v63  ;;  %v3009_v29 = vmul.f32 0.0078125, %v3007_v37 }
 0xe34   :  { %v3011_v30 = vsub.f32 %v3001_v25, %v3009_v29  ;;  %v3012_v4 = vmul.f32 %v3010_v0, %v3010_v0 }
 0xe36   :  { %3014 = vadd.xlane.f32.xlu0 %v3012_v4  ;;  %v3013_v5 = vmul.f32 %v3011_v30, %v3011_v30 }
 0xe38   :  { %3016 = vadd.xlane.f32.xlu1 %v3013_v5 }
 0xec3   :  { %v3015_v24 = vpop.xlane.xlu0 %3014 }
 0xec4   :  { %v3018_v26 = vmul.f32 0.0078125, %v3015_v24 }
 0xec5   :  { %v3017_v27 = vpop.xlane.xlu1 %3016 }
 0xec6   :  { %v3020_v28 = vadd.f32 1e-12, %v3018_v26  ;;  %v3019_v31 = vmul.f32 0.0078125, %v3017_v27 }
 0xec8   :  { %6637 = vrsqrt.f32 %v3020_v28  ;;  %v3021_v38 = vadd.f32 1e-12, %v3019_v31 }
 0xeca   :  { %6639 = vrsqrt.f32 %v3021_v38 }
 0xed2   :  { %v6638_v40 = vpop.eup %6637 }
 0xed3   :  { %v3024_v44 = vmul.f32 %v6638_v40, %v3010_v0 }
 0xed4   :  { %v6640_v56 = vpop.eup %6639 }
 0xed5   :  { %v3025_v45 = vmul.f32 %v6640_v56, %v3011_v30  ;;  %v3032_v46 = vmul.f32 %v5508_v41, %v3024_v44 }
 0xed7   :  { %v3033_v48 = vmul.f32 %v5508_v41, %v3025_v45  ;;  %v7442_v49 = vadd.f32 %v5509_v47, %v3032_v46 }
 0xed9   :  { %v7444_v50 = vadd.f32 %v5509_v47, %v3033_v48 }
 0xedb   :  { %v3075_v52 = vpack.c.bf16 %v7444_v50, %v7442_v49 }
 0xedd   :  { %3255 = vmatmul.mubr.bf16.vlgmr.msra.gmra.mrb[36].mxu1 %v3075_v52  ;;  %6093 = vmatmul.mubr.bf16.vlgmr.msra.gmra.mrb[36].mxu0 %v3075_v52 }
 0xede   :  { %6098 = vmatprep.mubr.msk.f32.mxu1 %vm6870_vm8, %v6868_v7  ;;  %6138 = vmatprep.mubr.msk.f32.mxu0 %vm6870_vm8, %v6868_v7 }
 0xfb0   :  { %v3256_v54 = vpop.f32.mrb[36].mxu1  ;;  %v3299_v55 = vpop.f32.mrb[36].mxu0 }
 0xfb1   :  { %v3258_v2 = vpop.f32.mrb[37].mxu1  ;;  %v6094_v51 = vpop.f32.mrb[37].mxu0  ;;  %v7464_v33 = vadd.f32 %v3256_v54, %v3082_v57  ;;  %v7467_v63 = vadd.f32 %v3299_v55, %v3090_v58 }
 0xfb2   :  { %v3259_v25 = vadd.f32 %v3258_v2, %v3086_v23  ;;  %v3260_v42 = vpop.f32.mrb[38].mxu1  ;;  %v3302_v59 = vpop.f32.mrb[38].mxu0 }
 0xfb3   :  { %v7459_v60 = vadd.f32 %v3302_v59, %v3090_v58  ;;  %v3262_v43 = vpop.f32.mrb[39].mxu1  ;;  %v6095_v61 = vpop.f32.mrb[39].mxu0  ;;  %v7471_v3 = vadd.f32 %v3260_v42, %v3082_v57 }
 0xfb4   :  { %v7461_v62 = vadd.f32 %v3262_v43, %v3086_v23  ;;  %6097 = vmatpush3.xpose.msk.msra.mxu1 %vm1126_vm9, %v3259_v25 }
 0xfb5   :  { %6101 = vmatprep.subr.mxu1 %v6868_v7 }
 0xfb6   :  { %6137 = vmatpush3.xpose.msk.msra.mxu0 %vm1126_vm9, %v7461_v62 }
 0xfb7   :  { %6099 = vmatmul.mubr.msk.f32.vlgmr.msra.gmra.mrb[40].mxu1 %vm1126_vm9, %v7464_v33  ;;  %6146 = vmatprep.subr.mxu0 %v6868_v7 }
 0xfb8   :  { %6102 = vmatpush3.msra.mxu1 %v7467_v63  ;;  %6103 = vmatprep.mubr.msk.f32.mxu1 %vm6870_vm8, %v6868_v7 }
 0xfb9   :  { %6139 = vmatmul.mubr.msk.f32.vlgmr.msra.gmra.mrb[26].mxu0 %vm1126_vm9, %v7471_v3  ;;  %6106 = vmatprep.subr.mxu1 %v6868_v7 }
 0xfba   :  { %6148 = vmatprep.mubr.msk.f32.mxu0 %vm6870_vm8, %v6868_v7 }
0x108a   :  { %v3378_v36 = vpop.f32.mrb[40].mxu1 }
0x108b   :  { %v3382_v37 = vmul.f32 0.17677669, %v3378_v36  ;;  %v6100_v0 = vpop.f32.mrb[41].mxu1 }
0x108c   :  { %v7484_v29 = vpop.f32.mrb[26].mxu0 }
0x108d   :  { %v6140_v30 = vpop.f32.mrb[27].mxu0  ;;  %v3383_v4 = vsel %vm1204_vm10, %v3382_v37, -inf  ;;  %v4057_v52 = vmul.f32 0.17677669, %v7484_v29 }
0x108e   :  { %3384 = vmax.xlane.f32.xlu0 %v3383_v4 }
0x108f   :  { %v4058_v53 = vsel %vm1204_vm10, %v4057_v52, -inf }
0x10a4   :  { %3469 = vrot.lane.b32.xlu0 %v3259_v25, %s6871_s24 }
0x111b   :  { %v3385_v5 = vpop.xlane.xlu0 %3384 }
0x111c   :  { %v3386_v6 = vsub.f32 %v3382_v37, %v3385_v5 }
0x111e   :  { %v3387_v39 = vmul.f32 1.442695, %v3386_v6 }
0x111f   :  { %v3470_v12 = vpop.permute.xlu0 %3469 }
0x1120   :  { %6641 = vpow2.f32 %v3387_v39 }
0x112a   :  { %v6642_v8 = vpop.eup %6641 }
0x112b   :  { %v3389_v9 = vsel %vm1204_vm10, %v6642_v8, 0.0 }
0x112c   :  { %3390 = vadd.xlane.f32.xlu1 %v3389_v9 }
0x113d   :  { %3467 = vrot.lane.b32.xlu1 %v7464_v33, %s6871_s24 }
0x11b9   :  { %v3391_v10 = vpop.xlane.xlu1 %3390 }
0x11ba   :  { %6643 = vrcp.f32 %v3391_v10 }
0x11bd   :  { %v3468_v13 = vpop.permute.xlu1 %3467 }
0x11c4   :  { %v6644_v34 = vpop.eup %6643 }
0x11c5   :  { %v3393_v11 = vmul.f32 %v6644_v34, %v6642_v8 }
0x11c7   :  { %6104 = vmatmul.mubr.msk.f32.vlgmr.msra.gmra.mrb[42].mxu1 %vm1204_vm10, %v3393_v11 }
0x11c8   :  { %6107 = vmatpush3.xpose.msk.msra.mxu1 %vm1126_vm9, %v3470_v12  ;;  %6108 = vmatprep.mubr.msk.f32.mxu1 %vm6870_vm8, %v6868_v7 }
0x11c9   :  { %6111 = vmatprep.subr.mxu1 %v6868_v7 }
0x11cb   :  { %6109 = vmatmul.mubr.msk.f32.vlgmr.msra.gmra.mrb[44].mxu1 %vm1126_vm9, %v3468_v13 }
0x11cc   :  { %6113 = vmatprep.mubr.msk.f32.mxu1 %vm6870_vm8, %v6868_v7 }
0x129a   :  { %v7499_v14 = vpop.f32.mrb[42].mxu1 }
0x129b   :  { %v6105_v15 = vpop.f32.mrb[43].mxu1 }
0x129e   :  { %v3541_v16 = vpop.f32.mrb[44].mxu1 }
0x129f   :  { %v3545_v17 = vmul.f32 0.17677669, %v3541_v16  ;;  %v6110_v18 = vpop.f32.mrb[45].mxu1 }
0x12a1   :  { %v3546_v19 = vsel %vm1204_vm10, %v3545_v17, -inf }
0x12a2   :  { %3547 = vmax.xlane.f32.xlu1 %v3546_v19 }
0x12b3   :  { %3636 = vrot.lane.b32.xlu1 %v3259_v25, %s7757_s30 }
0x12b7   :  { %3634 = vrot.lane.b32.xlu1 %v7464_v33, %s7757_s30 }
0x12bb   :  { %3802 = vrot.lane.b32.xlu1 %v3259_v25, %s6872_s6 }
0x132f   :  { %v3548_v20 = vpop.xlane.xlu1 %3547 }
0x1330   :  { %v3549_v21 = vsub.f32 %v3545_v17, %v3548_v20 }
0x1332   :  { %v3550_v22 = vmul.f32 1.442695, %v3549_v21 }
0x1333   :  { %v3637_v38 = vpop.permute.xlu1 %3636 }
0x1334   :  { %6645 = vpow2.f32 %v3550_v22 }
0x1337   :  { %v3635_v41 = vpop.permute.xlu1 %3634 }
0x133b   :  { %v3803_v51 = vpop.permute.xlu1 %3802 }
0x133e   :  { %v6646_v24 = vpop.eup %6645 }
0x133f   :  { %v3552_v26 = vsel %vm1204_vm10, %v6646_v24, 0.0 }
0x1340   :  { %3553 = vadd.xlane.f32.xlu0 %v3552_v26 }
0x1356   :  { %3558 = vrot.lane.b32.xlu0 %v7467_v63, %s6871_s24 }
0x13cd   :  { %v3554_v27 = vpop.xlane.xlu0 %3553 }
0x13ce   :  { %6647 = vrcp.f32 %v3554_v27 }
0x13d1   :  { %v3559_v28 = vpop.permute.xlu0 %3558 }
0x13d2   :  { %6112 = vmatpush3.msra.mxu1 %v3559_v28 }
0x13d3   :  { %6116 = vmatprep.subr.mxu1 %v6868_v7 }
0x13d8   :  { %v6648_v31 = vpop.eup %6647 }
0x13d9   :  { %v3556_v40 = vmul.f32 %v6648_v31, %v6646_v24 }
0x13db   :  { %6114 = vmatmul.mubr.msk.f32.vlgmr.msra.gmra.mrb[46].mxu1 %vm1204_vm10, %v3556_v40 }
0x13dc   :  { %6117 = vmatpush3.xpose.msk.msra.mxu1 %vm1126_vm9, %v3637_v38  ;;  %6118 = vmatprep.mubr.msk.f32.mxu1 %vm6870_vm8, %v6868_v7 }
0x13dd   :  { %6121 = vmatprep.subr.mxu1 %v6868_v7 }
0x13df   :  { %6119 = vmatmul.mubr.msk.f32.vlgmr.msra.gmra.mrb[48].mxu1 %vm1126_vm9, %v3635_v41 }
0x13e0   :  { %6123 = vmatprep.mubr.msk.f32.mxu1 %vm6870_vm8, %v6868_v7 }
0x14ae   :  { %v7518_v44 = vpop.f32.mrb[46].mxu1 }
0x14af   :  { %v6115_v56 = vpop.f32.mrb[47].mxu1 }
0x14b2   :  { %v3708_v45 = vpop.f32.mrb[48].mxu1 }
0x14b3   :  { %v3712_v46 = vmul.f32 0.17677669, %v3708_v45  ;;  %v6120_v47 = vpop.f32.mrb[49].mxu1 }
0x14b5   :  { %v3713_v48 = vsel %vm1204_vm10, %v3712_v46, -inf }
0x14b6   :  { %3714 = vmax.xlane.f32.xlu0 %v3713_v48 }
0x14cc   :  { %3724 = vrot.lane.b32.xlu0 %v7467_v63, %s7757_s30 }
0x14d0   :  { %3800 = vrot.lane.b32.xlu0 %v7464_v33, %s6872_s6 }
0x14d4   :  { %4142 = vrot.lane.b32.xlu0 %v7471_v3, %s6871_s24 }
0x14d8   :  { %4309 = vrot.lane.b32.xlu0 %v7471_v3, %s7757_s30 }
0x14dc   :  { %4475 = vrot.lane.b32.xlu0 %v7471_v3, %s6872_s6 }
0x14fb   :  { %4059 = vmax.xlane.f32.xlu0 %v4058_v53 }
0x1543   :  { %v3715_v23 = vpop.xlane.xlu0 %3714 }
0x1544   :  { %v3716_v54 = vsub.f32 %v3712_v46, %v3715_v23 }
0x1546   :  { %v3717_v55 = vmul.f32 1.442695, %v3716_v54 }
0x1547   :  { %v3725_v57 = vpop.permute.xlu0 %3724 }
0x1548   :  { %6649 = vpow2.f32 %v3717_v55  ;;  %6122 = vmatpush3.msra.mxu1 %v3725_v57 }
0x1549   :  { %6126 = vmatprep.subr.mxu1 %v6868_v7 }
0x154b   :  { %v3801_v25 = vpop.permute.xlu0 %3800 }
0x154f   :  { %v4143_v59 = vpop.permute.xlu0 %4142 }
0x1552   :  { %v6650_v58 = vpop.eup %6649 }
0x1553   :  { %v3719_v2 = vsel %vm1204_vm10, %v6650_v58, 0.0  ;;  %v4310_v33 = vpop.permute.xlu0 %4309 }
0x1554   :  { %3720 = vadd.xlane.f32.xlu1 %v3719_v2 }
0x1557   :  { %v4476_v37 = vpop.permute.xlu0 %4475 }
0x1565   :  { %4144 = vrot.lane.b32.xlu1 %v7461_v62, %s6871_s24 }
0x1569   :  { %4311 = vrot.lane.b32.xlu1 %v7461_v62, %s7757_s30 }
0x156d   :  { %4477 = vrot.lane.b32.xlu1 %v7461_v62, %s6872_s6 }
0x1588   :  { %v4060_v0 = vpop.xlane.xlu0 %4059 }
0x1589   :  { %v4061_v29 = vsub.f32 %v4057_v52, %v4060_v0 }
0x158b   :  { %v4062_v30 = vmul.f32 1.442695, %v4061_v29 }
0x15e1   :  { %v3721_v42 = vpop.xlane.xlu1 %3720 }
0x15e2   :  { %6651 = vrcp.f32 %v3721_v42 }
0x15e3   :  { %6653 = vpow2.f32 %v4062_v30 }
0x15e5   :  { %v4145_v43 = vpop.permute.xlu1 %4144 }
0x15e6   :  { %6147 = vmatpush3.xpose.msk.msra.mxu0 %vm1126_vm9, %v4145_v43 }
0x15e7   :  { %6156 = vmatprep.subr.mxu0 %v6868_v7 }
0x15e9   :  { %v4312_v61 = vpop.permute.xlu1 %4311  ;;  %6149 = vmatmul.mubr.msk.f32.vlgmr.msra.gmra.mrb[40].mxu0 %vm1126_vm9, %v4143_v59 }
0x15ea   :  { %6157 = vmatpush3.xpose.msk.msra.mxu0 %vm1126_vm9, %v4312_v61  ;;  %6158 = vmatprep.mubr.msk.f32.mxu0 %vm6870_vm8, %v6868_v7 }
0x15eb   :  { %6166 = vmatprep.subr.mxu0 %v6868_v7 }
0x15ec   :  { %v6652_v62 = vpop.eup %6651 }
0x15ed   :  { %v3723_v3 = vmul.f32 %v6652_v62, %v6650_v58  ;;  %v4478_v36 = vpop.permute.xlu1 %4477  ;;  %6159 = vmatmul.mubr.msk.f32.vlgmr.msra.gmra.mrb[42].mxu0 %vm1126_vm9, %v4310_v33  ;;  %v6654_v19 = vpop.eup %6653 }
0x15ee   :  { %6167 = vmatpush3.xpose.msk.msra.mxu0 %vm1126_vm9, %v4478_v36  ;;  %6168 = vmatprep.mubr.msk.f32.mxu0 %vm6870_vm8, %v6868_v7  ;;  %v4064_v22 = vsel %vm1204_vm10, %v6654_v19, 0.0 }
0x15ef   :  { %6124 = vmatmul.mubr.msk.f32.vlgmr.msra.gmra.mrb[50].mxu1 %vm1204_vm10, %v3723_v3  ;;  %6176 = vmatprep.subr.bf16.mxu0 %v6868_v7 }
0x15f0   :  { %6127 = vmatpush3.xpose.msk.msra.mxu1 %vm1126_vm9, %v3803_v51  ;;  %6128 = vmatprep.mubr.msk.f32.mxu1 %vm6870_vm8, %v6868_v7 }
0x15f1   :  { %6169 = vmatmul.mubr.msk.f32.vlgmr.msra.gmra.mrb[44].mxu0 %vm1126_vm9, %v4476_v37  ;;  %6131 = vmatprep.subr.mxu1 %v6868_v7 }
0x15f2   :  { %6192 = vmatprep.mubr.msk.bf16.mxu0 %vm6870_vm8, %v6868_v7 }
0x15f3   :  { %6129 = vmatmul.mubr.msk.f32.vlgmr.msra.gmra.mrb[52].mxu1 %vm1126_vm9, %v3801_v25 }
0x15f4   :  { %6133 = vmatprep.mubr.msk.f32.mxu1 %vm6870_vm8, %v6868_v7 }
0x16bc   :  { %v4216_v4 = vpop.f32.mrb[40].mxu0 }
0x16bd   :  { %v4220_v5 = vmul.f32 0.17677669, %v4216_v4  ;;  %v6150_v6 = vpop.f32.mrb[41].mxu0 }
0x16bf   :  { %v4221_v39 = vsel %vm1204_vm10, %v4220_v5, -inf }
0x16c0   :  { %4222 = vmax.xlane.f32.xlu0 %v4221_v39  ;;  %v4383_v8 = vpop.f32.mrb[42].mxu0  ;;  %v6533_v39 = vld [vmem:[#allocation8 + $0x40] sm:$0xff]  }
0x16c1   :  { %v6160_v9 = vpop.f32.mrb[43].mxu0  ;;  %v4387_v20 = vmul.f32 0.17677669, %v4383_v8  ;;  %6177 = vmatpush3.bf16.msra.mxu0 %v6533_v39  ;;  %v6534_v8 = vld [vmem:[#allocation8 + $0x48] sm:$0xff]   ;;  %v6550_v39 = vld [vmem:[#allocation10 + $0xb0] ss:$8 sps:$4 sm:$0xff]  }
0x16c2   :  { %v7565_v10 = vpop.f32.mrb[50].mxu1  ;;  %6178 = vmatprep.subr.bf16.mxu0 %v6868_v7  ;;  %v6535_v9 = vld [vmem:[#allocation8 + $0x50] sm:$0xff]  }
0x16c3   :  { %v6125_v34 = vpop.f32.mrb[51].mxu1  ;;  %v4388_v24 = vsel %vm1204_vm10, %v4387_v20, -inf }
0x16c4   :  { %v4549_v11 = vpop.f32.mrb[44].mxu0  ;;  %v6536_v34 = vld [vmem:[#allocation8 + $0x58] sm:$0xff]  }
0x16c5   :  { %v4553_v12 = vmul.f32 0.17677669, %v4549_v11  ;;  %v6170_v13 = vpop.f32.mrb[45].mxu0  ;;  %6179 = vmatpush3.bf16.msra.mxu0 %v6534_v8  ;;  %v6537_v11 = vld [vmem:[#allocation8 + $0x60] sm:$0xff]  }
0x16c6   :  { %v3874_v15 = vpop.f32.mrb[52].mxu1  ;;  %6180 = vmatprep.subr.bf16.mxu0 %v6868_v7  ;;  %v6555_v8 = vld [vmem:[#allocation10 + $0xc4] ss:$8 sps:$4 sm:$0xff]  }
0x16c7   :  { %v3878_v16 = vmul.f32 0.17677669, %v3874_v15  ;;  %v6130_v17 = vpop.f32.mrb[53].mxu1  ;;  %v4554_v18 = vsel %vm1204_vm10, %v4553_v12, -inf  ;;  %v6539_v15 = vld [vmem:[#allocation8 + $0x70] sm:$0xff]  }
0x16c8   :  { %4555 = vmax.xlane.f32.xlu0 %v4554_v18  ;;  %v6540_v18 = vld [vmem:[#allocation8 + $0x78] sm:$0xff]  }
0x16c9   :  { %v3879_v21 = vsel %vm1204_vm10, %v3878_v16, -inf  ;;  %6181 = vmatpush3.bf16.msra.mxu0 %v6535_v9  ;;  %v6553_v9 = vld [vmem:[#allocation10 + $0xc0] ss:$8 sps:$4 sm:$0xff]  }
0x16ca   :  { %3880 = vmax.xlane.f32.xlu1 %v3879_v21  ;;  %6182 = vmatprep.subr.bf16.mxu0 %v6868_v7 }
0x16cc   :  { %4065 = vadd.xlane.f32.xlu0 %v4064_v22 }
0x16cd   :  { %6183 = vmatpush3.bf16.msra.mxu0 %v6536_v34  ;;  %v6558_v34 = vld [vmem:[#allocation10 + $0xd4] ss:$8 sps:$4 sm:$0xff]  }
0x16ce   :  { %4389 = vmax.xlane.f32.xlu1 %v4388_v24  ;;  %6184 = vmatprep.subr.bf16.mxu0 %v6868_v7 }
0x16d1   :  { %6185 = vmatpush3.bf16.msra.mxu0 %v6537_v11  ;;  %v6556_v11 = vld [vmem:[#allocation10 + $0xd0] ss:$8 sps:$4 sm:$0xff]  }
0x16d2   :  { %6186 = vmatprep.subr.bf16.mxu0 %v6868_v7 }
0x174d   :  { %v4223_v26 = vpop.xlane.xlu0 %4222 }
0x174e   :  { %v4224_v27 = vsub.f32 %v4220_v5, %v4223_v26 }
0x1750   :  { %v4225_v28 = vmul.f32 1.442695, %v4224_v27 }
0x1752   :  { %6655 = vpow2.f32 %v4225_v28 }
0x1755   :  { %v4556_v31 = vpop.xlane.xlu0 %4555 }
0x1756   :  { %v4557_v38 = vsub.f32 %v4553_v12, %v4556_v31 }
0x1757   :  { %v3881_v40 = vpop.xlane.xlu1 %3880 }
0x1758   :  { %v4558_v41 = vmul.f32 1.442695, %v4557_v38  ;;  %v3882_v56 = vsub.f32 %v3878_v16, %v3881_v40 }
0x1759   :  { %v4066_v42 = vpop.xlane.xlu0 %4065 }
0x175a   :  { %6657 = vpow2.f32 %v4558_v41  ;;  %v3883_v45 = vmul.f32 1.442695, %v3882_v56 }
0x175b   :  { %v4390_v46 = vpop.xlane.xlu1 %4389 }
0x175c   :  { %v6656_v47 = vpop.eup %6655  ;;  %6659 = vpow2.f32 %v3883_v45  ;;  %v4391_v48 = vsub.f32 %v4387_v20, %v4390_v46 }
0x175d   :  { %v4227_v52 = vsel %vm1204_vm10, %v6656_v47, 0.0 }
0x175e   :  { %v4392_v53 = vmul.f32 1.442695, %v4391_v48  ;;  %4228 = vadd.xlane.f32.xlu1 %v4227_v52 }
0x1760   :  { %6661 = vpow2.f32 %v4392_v53 }
0x1764   :  { %v6658_v23 = vpop.eup %6657 }
0x1765   :  { %v4560_v54 = vsel %vm1204_vm10, %v6658_v23, 0.0 }
0x1766   :  { %v6660_v55 = vpop.eup %6659  ;;  %4561 = vadd.xlane.f32.xlu1 %v4560_v54 }
0x1767   :  { %v3885_v57 = vsel %vm1204_vm10, %v6660_v55, 0.0 }
0x176a   :  { %v6662_v58 = vpop.eup %6661  ;;  %3886 = vadd.xlane.f32.xlu1 %v3885_v57 }
0x176b   :  { %v4394_v2 = vsel %vm1204_vm10, %v6662_v58, 0.0 }
0x176c   :  { %4395 = vadd.xlane.f32.xlu0 %v4394_v2 }
0x177b   :  { %4233 = vrot.lane.b32.xlu1 %v7459_v60, %s6871_s24 }
0x177f   :  { %4399 = vrot.lane.b32.xlu1 %v7459_v60, %s7757_s30 }
0x1782   :  { %3890 = vrot.lane.b32.xlu0 %v7467_v63, %s6872_s6 }
0x1786   :  { %4565 = vrot.lane.b32.xlu0 %v7459_v60, %s6872_s6 }
0x17eb   :  { %v4229_v51 = vpop.xlane.xlu1 %4228 }
0x17f3   :  { %v4562_v25 = vpop.xlane.xlu1 %4561 }
0x17f7   :  { %v3887_v59 = vpop.xlane.xlu1 %3886 }
0x17f8   :  { %6663 = vrcp.f32 %v3887_v59 }
0x17f9   :  { %v4396_v43 = vpop.xlane.xlu0 %4395  ;;  %6665 = vrcp.f32 %v4066_v42 }
0x17fa   :  { %6667 = vrcp.f32 %v4229_v51 }
0x17fb   :  { %6669 = vrcp.f32 %v4396_v43  ;;  %v4234_v36 = vpop.permute.xlu1 %4233 }
0x17fc   :  { %6671 = vrcp.f32 %v4562_v25 }
0x17fd   :  { %v3891_v61 = vpop.permute.xlu0 %3890 }
0x17fe   :  { %6132 = vmatpush3.msra.mxu1 %v3891_v61 }
0x17ff   :  { %6141 = vmatprep.subr.mxu1 %v6868_v7  ;;  %v4400_v30 = vpop.permute.xlu1 %4399 }
0x1801   :  { %v4566_v5 = vpop.permute.xlu0 %4565 }
0x1802   :  { %v6664_v33 = vpop.eup %6663 }
0x1803   :  { %v3889_v62 = vmul.f32 %v6664_v33, %v6660_v55  ;;  %v6666_v3 = vpop.eup %6665  ;;  %v6541_v33 = vld [vmem:[#allocation10 + $0x80] ss:$8 sps:$4 sm:$0xff]  }
0x1804   :  { %v4068_v63 = vmul.f32 %v6666_v3, %v6654_v19  ;;  %v6668_v37 = vpop.eup %6667  ;;  %v6546_v3 = vld [vmem:[#allocation10 + $0x94] ss:$8 sps:$4 sm:$0xff]  }
0x1805   :  { %6134 = vmatmul.mubr.msk.f32.vlgmr.msra.gmra.mrb[54].mxu1 %vm1204_vm10, %v3889_v62  ;;  %v4231_v0 = vmul.f32 %v6668_v37, %v6656_v47  ;;  %v6670_v29 = vpop.eup %6669  ;;  %v6543_v62 = vld [vmem:[#allocation10 + $0x84] ss:$8 sps:$4 sm:$0xff]  }
0x1806   :  { %6142 = vmatpush3.msra.mxu1 %v7459_v60  ;;  %6143 = vmatprep.mubr.msk.f32.mxu1 %vm6870_vm8, %v6868_v7  ;;  %v4398_v60 = vmul.f32 %v6670_v29, %v6662_v58  ;;  %v6672_v4 = vpop.eup %6671  ;;  %v5560_v58 = vld [vmem:[%s7717_s10 + $0x1] ss:$0 sm:$0xff] }
0x1807   :  { %6151 = vmatprep.subr.mxu1 %v6868_v7  ;;  %v4564_v6 = vmul.f32 %v6672_v4, %v6658_v23 }
0x1809   :  { %6144 = vmatmul.mubr.msk.f32.vlgmr.msra.gmra.mrb[56].mxu1 %vm1204_vm10, %v4068_v63  ;;  %v6544_v63 = vld [vmem:[#allocation10 + $0x90] ss:$8 sps:$4 sm:$0xff]  }
0x180a   :  { %6152 = vmatpush3.msra.mxu1 %v4234_v36  ;;  %6153 = vmatprep.mubr.msk.f32.mxu1 %vm6870_vm8, %v6868_v7 }
0x180b   :  { %6161 = vmatprep.subr.mxu1 %v6868_v7 }
0x180d   :  { %6154 = vmatmul.mubr.msk.f32.vlgmr.msra.gmra.mrb[58].mxu1 %vm1204_vm10, %v4231_v0 }
0x180e   :  { %6162 = vmatpush3.msra.mxu1 %v4400_v30  ;;  %6163 = vmatprep.mubr.msk.f32.mxu1 %vm6870_vm8, %v6868_v7 }
0x180f   :  { %6171 = vmatprep.subr.mxu1 %v6868_v7 }
0x1811   :  { %6164 = vmatmul.mubr.msk.f32.vlgmr.msra.gmra.mrb[60].mxu1 %vm1204_vm10, %v4398_v60 }
0x1812   :  { %6172 = vmatpush3.msra.mxu1 %v4566_v5  ;;  %6173 = vmatprep.mubr.msk.f32.mxu1 %vm6870_vm8, %v6868_v7  ;;  %v6547_v5 = vld [vmem:[#allocation10 + $0xa0] ss:$8 sps:$4 sm:$0xff]  }
0x1813   :  { %4926 = vmatprep.subr.bf16.mxu1 %v6543_v62 }
0x1815   :  { %6174 = vmatmul.mubr.msk.f32.vlgmr.msra.gmra.mrb[62].mxu1 %vm1204_vm10, %v4564_v6  ;;  %v6552_v6 = vld [vmem:[#allocation10 + $0xb4] ss:$8 sps:$4 sm:$0xff]  }
0x1816   :  { %4958 = vmatprep.mubr.bf16.mxu1 %v6867_v1  ;;  %v6538_v1 = vld [vmem:[#allocation8 + $0x68] sm:$0xff]   ;;  %4927 = vmatpush1.bf16.msra.mxu1 %v6541_v33 }
0x1817   :  { %6187 = vmatpush3.bf16.msra.mxu0 %v6538_v1  ;;  %4928 = vmatprep.subr.bf16.mxu1 %v6546_v3  ;;  %v6561_v1 = vld [vmem:[#allocation10 + $0xe4] ss:$8 sps:$4 sm:$0xff]  }
0x1818   :  { %6188 = vmatprep.subr.bf16.mxu0 %v6868_v7 }
0x181a   :  { %4929 = vmatpush1.bf16.msra.mxu1 %v6544_v63 }
0x181b   :  { %6189 = vmatpush3.bf16.msra.mxu0 %v6539_v15  ;;  %v6562_v15 = vld [vmem:[#allocation10 + $0xf0] ss:$8 sps:$4 sm:$0xff]  }
0x181c   :  { %6190 = vmatprep.subr.bf16.mxu0 %v6868_v7 }
0x181f   :  { %6191 = vmatpush3.bf16.msra.mxu0 %v6540_v18 }
0x18d8   :  { %v3962_v12 = vpop.f32.mrb[54].mxu1 }
0x18d9   :  { %v6135_v13 = vpop.f32.mrb[55].mxu1 }
0x18da   :  { %v6564_v13 = vld [vmem:[#allocation10 + $0xf4] ss:$8 sps:$4 sm:$0xff]  }
0x18dc   :  { %v4138_v16 = vpop.f32.mrb[56].mxu1 }
0x18dd   :  { %v6145_v17 = vpop.f32.mrb[57].mxu1 }
0x18e0   :  { %v4305_v19 = vpop.f32.mrb[58].mxu1 }
0x18e1   :  { %v6406_v20 = vpack.i.bf16 %v4305_v19, %v7518_v44  ;;  %v6155_v21 = vpop.f32.mrb[59].mxu1 }
0x18e3   :  { %6407 = vrot.lane.b32.xlu1 %v6406_v20, %s6872_s6 }
0x18e4   :  { %v4471_v22 = vpop.f32.mrb[60].mxu1 }
0x18e5   :  { %v6411_v24 = vpack.i.bf16 %v4471_v22, %v7565_v10  ;;  %v6165_v26 = vpop.f32.mrb[61].mxu1 }
0x18e6   :  { %v5571_v26 = vld [vmem:[%s7718_s11 + $0x1] ss:$0 sm:$0xff] }
0x18e7   :  { %6412 = vrot.lane.b32.xlu0 %v6411_v24, %s7757_s30 }
0x18e8   :  { %v4637_v27 = vpop.f32.mrb[62].mxu1 }
0x18e9   :  { %v6416_v28 = vpack.i.bf16 %v4637_v27, %v3962_v12  ;;  %v6175_v31 = vpop.f32.mrb[63].mxu1  ;;  %v6559_v12 = vld [vmem:[#allocation10 + $0xe0] ss:$8 sps:$4 sm:$0xff]  }
0x18eb   :  { %6417 = vrot.lane.b32.xlu1 %v6416_v28, %s6871_s24  ;;  %s6873_s24 = smov [#allocation13]  }
0x18ec   :  { %s5360_s11 = sshll.u32 %s6873_s24, 4  ;;  %s5361_s11 = int_to_ptr.vmem [resolvable:$true] %s5360_s11 }
0x18ed   :  { %p6828_p7 = scmp.lt.s32.totalorder %s5361_s11, %s5361_s11 }
0x1955   :  { %v6408_v38 = vpop.permute.xlu1 %6407 }
0x1956   :  { %v6410_v41 = vunpack.i.h.bf16 %v6408_v38  ;;  %v6409_v56 = vunpack.i.l.bf16 %v6408_v38  ;;  %v5572_v38 = vld [vmem:[%s7719_s12 + $0x1] ss:$0 sm:$0xff] }
0x1958   :  { %v4653_v47 = vsel %vm1126_vm9, %v4138_v16, %v6410_v41  ;;  %v3978_v10 = vsel %vm1126_vm9, %v7499_v14, %v6409_v56 }
0x1959   :  { %v6413_v40 = vpop.permute.xlu0 %6412 }
0x195a   :  { %v6415_v44 = vunpack.i.h.bf16 %v6413_v40  ;;  %v6414_v45 = vunpack.i.l.bf16 %v6413_v40 }
0x195c   :  { %v4654_v53 = vsel %vm389_vm0, %v4653_v47, %v6415_v44  ;;  %v3979_v23 = vsel %vm389_vm0, %v3978_v10, %v6414_v45  ;;  %v6565_v45 = vld [vmem:[#allocation11 + $0xc0] sm:$0xff]   ;;  %v6567_v47 = vld [vmem:[#allocation11 + $0xc8] sm:$0xff]   ;;  %vm5232_vm0 = vcmask 1040384  }
0x195d   :  { %v6418_v46 = vpop.permute.xlu1 %6417  ;;  %5906 = vmatprep.subr.bf16.mxu0 %v6565_v45  ;;  %v6568_v10 = vld [vmem:[#allocation11 + $0x88] sm:$0xff]  }
0x195e   :  { %v6420_v48 = vunpack.i.h.bf16 %v6418_v46  ;;  %v6419_v52 = vunpack.i.l.bf16 %v6418_v46  ;;  %v6566_v46 = vld [vmem:[#allocation11 + $0x80] sm:$0xff]  }
0x1960   :  { %v4655_v54 = vsel %vm1802_vm11, %v4654_v53, %v6420_v48  ;;  %v3980_v55 = vsel %vm1802_vm11, %v3979_v23, %v6419_v52  ;;  %v6569_v48 = vld [vmem:[#allocation11 + $0xd0] sm:$0xff]   ;;  %v6571_v53 = vld [vmem:[#allocation11 + $0xd8] sm:$0xff]  }
0x1961   :  { %v4673_v57 = vpack.c.bf16 %v4655_v54, %v3980_v55  ;;  %v6570_v52 = vld [vmem:[#allocation11 + $0x90] sm:$0xff]   ;;  %v6572_v23 = vld [vmem:[#allocation11 + $0x98] sm:$0xff]   ;;  %v6573_v54 = vld [vmem:[#allocation11 + $0xe0] sm:$0xff]  }
0x1962   :  { %v6574_v55 = vld [vmem:[#allocation11 + $0xa0] sm:$0xff]  }
0x1963   :  { %6193 = vmatmul.mubr.bf16.vlgmr.msra.gmra.mrb[48].mxu0 %v4673_v57  ;;  %v6575_v57 = vld [vmem:[#allocation11 + $0xe8] sm:$0xff]  }
0x1964   :  { %5907 = vmatpush3.bf16.msra.mxu0 %v6566_v46 }
0x1965   :  { %5908 = vmatprep.subr.bf16.mxu0 %v6567_v47 }
0x1968   :  { %5909 = vmatpush3.bf16.msra.mxu0 %v6568_v10 }
0x1969   :  { %5910 = vmatprep.subr.bf16.mxu0 %v6569_v48 }
0x196c   :  { %5911 = vmatpush3.bf16.msra.mxu0 %v6570_v52  ;;  %v5591_v52 = vld [vmem:[%s7723_s16 + $0x1] ss:$0 sm:$0xff] }
0x196d   :  { %5912 = vmatprep.subr.bf16.mxu0 %v6571_v53 }
0x1970   :  { %5913 = vmatpush3.bf16.msra.mxu0 %v6572_v23 }
0x1971   :  { %5914 = vmatprep.subr.bf16.mxu0 %v6573_v54 }
0x1974   :  { %5915 = vmatpush3.bf16.msra.mxu0 %v6574_v55 }
0x1975   :  { %5916 = vmatprep.subr.bf16.mxu0 %v6575_v57 }
0x1a36   :  { %v4764_v2 = vpop.f32.mrb[48].mxu0 }
0x1a37   :  { %v4765_v51 = vadd.f32 %v5560_v58, %v4764_v2  ;;  %v6194_v25 = vpop.f32.mrb[49].mxu0  ;;  %v6577_v2 = vld [vmem:[#allocation11 + $0xf0] sm:$0xff]  }
0x1a38   :  { %v4767_v14 = vpop.f32.mrb[50].mxu0  ;;  %v6579_v25 = vld [vmem:[#allocation11 + $0xf8] sm:$0xff]  }
0x1a39   :  { %v4768_v42 = vadd.f32 %v5560_v58, %v4767_v14  ;;  %v6195_v59 = vpop.f32.mrb[51].mxu0  ;;  %v4771_v43 = vadd.f32 %v4765_v51, %v7442_v49  ;;  %v6576_v58 = vld [vmem:[#allocation11 + $0xa8] sm:$0xff]   ;;  %v6578_v51 = vld [vmem:[#allocation11 + $0xb0] sm:$0xff]   ;;  %v6580_v14 = vld [vmem:[#allocation11 + $0xb8] sm:$0xff]  }
0x1a3a   :  { %5917 = vmatpush3.bf16.msra.mxu0 %v6576_v58 }
0x1a3b   :  { %4777 = vadd.xlane.f32.xlu0 %v4771_v43  ;;  %v4772_v61 = vadd.f32 %v4768_v42, %v7444_v50  ;;  %v6549_v50 = vld [vmem:[#allocation10 + $0xa4] ss:$8 sps:$4 sm:$0xff]   ;;  %5918 = vmatprep.subr.bf16.mxu0 %v6577_v2  ;;  %v5573_v42 = vld [vmem:[%s7721_s14 + $0x2] sm:$0x3] }
0x1a3c   :  { %4930 = vmatprep.subr.bf16.mxu1 %v6549_v50  ;;  %v4839_v59 = vrot.slane %v5573_v42, %v7232_v35 }
0x1a3d   :  { %4779 = vadd.xlane.f32.xlu1 %v4772_v61  ;;  %4931 = vmatpush1.bf16.msra.mxu1 %v6547_v5 }
0x1a3e   :  { %4932 = vmatprep.subr.bf16.mxu1 %v6552_v6  ;;  %5919 = vmatpush3.bf16.msra.mxu0 %v6578_v51 }
0x1a3f   :  { %5920 = vmatprep.subr.bf16.mxu0 %v6579_v25 }
0x1a41   :  { %4933 = vmatpush1.bf16.msra.mxu1 %v6550_v39 }
0x1a42   :  { %4934 = vmatprep.subr.bf16.mxu1 %v6555_v8  ;;  %5921 = vmatpush3.bf16.msra.mxu0 %v6580_v14  ;;  %v6581_v14 = vld [vmem:[%s7726_s19] sm:$0xff]  }
0x1a45   :  { %4935 = vmatpush1.bf16.msra.mxu1 %v6553_v9 }
0x1a46   :  { %4936 = vmatprep.subr.bf16.mxu1 %v6558_v34 }
0x1a49   :  { %4937 = vmatpush1.bf16.msra.mxu1 %v6556_v11 }
0x1a4a   :  { %4938 = vmatprep.subr.bf16.mxu1 %v6561_v1 }
0x1a4d   :  { %4939 = vmatpush1.bf16.msra.mxu1 %v6559_v12 }
0x1a4e   :  { %4940 = vmatprep.subr.bf16.mxu1 %v6564_v13 }
0x1a51   :  { %4941 = vmatpush1.bf16.msra.mxu1 %v6562_v15 }
0x1a52   :  { %6196 = vmatprep.subr.bf16.mxu1 %v6868_v7 }
0x1ac8   :  { %v4778_v36 = vpop.xlane.xlu0 %4777 }
0x1ac9   :  { %v4781_v37 = vmul.f32 0.0078125, %v4778_v36 }
0x1aca   :  { %v4780_v0 = vpop.xlane.xlu1 %4779 }
0x1acb   :  { %v4783_v29 = vsub.f32 %v4771_v43, %v4781_v37  ;;  %v4782_v30 = vmul.f32 0.0078125, %v4780_v0  ;;  %v4843_v43 = vrot.slane %v5573_v42, %v7226_v32 }
0x1acd   :  { %v4784_v60 = vsub.f32 %v4772_v61, %v4782_v30  ;;  %v4785_v4 = vmul.f32 %v4783_v29, %v4783_v29 }
0x1acf   :  { %4787 = vadd.xlane.f32.xlu0 %v4785_v4  ;;  %v4786_v49 = vmul.f32 %v4784_v60, %v4784_v60 }
0x1ad3   :  { %4789 = vadd.xlane.f32.xlu0 %v4786_v49 }
0x1b5c   :  { %v4788_v16 = vpop.xlane.xlu0 %4787 }
0x1b5d   :  { %v4791_v17 = vmul.f32 0.0078125, %v4788_v16 }
0x1b5f   :  { %v4793_v18 = vadd.f32 1e-12, %v4791_v17 }
0x1b60   :  { %v4790_v19 = vpop.xlane.xlu0 %4789 }
0x1b61   :  { %6673 = vrsqrt.f32 %v4793_v18  ;;  %v4792_v20 = vmul.f32 0.0078125, %v4790_v19 }
0x1b63   :  { %v4794_v21 = vadd.f32 1e-12, %v4792_v20 }
0x1b65   :  { %6675 = vrsqrt.f32 %v4794_v21 }
0x1b6b   :  { %v6674_v22 = vpop.eup %6673 }
0x1b6c   :  { %v4797_v24 = vmul.f32 %v6674_v22, %v4783_v29 }
0x1b6e   :  { %v4805_v31 = vmul.f32 %v5571_v26, %v4797_v24 }
0x1b6f   :  { %v6676_v27 = vpop.eup %6675 }
0x1b70   :  { %v4798_v28 = vmul.f32 %v6676_v27, %v4784_v60  ;;  %v7633_v41 = vadd.f32 %v5572_v38, %v4805_v31 }
0x1b72   :  { %v4806_v40 = vmul.f32 %v5571_v26, %v4798_v28 }
0x1b74   :  { %v7635_v56 = vadd.f32 %v5572_v38, %v4806_v40 }
0x1b76   :  { %v4832_v44 = vpack.c.bf16 %v7635_v56, %v7633_v41 }
0x1b78   :  { %4959 = vmatmul.mubr.bf16.vlgmr.msra.gmra.mrb[64].mxu1 %v4832_v44 }
0x1b79   :  { %6212 = vmatprep.mubr.msk.bf16.mxu1 %vm6870_vm8, %v6868_v7  ;;  %6197 = vmatpush3.bf16.msra.mxu1 %v6581_v14 }
0x1b7a   :  { %6198 = vmatprep.subr.bf16.mxu1 %v6868_v7 }
0x1c4b   :  { %v4960_v61 = vpop.f32.mrb[64].mxu1 }
0x1c4c   :  { %v4961_v33 = vadd.f32 %v4960_v61, %v4839_v59  ;;  %v4962_v62 = vpop.f32.mrb[65].mxu1 }
0x1c4d   :  { %v4963_v3 = vadd.f32 %v4962_v62, %v4843_v43  ;;  %v4964_v63 = vpop.f32.mrb[66].mxu1 }
0x1c4e   :  { %v4969_v36 = vmul.f32 %v4961_v33, %v4961_v33  ;;  %v4965_v37 = vadd.f32 %v4964_v63, %v4839_v59  ;;  %v4966_v0 = vpop.f32.mrb[67].mxu1  ;;  %v6583_v63 = vld [vmem:[%s7726_s19 + $0x10] sm:$0xff]  }
0x1c4f   :  { %v4970_v29 = vmul.f32 %v4963_v3, %v4963_v3  ;;  %v4967_v30 = vadd.f32 %v4966_v0, %v4843_v43  ;;  %v6586_v0 = vld [vmem:[%s7726_s19 + $0x28] sm:$0xff]  }
0x1c50   :  { %v4973_v60 = vmul.f32 %v4969_v36, %v4961_v33  ;;  %v4971_v4 = vmul.f32 %v4965_v37, %v4965_v37  ;;  %v6584_v36 = vld [vmem:[%s7726_s19 + $0x18] sm:$0xff]  }
0x1c51   :  { %v4974_v49 = vmul.f32 %v4970_v29, %v4963_v3  ;;  %v4972_v50 = vmul.f32 %v4967_v30, %v4967_v30  ;;  %v6587_v29 = vld [vmem:[%s7726_s19 + $0x30] sm:$0xff]  }
0x1c52   :  { %v4977_v5 = vmul.f32 0.044715, %v4973_v60  ;;  %v4975_v6 = vmul.f32 %v4971_v4, %v4965_v37 }
0x1c53   :  { %v4978_v39 = vmul.f32 0.044715, %v4974_v49  ;;  %v4976_v35 = vmul.f32 %v4972_v50, %v4967_v30 }
0x1c54   :  { %v4981_v8 = vadd.f32 %v4977_v5, %v4961_v33  ;;  %v4979_v32 = vmul.f32 0.044715, %v4975_v6 }
0x1c55   :  { %v4982_v9 = vadd.f32 %v4978_v39, %v4963_v3  ;;  %v4980_v34 = vmul.f32 0.044715, %v4976_v35 }
0x1c56   :  { %v4985_v11 = vmul.f32 0.7978846, %v4981_v8  ;;  %v4983_v1 = vadd.f32 %v4979_v32, %v4965_v37  ;;  %v5610_v32 = vld [vmem:[%s7724_s17 + $0x1] ss:$0 sm:$0xff] }
0x1c57   :  { %v4986_v12 = vmul.f32 0.7978846, %v4982_v9  ;;  %v4984_v13 = vadd.f32 %v4980_v34, %v4967_v30 }
0x1c58   :  { %6677 = vtanh.f32 %v4985_v11  ;;  %v4987_v15 = vmul.f32 0.7978846, %v4983_v1  ;;  %v5611_v1 = vld [vmem:[%s7725_s18 + $0x1] ss:$0 sm:$0xff]  ;;  %s7763_s18 = sld [smem:[#allocation26_spill]] }
0x1c59   :  { %6679 = vtanh.f32 %v4986_v12  ;;  %v4988_v16 = vmul.f32 0.7978846, %v4984_v13 }
0x1c5a   :  { %6681 = vtanh.f32 %v4987_v15 }
0x1c5b   :  { %6683 = vtanh.f32 %v4988_v16 }
0x1c62   :  { %v6678_v17 = vpop.eup %6677 }
0x1c63   :  { %v6680_v18 = vpop.eup %6679  ;;  %v4993_v19 = vadd.f32 1.0, %v6678_v17 }
0x1c64   :  { %v6682_v20 = vpop.eup %6681  ;;  %v4994_v21 = vadd.f32 1.0, %v6680_v18  ;;  %v5612_v18 = vld [vmem:[%s7727_s20] ss:$0 sm:$0xff]  ;;  %s6823_s20 = scalar_lea.vmem %s5361_s11, 32 }
0x1c65   :  { %v6684_v22 = vpop.eup %6683  ;;  %v4997_v24 = vmul.f32 0.5, %v4993_v19  ;;  %v4995_v26 = vadd.f32 1.0, %v6682_v20  ;;  %p6824_p6 = scmp.ne.s32.totalorder %s5361_s11, %s6823_s20  ;;  %p6829_p8 = scmp.lt.s32.totalorder %s6823_s20, %s6823_s20 }
0x1c66   :  { %v4996_v27 = vadd.f32 1.0, %v6684_v22  ;;  %v4998_v28 = vmul.f32 0.5, %v4994_v21 }
0x1c67   :  { %v4999_v31 = vmul.f32 0.5, %v4995_v26  ;;  %v5001_v40 = vmul.f32 %v4997_v24, %v4961_v33  ;;  %v5347_v26 = vld [vmem:[%s7763_s18] sm:$0x3]  ;;  %p6830_p9 = por %p6829_p8, %p6828_p7 }
0x1c68   :  { %v5000_v38 = vmul.f32 0.5, %v4996_v27  ;;  %v5002_v45 = vmul.f32 %v4998_v28, %v4963_v3  ;;  %vm5348_vm12 = vcmp.ge.f32.partialorder %v5347_v26, 0.2 }
0x1c69   :  { %v5003_v44 = vmul.f32 %v4999_v31, %v4965_v37  ;;  %v6585_v37 = vld [vmem:[%s7726_s19 + $0x20] sm:$0xff]   ;;  %v5621_v27 = vsel %vm5348_vm12, 1.0, %v6868_v7  ;;  %p6831_p10 = pnand %p6830_p9, %p6824_p6 }
0x1c6a   :  { %v5004_v46 = vmul.f32 %v5000_v38, %v4967_v30  ;;  %v6588_v30 = vld [vmem:[%s7726_s19 + $0x38] sm:$0xff]  }
0x1c6b   :  { %v5038_v47 = vpack.c.bf16 %v5003_v44, %v5001_v40 }
0x1c6c   :  { %v5039_v10 = vpack.c.bf16 %v5004_v46, %v5002_v45 }
0x1c6e   :  { %5176 = vmatprep.mubr.bf16.mxu0 %v5039_v10 }
0x1c6f   :  { %5177 = vmatmul.mubr.bf16.vlgmr.msra.gmra.mrb[52].mxu0 %v5038_v47 }
0x1d42   :  { %v5922_v48 = vpop.f32.mrb[52].mxu0 }
0x1d43   :  { %v5923_v53 = vpop.f32.mrb[53].mxu0 }
0x1d44   :  { %v5924_v23 = vadd.f32 %v5923_v53, %v5922_v48  ;;  %v5925_v54 = vpop.f32.mrb[54].mxu0 }
0x1d45   :  { %v5926_v55 = vpop.f32.mrb[55].mxu0 }
0x1d46   :  { %v5179_v57 = vadd.f32 %v5924_v23, %v5591_v52  ;;  %v5927_v58 = vadd.f32 %v5926_v55, %v5925_v54 }
0x1d48   :  { %v5182_v2 = vadd.f32 %v5927_v58, %v5591_v52  ;;  %v5185_v51 = vadd.f32 %v5179_v57, %v7633_v41 }
0x1d4a   :  { %5191 = vadd.xlane.f32.xlu0 %v5185_v51  ;;  %v5186_v25 = vadd.f32 %v5182_v2, %v7635_v56  ;;  %v6582_v56 = vld [vmem:[%s7726_s19 + $0x8] sm:$0xff]  }
0x1d4b   :  { %6199 = vmatpush3.bf16.msra.mxu1 %v6582_v56 }
0x1d4c   :  { %5193 = vadd.xlane.f32.xlu1 %v5186_v25  ;;  %6200 = vmatprep.subr.bf16.mxu1 %v6868_v7 }
0x1d4f   :  { %6201 = vmatpush3.bf16.msra.mxu1 %v6583_v63 }
0x1d50   :  { %6202 = vmatprep.subr.bf16.mxu1 %v6868_v7 }
0x1d53   :  { %6203 = vmatpush3.bf16.msra.mxu1 %v6584_v36 }
0x1d54   :  { %6204 = vmatprep.subr.bf16.mxu1 %v6868_v7 }
0x1d57   :  { %6205 = vmatpush3.bf16.msra.mxu1 %v6585_v37 }
0x1d58   :  { %6206 = vmatprep.subr.bf16.mxu1 %v6868_v7 }
0x1d5b   :  { %6207 = vmatpush3.bf16.msra.mxu1 %v6586_v0 }
0x1d5c   :  { %6208 = vmatprep.subr.bf16.mxu1 %v6868_v7 }
0x1d5f   :  { %6209 = vmatpush3.bf16.msra.mxu1 %v6587_v29 }
0x1d60   :  { %6210 = vmatprep.subr.bf16.mxu1 %v6868_v7 }
0x1d63   :  { %6211 = vmatpush3.bf16.msra.mxu1 %v6588_v30 }
0x1dd7   :  { %v5192_v42 = vpop.xlane.xlu0 %5191 }
0x1dd8   :  { %v5195_v59 = vmul.f32 0.0078125, %v5192_v42 }
0x1dd9   :  { %v5194_v43 = vpop.xlane.xlu1 %5193 }
0x1dda   :  { %v5197_v61 = vsub.f32 %v5185_v51, %v5195_v59  ;;  %v5196_v33 = vmul.f32 0.0078125, %v5194_v43 }
0x1ddc   :  { %v5198_v62 = vsub.f32 %v5186_v25, %v5196_v33  ;;  %v5199_v3 = vmul.f32 %v5197_v61, %v5197_v61 }
0x1dde   :  { %5201 = vadd.xlane.f32.xlu0 %v5199_v3  ;;  %v5200_v41 = vmul.f32 %v5198_v62, %v5198_v62 }
0x1de0   :  { %5203 = vadd.xlane.f32.xlu1 %v5200_v41 }
0x1e6b   :  { %v5202_v60 = vpop.xlane.xlu0 %5201 }
0x1e6c   :  { %v5205_v4 = vmul.f32 0.0078125, %v5202_v60 }
0x1e6d   :  { %v5204_v49 = vpop.xlane.xlu1 %5203 }
0x1e6e   :  { %v5207_v50 = vadd.f32 1e-12, %v5205_v4  ;;  %v5206_v5 = vmul.f32 0.0078125, %v5204_v49 }
0x1e70   :  { %6685 = vrsqrt.f32 %v5207_v50  ;;  %v5208_v6 = vadd.f32 1e-12, %v5206_v5 }
0x1e72   :  { %6687 = vrsqrt.f32 %v5208_v6 }
0x1e7a   :  { %v6686_v39 = vpop.eup %6685 }
0x1e7b   :  { %v5211_v35 = vmul.f32 %v6686_v39, %v5197_v61 }
0x1e7c   :  { %v6688_v8 = vpop.eup %6687 }
0x1e7d   :  { %v5212_v9 = vmul.f32 %v6688_v8, %v5198_v62  ;;  %v5219_v34 = vmul.f32 %v5610_v32, %v5211_v35 }
0x1e7f   :  { %v5220_v11 = vmul.f32 %v5610_v32, %v5212_v9  ;;  %v5227_v13 = vadd.f32 %v5611_v1, %v5219_v34 }
0x1e81   :  { %v5228_v12 = vadd.f32 %v5611_v1, %v5220_v11 }
0x1e83   :  { %v5230_v15 = vrot.slane %v5228_v12, 7 }
0x1e85   :  { %v5233_v16 = vsel %vm5232_vm0, %v5227_v13, %v5230_v15 }
0x1e86   :  { %v5250_v17 = vpack.c.bf16 %v5233_v16, %v5233_v16 }
0x1e88   :  { %6213 = vmatmul.mubr.bf16.vlgmr.msra.gmra.mrb[68].mxu1 %v5250_v17 }
0x1f5b   :  { %v5340_v19 = vpop.f32.mrb[68].mxu1 }
0x1f5c   :  { %v5341_v20 = vadd.f32 %v5612_v18, %v5340_v19  ;;  %v6214_v21 = vpop.f32.mrb[69].mxu1 }
0x1f5d   :  { %v5343_v22 = vpop.f32.mrb[70].mxu1 }
0x1f5e   :  { %6689 = vtanh.f32 %v5341_v20  ;;  %v6215_v24 = vpop.f32.mrb[71].mxu1 }
0x1f68   :  { %v6690_v28 = vpop.eup %6689 }
0x1f69   :  { %v5351_v31 = vmul.f32 %v6690_v28, %v5621_v27 }
0x1f6b   :  { %v5352_v38 = vmul.f32 1.25, %v5351_v31 }
0x1f6d   :  { %5353 = vst [vmem:[#allocation13] sm:$0x3] %v5352_v38 }
0x1f6e   :  { %6834 = shalt.err (!%p6831_p10)
}
0x1f6f   :  { %s7764_s6 = sld [smem:[#allocation27_spill]] }
0x1f75   :  { %s6835_s26 = scalar_lea.hbm %s7764_s6, 32 }
0x1f76   :  { %p6836_p11 = scmp.ne.s32.totalorder %s7764_s6, %s6835_s26  ;;  %p6839_p12 = scmp.lt.u32.totalorder %s6835_s26, %s7764_s6 }
0x1f78   :  { %p6841_p13 = pnand %p6839_p12, %p6836_p11 }
0x1f7a   :  { %6844 = shalt.err (!%p6841_p13)
}
0x1f7b   :  { %5363 = dma.vmem_to_hbm [thread:$0]  %s5361_s11, 32, %s7764_s6, [#allocation4]  }
0x1f7c   :  { %6853 = dma.done.wait [#allocation4], 32  }
0x1f7d   :  { %6854 = vsyncadd [#allocation4], 4294967264 }
0x1f7e   :  { %5367 = vsyncpa [#allocation3], 1 }
0x1f7f   :  { %5368 = vsyncpa [#allocation6], 1 }
0x1f80   :  { %5369 = vsyncpa [#allocation9], 1 }
0x1f81   :  { %5370 = vsyncpa [#allocation12], 1 }
0x1f82   :  { %5371 = vsyncpa [#allocation4], 1 }

</bundles_post_ra>
